<compile_context>
chip_gen: v6e
topology: v6e:2x2x1
jax: 0.10.0
libtpu: 0.0.40
codegen_flags: <defaults>
</compile_context>

<pallas_src>
import functools

import jax
import jax.numpy as jnp
import numpy as np
from jax.experimental import pallas as pl
from jax.experimental.pallas import tpu as pltpu

BN_EPS = 1e-5
MATMUL_DTYPE = jnp.bfloat16       # MXU input dtype; fp32 accumulation everywhere.
ROW_TILE = 256                    # target rows per tile. Production: 512-1024
                                  # (halve on v7x: 64 MiB VMEM). Kept small here
                                  # so the toy test still exercises a >1 grid.
VMEM_LIMIT = 48 * 1024 * 1024     # explicit scoped-VMEM budget (fits v7x).


def _compiler_params(semantics):
    return pltpu.CompilerParams(dimension_semantics=semantics,
                                vmem_limit_bytes=VMEM_LIMIT)


def _choose_row_tile(m, target=ROW_TILE):
    """Largest divisor of m that is <= target and sublane aligned (mult. of 8).

    Falls back to a single full-extent block, which is always BlockSpec-legal.
    """
    if m <= target:
        return m
    for t in range(target, 7, -1):
        if t % 8 == 0 and m % t == 0:
            return t
    return m


# ----------------------------------------------------------------------------
# Kernel 1: tiled matmul (1x1 conv) + per-tile BN partial statistics.
# Optionally fuses the *previous* layer's BN + ReLU onto its input
# (pre_bn_relu), avoiding an HBM round-trip of the normalized activation.
# ----------------------------------------------------------------------------
def _matmul_stats_kernel(*refs, pre_bn_relu):
    if pre_bn_relu:
        x_ref, w_ref, psc_ref, psh_ref, y_ref, stats_ref = refs
        x = x_ref[...] * psc_ref[...] + psh_ref[...]         # fp32 BN affine
        x = jnp.maximum(x, 0.0).astype(w_ref.dtype)          # ReLU, cast for MXU
    else:
        x_ref, w_ref, y_ref, stats_ref = refs
        x = x_ref[...]
    y = jnp.dot(x, w_ref[...], preferred_element_type=jnp.float32)
    y_ref[...] = y
    # one-pass per-tile partials (fp32): [sum, sum of squares] per channel
    stats_ref[0, 0:1, :] = jnp.sum(y, axis=0, keepdims=True)
    stats_ref[0, 1:2, :] = jnp.sum(y * y, axis=0, keepdims=True)


def matmul_stats(x2d, w, pre_scale=None, pre_shift=None):
    m, k = x2d.shape
    c = w.shape[1]
    tm = _choose_row_tile(m)
    n_t = m // tm
    pre = pre_scale is not None
    kernel = functools.partial(_matmul_stats_kernel, pre_bn_relu=pre)

    in_specs = [pl.BlockSpec((tm, k), lambda i: (i, 0)),
                pl.BlockSpec((k, c), lambda i: (0, 0))]       # weight stays resident
    args = [x2d, w]
    if pre:
        in_specs += [pl.BlockSpec((1, k), lambda i: (0, 0)),
                     pl.BlockSpec((1, k), lambda i: (0, 0))]
        args += [pre_scale, pre_shift]

    cost = pl.CostEstimate(
        flops=2 * m * k * c + 4 * m * c, transcendentals=0,
        bytes_accessed=x2d.size * x2d.dtype.itemsize
        + w.size * w.dtype.itemsize + m * c * 4 + n_t * 2 * c * 4)

    y, stats = pl.pallas_call(
        kernel,
        grid=(n_t,),
        in_specs=in_specs,
        out_specs=(pl.BlockSpec((tm, c), lambda i: (i, 0)),
                   pl.BlockSpec((1, 2, c), lambda i: (i, 0, 0))),
        out_shape=(jax.ShapeDtypeStruct((m, c), jnp.float32),
                   jax.ShapeDtypeStruct((n_t, 2, c), jnp.float32)),
        compiler_params=_compiler_params(("parallel",)),
        cost_estimate=cost,
    )(*args)
    return y, stats


# ----------------------------------------------------------------------------
# Kernel 2: 3x3 conv (stride s, pad pre-applied) + per-tile BN partials.
# Input is a polyphase view  xph[n, p*s+q, i, j, c] = x_pad[n, i*s+p, j*s+q, c]
# so every tap (dy, dx) is a contiguous (tho, Wo, C) window: no im2col in HBM
# and no strided in-kernel loads.  9 accumulated MXU matmuls, fp32 accumulator.
# ----------------------------------------------------------------------------
def _conv3x3_stats_kernel(xph_ref, w_ref, y_ref, stats_ref, *, stride, tho, wo):
    t = pl.program_id(1)
    c_in = xph_ref.shape[-1]
    c_out = w_ref.shape[-1]
    acc = jnp.zeros((tho * wo, c_out), jnp.float32)
    for dy in range(3):
        for dx in range(3):
            pq = (dy % stride) * stride + (dx % stride)       # phase index
            oi, oj = dy // stride, dx // stride               # in-phase offsets
            tap = xph_ref[0, pq, pl.ds(t * tho + oi, tho), pl.ds(oj, wo), :]
            acc = acc + jnp.dot(tap.reshape(tho * wo, c_in), w_ref[dy, dx],
                                preferred_element_type=jnp.float32)
    y_ref[...] = acc
    stats_ref[0, 0:1, :] = jnp.sum(acc, axis=0, keepdims=True)
    stats_ref[0, 1:2, :] = jnp.sum(acc * acc, axis=0, keepdims=True)


def _choose_ho_tile(ho, wo, target=ROW_TILE):
    for t in range(ho, 0, -1):
        if ho % t == 0 and (t * wo) % 8 == 0 and t * wo <= target:
            return t
    return ho  # fallback: one tile of output rows per image


def conv3x3_stats(xph, w_taps, stride, ho, wo):
    n_img, n_phase, hs, ws, c_in = xph.shape
    c_out = w_taps.shape[-1]
    tho = _choose_ho_tile(ho, wo)
    n_t = ho // tho
    m2 = n_img * ho * wo
    assert (tho * wo) % 8 == 0 or n_img * n_t == 1, "row tile not sublane aligned"
    kernel = functools.partial(_conv3x3_stats_kernel, stride=stride, tho=tho, wo=wo)

    cost = pl.CostEstimate(
        flops=2 * m2 * 9 * c_in * c_out + 4 * m2 * c_out, transcendentals=0,
        bytes_accessed=xph.size * xph.dtype.itemsize
        + w_taps.size * w_taps.dtype.itemsize + m2 * c_out * 4)

    y, stats = pl.pallas_call(
        kernel,
        grid=(n_img, n_t),
        in_specs=[
            # whole (phased) image per n; re-DMA'd only when the n index changes
            pl.BlockSpec((1, n_phase, hs, ws, c_in),
                         lambda i, t: (i, 0, 0, 0, 0)),
            pl.BlockSpec((3, 3, c_in, c_out), lambda i, t: (0, 0, 0, 0)),
        ],
        out_specs=(pl.BlockSpec((tho * wo, c_out), lambda i, t: (i * n_t + t, 0)),
                   pl.BlockSpec((1, 2, c_out), lambda i, t: (i * n_t + t, 0, 0))),
        out_shape=(jax.ShapeDtypeStruct((m2, c_out), jnp.float32),
                   jax.ShapeDtypeStruct((n_img * n_t, 2, c_out), jnp.float32)),
        compiler_params=_compiler_params(("parallel", "parallel")),
        cost_estimate=cost,
    )(xph, w_taps)
    return y, stats


# ----------------------------------------------------------------------------
# Kernel 3: tiled BN apply (+ optional normalized residual) + ReLU.
#   out = relu(y*scale + shift [+ r*rscale + rshift])
# scale/shift are precomputed per channel from globally reduced stats, so this
# is a pure streaming elementwise pass.
# ----------------------------------------------------------------------------
def _bn_act_kernel(*refs, has_residual, apply_relu):
    if has_residual:
        y_ref, sc_ref, sh_ref, r_ref, rsc_ref, rsh_ref, o_ref = refs
    else:
        y_ref, sc_ref, sh_ref, o_ref = refs
    out = y_ref[...] * sc_ref[...] + sh_ref[...]
    if has_residual:
        out = out + r_ref[...] * rsc_ref[...] + rsh_ref[...]
    if apply_relu:
        out = jnp.maximum(out, 0.0)
    o_ref[...] = out.astype(o_ref.dtype)


def bn_act(y, scale, shift, residual=None, apply_relu=True, out_dtype=jnp.float32):
    m, c = y.shape
    tm = _choose_row_tile(m)
    has_res = residual is not None
    kernel = functools.partial(_bn_act_kernel, has_residual=has_res,
                               apply_relu=apply_relu)
    row = pl.BlockSpec((tm, c), lambda i: (i, 0))
    vec = pl.BlockSpec((1, c), lambda i: (0, 0))
    in_specs = [row, vec, vec]
    args = [y, scale, shift]
    if has_res:
        r, rsc, rsh = residual
        in_specs += [row, vec, vec]
        args += [r, rsc, rsh]
    return pl.pallas_call(
        kernel,
        grid=(m // tm,),
        in_specs=in_specs,
        out_specs=row,
        out_shape=jax.ShapeDtypeStruct((m, c), out_dtype),
        compiler_params=_compiler_params(("parallel",)),
    )(*args)


# ----------------------------------------------------------------------------
# Plain-JAX glue.
# ----------------------------------------------------------------------------
def _bn_scale_shift(stats, m_rows, gamma, beta):
    """Fold global batch mean/var and gamma/beta into per-channel scale/shift."""
    tot = jnp.sum(stats, axis=0)                     # (2, C): [sum, sum_sq]
    mean = tot[0] / m_rows
    var = tot[1] / m_rows - mean * mean              # biased variance (train mode)
    scale = gamma.reshape(-1) * jax.lax.rsqrt(var + BN_EPS)
    shift = beta.reshape(-1) - mean * scale
    return scale.reshape(1, -1), shift.reshape(1, -1)


def _to_phases(xp, s):
    """(N,Hp,Wp,C) -> (N, s*s, ceil(Hp/s), ceil(Wp/s), C) polyphase view."""
    n, hp, wp, c = xp.shape
    hs, ws = -(-hp // s), -(-wp // s)
    xp = jnp.pad(xp, ((0, 0), (0, hs * s - hp), (0, ws * s - wp), (0, 0)))
    xp = xp.reshape(n, hs, s, ws, s, c)
    xp = jnp.transpose(xp, (0, 2, 4, 1, 3, 5))       # (N, s, s, Hs, Ws, C)
    return xp.reshape(n, s * s, hs, ws, c)


def bottleneck_forward(x_nchw, params, stride):
    """BottleNeck.forward with training-mode (batch-statistics) BatchNorm."""
    n, c_in, h, w = x_nchw.shape
    c1 = params["w1"].shape[0]                       # out_channels
    c4 = params["w3"].shape[0]                       # out_channels * expansion
    ho = (h + 2 - 3) // stride + 1
    wo = (w + 2 - 3) // stride + 1
    m1, m2 = n * h * w, n * ho * wo

    xh = jnp.transpose(x_nchw, (0, 2, 3, 1))         # NHWC, fp32
    x2d = xh.reshape(m1, c_in)

    # conv1 (1x1) -> BN1 -> ReLU
    w1 = params["w1"].reshape(c1, c_in).T.astype(MATMUL_DTYPE)
    y1, st1 = matmul_stats(x2d.astype(MATMUL_DTYPE), w1)
    sc1, sh1 = _bn_scale_shift(st1, m1, params["g1"], params["b1"])
    h1 = bn_act(y1, sc1, sh1, out_dtype=MATMUL_DTYPE)                # (M1, C1) bf16

    # conv2 (3x3, stride, pad=1) -> BN2 -> ReLU (BN2+ReLU fused into conv3)
    h1p = jnp.pad(h1.reshape(n, h, w, c1), ((0, 0), (1, 1), (1, 1), (0, 0)))
    h1ph = _to_phases(h1p, stride)
    w2 = jnp.transpose(params["w2"], (2, 3, 1, 0)).astype(MATMUL_DTYPE)
    y2, st2 = conv3x3_stats(h1ph, w2, stride, ho, wo)                # (M2, C1) f32
    sc2, sh2 = _bn_scale_shift(st2, m2, params["g2"], params["b2"])

    # conv3 (1x1 expand), input pre-normalized (BN2 + ReLU) inside the kernel
    w3 = params["w3"].reshape(c4, c1).T.astype(MATMUL_DTYPE)
    y3, st3 = matmul_stats(y2, w3, pre_scale=sc2, pre_shift=sh2)     # (M2, C4)
    sc3, sh3 = _bn_scale_shift(st3, m2, params["g3"], params["b3"])

    # shortcut branch
    if stride != 1 or c_in != c4:
        xs = xh[:, ::stride, ::stride, :][:, :ho, :wo, :].reshape(m2, c_in)
        wsc = params["wsc"].reshape(c4, c_in).T.astype(MATMUL_DTYPE)
        ysc, stsc = matmul_stats(xs.astype(MATMUL_DTYPE), wsc)
        sc_s, sh_s = _bn_scale_shift(stsc, m2, params["gsc"], params["bsc"])
    else:
        ysc = x2d                                                    # identity
        sc_s = jnp.ones((1, c4), jnp.float32)
        sh_s = jnp.zeros((1, c4), jnp.float32)

    # final fused pass: BN3(y3) + BN_sc(shortcut) -> ReLU
    out2d = bn_act(y3, sc3, sh3, residual=(ysc, sc_s, sh_s),
                   out_dtype=jnp.float32)
    return jnp.transpose(out2d.reshape(n, ho, wo, c4), (0, 3, 1, 2))


# ----------------------------------------------------------------------------
# Pure-JAX reference (lax.conv) with the same bf16-matmul / fp32-BN recipe.
# ----------------------------------------------------------------------------
def bottleneck_reference(x_nchw, params, stride):
    xh = jnp.transpose(x_nchw, (0, 2, 3, 1))

    def conv(a, w_oikk, s, pad):
        return jax.lax.conv_general_dilated(
            a.astype(MATMUL_DTYPE),
            jnp.transpose(w_oikk, (2, 3, 1, 0)).astype(MATMUL_DTYPE),
            (s, s), [(pad, pad), (pad, pad)],
            dimension_numbers=("NHWC", "HWIO", "NHWC"),
            preferred_element_type=jnp.float32)

    def bn(y, g, b):
        m = jnp.mean(y, axis=(0, 1, 2))
        v = jnp.mean(y * y, axis=(0, 1, 2)) - m * m
        sc = g.reshape(-1) * jax.lax.rsqrt(v + BN_EPS)
        return y * sc + (b.reshape(-1) - m * sc)

    h1 = jax.nn.relu(bn(conv(xh, params["w1"], 1, 0), params["g1"], params["b1"]))
    h2 = jax.nn.relu(bn(conv(h1, params["w2"], stride, 1), params["g2"], params["b2"]))
    r3 = bn(conv(h2, params["w3"], 1, 0), params["g3"], params["b3"])
    if "wsc" in params:
        sc = bn(conv(xh, params["wsc"], stride, 0), params["gsc"], params["bsc"])
    else:
        sc = xh
    return jnp.transpose(jax.nn.relu(r3 + sc), (0, 3, 1, 2))


def init_params(key, in_channels, out_channels, stride):
    c1, c4 = out_channels, out_channels * 4
    ks = jax.random.split(key, 12)

    def conv_w(k, co, ci, kh, kw):
        return jax.random.normal(k, (co, ci, kh, kw), jnp.float32) * 0.1

    def bn_p(kg, kb, c):
        return (1.0 + 0.1 * jax.random.normal(kg, (c,), jnp.float32),
                0.1 * jax.random.normal(kb, (c,), jnp.float32))

    p = {"w1": conv_w(ks[0], c1, in_channels, 1, 1),
         "w2": conv_w(ks[1], c1, c1, 3, 3),
         "w3": conv_w(ks[2], c4, c1, 1, 1)}
    p["g1"], p["b1"] = bn_p(ks[3], ks[4], c1)
    p["g2"], p["b2"] = bn_p(ks[5], ks[6], c1)
    p["g3"], p["b3"] = bn_p(ks[7], ks[8], c4)
    if stride != 1 or in_channels != c4:
        p["wsc"] = conv_w(ks[9], c4, in_channels, 1, 1)
        p["gsc"], p["bsc"] = bn_p(ks[10], ks[11], c4)
    return p


if __name__ == "__main__":
    fwd = jax.jit(bottleneck_forward, static_argnums=2)
    key = jax.random.PRNGKey(0)
    k1, k2, k3, k4 = jax.random.split(key, 4)

    # Case 1: projection shortcut (stride=2, channel expansion 16 -> 32).
    n, c_in, h, w, c_mid, stride = 2, 16, 16, 16, 8, 2
    x = jax.random.normal(k1, (n, c_in, h, w), jnp.float32)
    params = init_params(k2, c_in, c_mid, stride)
    out = jax.block_until_ready(fwd(x, params, stride))
    ref = bottleneck_reference(x, params, stride)
    assert out.shape == (n, 4 * c_mid, h // stride, w // stride)
    np.testing.assert_allclose(np.asarray(out), np.asarray(ref),
                               atol=1e-2, rtol=1e-2)

    # Case 2: identity shortcut (stride=1, in_channels == out_channels*4).
    n, c_in, h, w, c_mid, stride = 2, 32, 16, 16, 8, 1
    x = jax.random.normal(k3, (n, c_in, h, w), jnp.float32)
    params = init_params(k4, c_in, c_mid, stride)
    out = jax.block_until_ready(fwd(x, params, stride))
    ref = bottleneck_reference(x, params, stride)
    assert out.shape == (n, 4 * c_mid, h, w)
    np.testing.assert_allclose(np.asarray(out), np.asarray(ref),
                               atol=1e-2, rtol=1e-2)

    print("KERNEL_OK")
</pallas_src>

<mosaic_0001>
module attributes {stable_mosaic.version = 11 : i64} {
  func.func @_matmul_stats_kernel(%arg0: i32, %arg1: memref<128x16xbf16, #tpu.memory_space<vmem>>, %arg2: memref<16x32xbf16, #tpu.memory_space<vmem>>, %arg3: memref<128x32xf32, #tpu.memory_space<vmem>>, %arg4: memref<1x2x32xf32, #tpu.memory_space<vmem>>) attributes {dimension_semantics = [#tpu.dimension_semantics<parallel>], iteration_bounds = array<i64: 1>, scalar_prefetch = 0 : i64, scratch_operands = 0 : i64, tpu.core_type = #tpu.core_type<tc>, window_params = [{transform_indices = @transform_0, window_bounds = array<i64: 128, 16>}, {pipeline_mode = #tpu.pipeline_mode<synchronous>, transform_indices = @transform_1, window_bounds = array<i64: 16, 32>}, {transform_indices = @transform_2, window_bounds = array<i64: 128, 32>}, {transform_indices = @transform_3, window_bounds = array<i64: 1, 2, 32>}]} {
    %c0 = arith.constant 0 : index
    %c0_0 = arith.constant 0 : index
    %0 = vector.load %arg1[%c0, %c0_0] : memref<128x16xbf16, #tpu.memory_space<vmem>>, vector<128x16xbf16>
    %c0_1 = arith.constant 0 : index
    %c0_2 = arith.constant 0 : index
    %1 = vector.load %arg2[%c0_1, %c0_2] : memref<16x32xbf16, #tpu.memory_space<vmem>>, vector<16x32xbf16>
    %cst = arith.constant dense<0.000000e+00> : vector<128x32xf32>
    %2 = tpu.matmul %0, %1, %cst {dimension_numbers = #tpu.dot_dimension_numbers<[1], [0], [0], [1], [0, 0, 1, 1], [], []>} : vector<128x16xbf16>, vector<16x32xbf16>, vector<128x32xf32> -> vector<128x32xf32>
    %c0_3 = arith.constant 0 : index
    %c0_4 = arith.constant 0 : index
    %3 = vector.load %arg3[%c0_3, %c0_4] : memref<128x32xf32, #tpu.memory_space<vmem>>, vector<128x32xf32>
    tpu.vector_store %arg3[%c0_3, %c0_4], %2 {strides = array<i32>} : memref<128x32xf32, #tpu.memory_space<vmem>>, vector<128x32xf32>,
    %cst_5 = arith.constant dense<0.000000e+00> : vector<32xf32>
    %4 = vector.multi_reduction <add>, %2, %cst_5 [0] : vector<128x32xf32> to vector<32xf32>
    %5 = vector.shape_cast %4 : vector<32xf32> to vector<1x32xf32>
    %c0_6 = arith.constant 0 : index
    %c0_7 = arith.constant 0 : index
    %c0_8 = arith.constant 0 : index
    %6 = vector.load %arg4[%c0_6, %c0_7, %c0_8] : memref<1x2x32xf32, #tpu.memory_space<vmem>>, vector<1x1x32xf32>
    %7 = vector.shape_cast %6 : vector<1x1x32xf32> to vector<1x32xf32>
    %8 = vector.shape_cast %5 : vector<1x32xf32> to vector<1x1x32xf32>
    tpu.vector_store %arg4[%c0_6, %c0_7, %c0_8], %8 {strides = array<i32>} : memref<1x2x32xf32, #tpu.memory_space<vmem>>, vector<1x1x32xf32>,
    %9 = arith.mulf %2, %2 : vector<128x32xf32>
    %cst_9 = arith.constant dense<0.000000e+00> : vector<32xf32>
    %10 = vector.multi_reduction <add>, %9, %cst_9 [0] : vector<128x32xf32> to vector<32xf32>
    %11 = vector.shape_cast %10 : vector<32xf32> to vector<1x32xf32>
    %c0_10 = arith.constant 0 : index
    %c1 = arith.constant 1 : index
    %c0_11 = arith.constant 0 : index
    %12 = vector.load %arg4[%c0_10, %c1, %c0_11] : memref<1x2x32xf32, #tpu.memory_space<vmem>>, vector<1x1x32xf32>
    %13 = vector.shape_cast %12 : vector<1x1x32xf32> to vector<1x32xf32>
    %14 = vector.shape_cast %11 : vector<1x32xf32> to vector<1x1x32xf32>
    tpu.vector_store %arg4[%c0_10, %c1, %c0_11], %14 {strides = array<i32>} : memref<1x2x32xf32, #tpu.memory_space<vmem>>, vector<1x1x32xf32>,
    return
  }
  func.func @transform_0(%arg0: i32) -> (i32, i32) {
    %c0_i32 = arith.constant 0 : i32
    %c0_i32_0 = arith.constant 0 : i32
    return %arg0, %c0_i32 : i32, i32
  }
  func.func @transform_1(%arg0: i32) -> (i32, i32) {
    %c0_i32 = arith.constant 0 : i32
    %c0_i32_0 = arith.constant 0 : i32
    %c0_i32_1 = arith.constant 0 : i32
    return %c0_i32, %c0_i32_0 : i32, i32
  }
  func.func @transform_2(%arg0: i32) -> (i32, i32) {
    %c0_i32 = arith.constant 0 : i32
    %c0_i32_0 = arith.constant 0 : i32
    return %arg0, %c0_i32 : i32, i32
  }
  func.func @transform_3(%arg0: i32) -> (i32, i32, i32) {
    %c0_i32 = arith.constant 0 : i32
    %c0_i32_0 = arith.constant 0 : i32
    %c0_i32_1 = arith.constant 0 : i32
    return %arg0, %c0_i32, %c0_i32_0 : i32, i32, i32
  }
}

module attributes {stable_mosaic.version = 11 : i64} {
  func.func @_bn_act_kernel(%arg0: i32, %arg1: memref<256x8xf32, #tpu.memory_space<vmem>>, %arg2: memref<1x8xf32, #tpu.memory_space<vmem>>, %arg3: memref<1x8xf32, #tpu.memory_space<vmem>>, %arg4: memref<256x8xbf16, #tpu.memory_space<vmem>>) attributes {dimension_semantics = [#tpu.dimension_semantics<parallel>], iteration_bounds = array<i64: 2>, scalar_prefetch = 0 : i64, scratch_operands = 0 : i64, tpu.core_type = #tpu.core_type<tc>, window_params = [{transform_indices = @transform_0, window_bounds = array<i64: 256, 8>}, {pipeline_mode = #tpu.pipeline_mode<synchronous>, transform_indices = @transform_1, window_bounds = array<i64: 1, 8>}, {pipeline_mode = #tpu.pipeline_mode<synchronous>, transform_indices = @transform_2, window_bounds = array<i64: 1, 8>}, {transform_indices = @transform_3, window_bounds = array<i64: 256, 8>}]} {
    %c0 = arith.constant 0 : index
    %c0_0 = arith.constant 0 : index
    %0 = vector.load %arg1[%c0, %c0_0] : memref<256x8xf32, #tpu.memory_space<vmem>>, vector<256x8xf32>
    %c0_1 = arith.constant 0 : index
    %c0_2 = arith.constant 0 : index
    %1 = vector.load %arg2[%c0_1, %c0_2] : memref<1x8xf32, #tpu.memory_space<vmem>>, vector<1x8xf32>
    %2 = vector.broadcast %1 : vector<1x8xf32> to vector<256x8xf32>
    %3 = arith.mulf %0, %2 : vector<256x8xf32>
    %c0_3 = arith.constant 0 : index
    %c0_4 = arith.constant 0 : index
    %4 = vector.load %arg3[%c0_3, %c0_4] : memref<1x8xf32, #tpu.memory_space<vmem>>, vector<1x8xf32>
    %5 = vector.broadcast %4 : vector<1x8xf32> to vector<256x8xf32>
    %6 = arith.addf %3, %5 : vector<256x8xf32>
    %cst = arith.constant 0.000000e+00 : f32
    %7 = vector.broadcast %cst : f32 to vector<256x8xf32>
    %8 = arith.maximumf %6, %7 : vector<256x8xf32>
    %9 = arith.truncf %8 : vector<256x8xf32> to vector<256x8xbf16>
    %c0_5 = arith.constant 0 : index
    %c0_6 = arith.constant 0 : index
    %10 = vector.load %arg4[%c0_5, %c0_6] : memref<256x8xbf16, #tpu.memory_space<vmem>>, vector<256x8xbf16>
    tpu.vector_store %arg4[%c0_5, %c0_6], %9 {strides = array<i32>} : memref<256x8xbf16, #tpu.memory_space<vmem>>, vector<256x8xbf16>,
    return
  }
  func.func @transform_0(%arg0: i32) -> (i32, i32) {
    %c0_i32 = arith.constant 0 : i32
    %c0_i32_0 = arith.constant 0 : i32
    return %arg0, %c0_i32 : i32, i32
  }
  func.func @transform_1(%arg0: i32) -> (i32, i32) {
    %c0_i32 = arith.constant 0 : i32
    %c0_i32_0 = arith.constant 0 : i32
    %c0_i32_1 = arith.constant 0 : i32
    return %c0_i32, %c0_i32_0 : i32, i32
  }
  func.func @transform_2(%arg0: i32) -> (i32, i32) {
    %c0_i32 = arith.constant 0 : i32
    %c0_i32_0 = arith.constant 0 : i32
    %c0_i32_1 = arith.constant 0 : i32
    return %c0_i32, %c0_i32_0 : i32, i32
  }
  func.func @transform_3(%arg0: i32) -> (i32, i32) {
    %c0_i32 = arith.constant 0 : i32
    %c0_i32_0 = arith.constant 0 : i32
    return %arg0, %c0_i32 : i32, i32
  }
}

module attributes {stable_mosaic.version = 11 : i64} {
  func.func @_matmul_stats_kernel(%arg0: i32, %arg1: memref<256x16xbf16, #tpu.memory_space<vmem>>, %arg2: memref<16x8xbf16, #tpu.memory_space<vmem>>, %arg3: memref<256x8xf32, #tpu.memory_space<vmem>>, %arg4: memref<1x2x8xf32, #tpu.memory_space<vmem>>) attributes {dimension_semantics = [#tpu.dimension_semantics<parallel>], iteration_bounds = array<i64: 2>, scalar_prefetch = 0 : i64, scratch_operands = 0 : i64, tpu.core_type = #tpu.core_type<tc>, window_params = [{transform_indices = @transform_0, window_bounds = array<i64: 256, 16>}, {pipeline_mode = #tpu.pipeline_mode<synchronous>, transform_indices = @transform_1, window_bounds = array<i64: 16, 8>}, {transform_indices = @transform_2, window_bounds = array<i64: 256, 8>}, {transform_indices = @transform_3, window_bounds = array<i64: 1, 2, 8>}]} {
    %c0 = arith.constant 0 : index
    %c0_0 = arith.constant 0 : index
    %0 = vector.load %arg1[%c0, %c0_0] : memref<256x16xbf16, #tpu.memory_space<vmem>>, vector<256x16xbf16>
    %c0_1 = arith.constant 0 : index
    %c0_2 = arith.constant 0 : index
    %1 = vector.load %arg2[%c0_1, %c0_2] : memref<16x8xbf16, #tpu.memory_space<vmem>>, vector<16x8xbf16>
    %cst = arith.constant dense<0.000000e+00> : vector<256x8xf32>
    %2 = tpu.matmul %0, %1, %cst {dimension_numbers = #tpu.dot_dimension_numbers<[1], [0], [0], [1], [0, 0, 1, 1], [], []>} : vector<256x16xbf16>, vector<16x8xbf16>, vector<256x8xf32> -> vector<256x8xf32>
    %c0_3 = arith.constant 0 : index
    %c0_4 = arith.constant 0 : index
    %3 = vector.load %arg3[%c0_3, %c0_4] : memref<256x8xf32, #tpu.memory_space<vmem>>, vector<256x8xf32>
    tpu.vector_store %arg3[%c0_3, %c0_4], %2 {strides = array<i32>} : memref<256x8xf32, #tpu.memory_space<vmem>>, vector<256x8xf32>,
    %cst_5 = arith.constant dense<0.000000e+00> : vector<8xf32>
    %4 = vector.multi_reduction <add>, %2, %cst_5 [0] : vector<256x8xf32> to vector<8xf32>
    %5 = vector.shape_cast %4 : vector<8xf32> to vector<1x8xf32>
    %c0_6 = arith.constant 0 : index
    %c0_7 = arith.constant 0 : index
    %c0_8 = arith.constant 0 : index
    %6 = vector.load %arg4[%c0_6, %c0_7, %c0_8] : memref<1x2x8xf32, #tpu.memory_space<vmem>>, vector<1x1x8xf32>
    %7 = vector.shape_cast %6 : vector<1x1x8xf32> to vector<1x8xf32>
    %8 = vector.shape_cast %5 : vector<1x8xf32> to vector<1x1x8xf32>
    tpu.vector_store %arg4[%c0_6, %c0_7, %c0_8], %8 {strides = array<i32>} : memref<1x2x8xf32, #tpu.memory_space<vmem>>, vector<1x1x8xf32>,
    %9 = arith.mulf %2, %2 : vector<256x8xf32>
    %cst_9 = arith.constant dense<0.000000e+00> : vector<8xf32>
    %10 = vector.multi_reduction <add>, %9, %cst_9 [0] : vector<256x8xf32> to vector<8xf32>
    %11 = vector.shape_cast %10 : vector<8xf32> to vector<1x8xf32>
    %c0_10 = arith.constant 0 : index
    %c1 = arith.constant 1 : index
    %c0_11 = arith.constant 0 : index
    %12 = vector.load %arg4[%c0_10, %c1, %c0_11] : memref<1x2x8xf32, #tpu.memory_space<vmem>>, vector<1x1x8xf32>
    %13 = vector.shape_cast %12 : vector<1x1x8xf32> to vector<1x8xf32>
    %14 = vector.shape_cast %11 : vector<1x8xf32> to vector<1x1x8xf32>
    tpu.vector_store %arg4[%c0_10, %c1, %c0_11], %14 {strides = array<i32>} : memref<1x2x8xf32, #tpu.memory_space<vmem>>, vector<1x1x8xf32>,
    return
  }
  func.func @transform_0(%arg0: i32) -> (i32, i32) {
    %c0_i32 = arith.constant 0 : i32
    %c0_i32_0 = arith.constant 0 : i32
    return %arg0, %c0_i32 : i32, i32
  }
  func.func @transform_1(%arg0: i32) -> (i32, i32) {
    %c0_i32 = arith.constant 0 : i32
    %c0_i32_0 = arith.constant 0 : i32
    %c0_i32_1 = arith.constant 0 : i32
    return %c0_i32, %c0_i32_0 : i32, i32
  }
  func.func @transform_2(%arg0: i32) -> (i32, i32) {
    %c0_i32 = arith.constant 0 : i32
    %c0_i32_0 = arith.constant 0 : i32
    return %arg0, %c0_i32 : i32, i32
  }
  func.func @transform_3(%arg0: i32) -> (i32, i32, i32) {
    %c0_i32 = arith.constant 0 : i32
    %c0_i32_0 = arith.constant 0 : i32
    %c0_i32_1 = arith.constant 0 : i32
    return %arg0, %c0_i32, %c0_i32_0 : i32, i32, i32
  }
}

module attributes {stable_mosaic.version = 11 : i64} {
  func.func @_conv3x3_stats_kernel(%arg0: i32, %arg1: i32, %arg2: memref<1x4x9x9x8xbf16, #tpu.memory_space<vmem>>, %arg3: memref<3x3x8x8xbf16, #tpu.memory_space<vmem>>, %arg4: memref<64x8xf32, #tpu.memory_space<vmem>>, %arg5: memref<1x2x8xf32, #tpu.memory_space<vmem>>) attributes {dimension_semantics = [#tpu.dimension_semantics<parallel>, #tpu.dimension_semantics<parallel>], iteration_bounds = array<i64: 2, 1>, scalar_prefetch = 0 : i64, scratch_operands = 0 : i64, tpu.core_type = #tpu.core_type<tc>, window_params = [{transform_indices = @transform_0, window_bounds = array<i64: 1, 4, 9, 9, 8>}, {pipeline_mode = #tpu.pipeline_mode<synchronous>, transform_indices = @transform_1, window_bounds = array<i64: 3, 3, 8, 8>}, {transform_indices = @transform_2, window_bounds = array<i64: 64, 8>}, {transform_indices = @transform_3, window_bounds = array<i64: 1, 2, 8>}]} {
    %cst = arith.constant 0.000000e+00 : f32
    %0 = vector.broadcast %cst : f32 to vector<64x8xf32>
    %c8_i32 = arith.constant 8 : i32
    %1 = arith.muli %arg1, %c8_i32 : i32
    %c0_i32 = arith.constant 0 : i32
    %2 = arith.addi %1, %c0_i32 : i32
    %c0 = arith.constant 0 : index
    %c0_0 = arith.constant 0 : index
    %3 = arith.index_cast %2 : i32 to index
    %c0_1 = arith.constant 0 : index
    %c0_2 = arith.constant 0 : index
    %4 = vector.load %arg2[%c0, %c0_0, %3, %c0_1, %c0_2] : memref<1x4x9x9x8xbf16, #tpu.memory_space<vmem>>, vector<1x1x8x8x8xbf16>
    %5 = vector.shape_cast %4 : vector<1x1x8x8x8xbf16> to vector<8x8x8xbf16>
    %6 = vector.shape_cast %5 : vector<8x8x8xbf16> to vector<64x8xbf16>
    %c0_3 = arith.constant 0 : index
    %c0_4 = arith.constant 0 : index
    %c0_5 = arith.constant 0 : index
    %c0_6 = arith.constant 0 : index
    %7 = vector.load %arg3[%c0_3, %c0_4, %c0_5, %c0_6] : memref<3x3x8x8xbf16, #tpu.memory_space<vmem>>, vector<1x1x8x8xbf16>
    %8 = vector.shape_cast %7 : vector<1x1x8x8xbf16> to vector<8x8xbf16>
    %cst_7 = arith.constant dense<0.000000e+00> : vector<64x8xf32>
    %9 = tpu.matmul %6, %8, %cst_7 {dimension_numbers = #tpu.dot_dimension_numbers<[1], [0], [0], [1], [0, 0, 1, 1], [], []>} : vector<64x8xbf16>, vector<8x8xbf16>, vector<64x8xf32> -> vector<64x8xf32>
    %10 = arith.addf %0, %9 : vector<64x8xf32>
    %c8_i32_8 = arith.constant 8 : i32
    %11 = arith.muli %arg1, %c8_i32_8 : i32
    %c0_i32_9 = arith.constant 0 : i32
    %12 = arith.addi %11, %c0_i32_9 : i32
    %c0_10 = arith.constant 0 : index
    %c1 = arith.constant 1 : index
    %13 = arith.index_cast %12 : i32 to index
    %c0_11 = arith.constant 0 : index
    %c0_12 = arith.constant 0 : index
    %14 = vector.load %arg2[%c0_10, %c1, %13, %c0_11, %c0_12] : memref<1x4x9x9x8xbf16, #tpu.memory_space<vmem>>, vector<1x1x8x8x8xbf16>
    %15 = vector.shape_cast %14 : vector<1x1x8x8x8xbf16> to vector<8x8x8xbf16>
    %16 = vector.shape_cast %15 : vector<8x8x8xbf16> to vector<64x8xbf16>
    %c0_13 = arith.constant 0 : index
    %c1_14 = arith.constant 1 : index
    %c0_15 = arith.constant 0 : index
    %c0_16 = arith.constant 0 : index
    %17 = vector.load %arg3[%c0_13, %c1_14, %c0_15, %c0_16] : memref<3x3x8x8xbf16, #tpu.memory_space<vmem>>, vector<1x1x8x8xbf16>
    %18 = vector.shape_cast %17 : vector<1x1x8x8xbf16> to vector<8x8xbf16>
    %cst_17 = arith.constant dense<0.000000e+00> : vector<64x8xf32>
    %19 = tpu.matmul %16, %18, %cst_17 {dimension_numbers = #tpu.dot_dimension_numbers<[1], [0], [0], [1], [0, 0, 1, 1], [], []>} : vector<64x8xbf16>, vector<8x8xbf16>, vector<64x8xf32> -> vector<64x8xf32>
    %20 = arith.addf %10, %19 : vector<64x8xf32>
    %c8_i32_18 = arith.constant 8 : i32
    %21 = arith.muli %arg1, %c8_i32_18 : i32
    %c0_i32_19 = arith.constant 0 : i32
    %22 = arith.addi %21, %c0_i32_19 : i32
    %c0_20 = arith.constant 0 : index
    %c0_21 = arith.constant 0 : index
    %23 = arith.index_cast %22 : i32 to index
    %c1_22 = arith.constant 1 : index
    %c0_23 = arith.constant 0 : index
    %24 = vector.load %arg2[%c0_20, %c0_21, %23, %c1_22, %c0_23] : memref<1x4x9x9x8xbf16, #tpu.memory_space<vmem>>, vector<1x1x8x8x8xbf16>
    %25 = vector.shape_cast %24 : vector<1x1x8x8x8xbf16> to vector<8x8x8xbf16>
    %26 = vector.shape_cast %25 : vector<8x8x8xbf16> to vector<64x8xbf16>
    %c0_24 = arith.constant 0 : index
    %c2 = arith.constant 2 : index
    %c0_25 = arith.constant 0 : index
    %c0_26 = arith.constant 0 : index
    %27 = vector.load %arg3[%c0_24, %c2, %c0_25, %c0_26] : memref<3x3x8x8xbf16, #tpu.memory_space<vmem>>, vector<1x1x8x8xbf16>
    %28 = vector.shape_cast %27 : vector<1x1x8x8xbf16> to vector<8x8xbf16>
    %cst_27 = arith.constant dense<0.000000e+00> : vector<64x8xf32>
    %29 = tpu.matmul %26, %28, %cst_27 {dimension_numbers = #tpu.dot_dimension_numbers<[1], [0], [0], [1], [0, 0, 1, 1], [], []>} : vector<64x8xbf16>, vector<8x8xbf16>, vector<64x8xf32> -> vector<64x8xf32>
    %30 = arith.addf %20, %29 : vector<64x8xf32>
    %c8_i32_28 = arith.constant 8 : i32
    %31 = arith.muli %arg1, %c8_i32_28 : i32
    %c0_i32_29 = arith.constant 0 : i32
    %32 = arith.addi %31, %c0_i32_29 : i32
    %c0_30 = arith.constant 0 : index
    %c2_31 = arith.constant 2 : index
    %33 = arith.index_cast %32 : i32 to index
    %c0_32 = arith.constant 0 : index
    %c0_33 = arith.constant 0 : index
    %34 = vector.load %arg2[%c0_30, %c2_31, %33, %c0_32, %c0_33] : memref<1x4x9x9x8xbf16, #tpu.memory_space<vmem>>, vector<1x1x8x8x8xbf16>
    %35 = vector.shape_cast %34 : vector<1x1x8x8x8xbf16> to vector<8x8x8xbf16>
    %36 = vector.shape_cast %35 : vector<8x8x8xbf16> to vector<64x8xbf16>
    %c1_34 = arith.constant 1 : index
    %c0_35 = arith.constant 0 : index
    %c0_36 = arith.constant 0 : index
    %c0_37 = arith.constant 0 : index
    %37 = vector.load %arg3[%c1_34, %c0_35, %c0_36, %c0_37] : memref<3x3x8x8xbf16, #tpu.memory_space<vmem>>, vector<1x1x8x8xbf16>
    %38 = vector.shape_cast %37 : vector<1x1x8x8xbf16> to vector<8x8xbf16>
    %cst_38 = arith.constant dense<0.000000e+00> : vector<64x8xf32>
    %39 = tpu.matmul %36, %38, %cst_38 {dimension_numbers = #tpu.dot_dimension_numbers<[1], [0], [0], [1], [0, 0, 1, 1], [], []>} : vector<64x8xbf16>, vector<8x8xbf16>, vector<64x8xf32> -> vector<64x8xf32>
    %40 = arith.addf %30, %39 : vector<64x8xf32>
    %c8_i32_39 = arith.constant 8 : i32
    %41 = arith.muli %arg1, %c8_i32_39 : i32
    %c0_i32_40 = arith.constant 0 : i32
    %42 = arith.addi %41, %c0_i32_40 : i32
    %c0_41 = arith.constant 0 : index
    %c3 = arith.constant 3 : index
    %43 = arith.index_cast %42 : i32 to index
    %c0_42 = arith.constant 0 : index
    %c0_43 = arith.constant 0 : index
    %44 = vector.load %arg2[%c0_41, %c3, %43, %c0_42, %c0_43] : memref<1x4x9x9x8xbf16, #tpu.memory_space<vmem>>, vector<1x1x8x8x8xbf16>
    %45 = vector.shape_cast %44 : vector<1x1x8x8x8xbf16> to vector<8x8x8xbf16>
    %46 = vector.shape_cast %45 : vector<8x8x8xbf16> to vector<64x8xbf16>
    %c1_44 = arith.constant 1 : index
    %c1_45 = arith.constant 1 : index
    %c0_46 = arith.constant 0 : index
    %c0_47 = arith.constant 0 : index
    %47 = vector.load %arg3[%c1_44, %c1_45, %c0_46, %c0_47] : memref<3x3x8x8xbf16, #tpu.memory_space<vmem>>, vector<1x1x8x8xbf16>
    %48 = vector.shape_cast %47 : vector<1x1x8x8xbf16> to vector<8x8xbf16>
    %cst_48 = arith.constant dense<0.000000e+00> : vector<64x8xf32>
    %49 = tpu.matmul %46, %48, %cst_48 {dimension_numbers = #tpu.dot_dimension_numbers<[1], [0], [0], [1], [0, 0, 1, 1], [], []>} : vector<64x8xbf16>, vector<8x8xbf16>, vector<64x8xf32> -> vector<64x8xf32>
    %50 = arith.addf %40, %49 : vector<64x8xf32>
    %c8_i32_49 = arith.constant 8 : i32
    %51 = arith.muli %arg1, %c8_i32_49 : i32
    %c0_i32_50 = arith.constant 0 : i32
    %52 = arith.addi %51, %c0_i32_50 : i32
    %c0_51 = arith.constant 0 : index
    %c2_52 = arith.constant 2 : index
    %53 = arith.index_cast %52 : i32 to index
    %c1_53 = arith.constant 1 : index
    %c0_54 = arith.constant 0 : index
    %54 = vector.load %arg2[%c0_51, %c2_52, %53, %c1_53, %c0_54] : memref<1x4x9x9x8xbf16, #tpu.memory_space<vmem>>, vector<1x1x8x8x8xbf16>
    %55 = vector.shape_cast %54 : vector<1x1x8x8x8xbf16> to vector<8x8x8xbf16>
    %56 = vector.shape_cast %55 : vector<8x8x8xbf16> to vector<64x8xbf16>
    %c1_55 = arith.constant 1 : index
    %c2_56 = arith.constant 2 : index
    %c0_57 = arith.constant 0 : index
    %c0_58 = arith.constant 0 : index
    %57 = vector.load %arg3[%c1_55, %c2_56, %c0_57, %c0_58] : memref<3x3x8x8xbf16, #tpu.memory_space<vmem>>, vector<1x1x8x8xbf16>
    %58 = vector.shape_cast %57 : vector<1x1x8x8xbf16> to vector<8x8xbf16>
    %cst_59 = arith.constant dense<0.000000e+00> : vector<64x8xf32>
    %59 = tpu.matmul %56, %58, %cst_59 {dimension_numbers = #tpu.dot_dimension_numbers<[1], [0], [0], [1], [0, 0, 1, 1], [], []>} : vector<64x8xbf16>, vector<8x8xbf16>, vector<64x8xf32> -> vector<64x8xf32>
    %60 = arith.addf %50, %59 : vector<64x8xf32>
    %c8_i32_60 = arith.constant 8 : i32
    %61 = arith.muli %arg1, %c8_i32_60 : i32
    %c1_i32 = arith.constant 1 : i32
    %62 = arith.addi %61, %c1_i32 : i32
    %c0_61 = arith.constant 0 : index
    %c0_62 = arith.constant 0 : index
    %63 = arith.index_cast %62 : i32 to index
    %c0_63 = arith.constant 0 : index
    %c0_64 = arith.constant 0 : index
    %64 = vector.load %arg2[%c0_61, %c0_62, %63, %c0_63, %c0_64] : memref<1x4x9x9x8xbf16, #tpu.memory_space<vmem>>, vector<1x1x8x8x8xbf16>
    %65 = vector.shape_cast %64 : vector<1x1x8x8x8xbf16> to vector<8x8x8xbf16>
    %66 = vector.shape_cast %65 : vector<8x8x8xbf16> to vector<64x8xbf16>
    %c2_65 = arith.constant 2 : index
    %c0_66 = arith.constant 0 : index
    %c0_67 = arith.constant 0 : index
    %c0_68 = arith.constant 0 : index
    %67 = vector.load %arg3[%c2_65, %c0_66, %c0_67, %c0_68] : memref<3x3x8x8xbf16, #tpu.memory_space<vmem>>, vector<1x1x8x8xbf16>
    %68 = vector.shape_cast %67 : vector<1x1x8x8xbf16> to vector<8x8xbf16>
    %cst_69 = arith.constant dense<0.000000e+00> : vector<64x8xf32>
    %69 = tpu.matmul %66, %68, %cst_69 {dimension_numbers = #tpu.dot_dimension_numbers<[1], [0], [0], [1], [0, 0, 1, 1], [], []>} : vector<64x8xbf16>, vector<8x8xbf16>, vector<64x8xf32> -> vector<64x8xf32>
    %70 = arith.addf %60, %69 : vector<64x8xf32>
    %c8_i32_70 = arith.constant 8 : i32
    %71 = arith.muli %arg1, %c8_i32_70 : i32
    %c1_i32_71 = arith.constant 1 : i32
    %72 = arith.addi %71, %c1_i32_71 : i32
    %c0_72 = arith.constant 0 : index
    %c1_73 = arith.constant 1 : index
    %73 = arith.index_cast %72 : i32 to index
    %c0_74 = arith.constant 0 : index
    %c0_75 = arith.constant 0 : index
    %74 = vector.load %arg2[%c0_72, %c1_73, %73, %c0_74, %c0_75] : memref<1x4x9x9x8xbf16, #tpu.memory_space<vmem>>, vector<1x1x8x8x8xbf16>
    %75 = vector.shape_cast %74 : vector<1x1x8x8x8xbf16> to vector<8x8x8xbf16>
    %76 = vector.shape_cast %75 : vector<8x8x8xbf16> to vector<64x8xbf16>
    %c2_76 = arith.constant 2 : index
    %c1_77 = arith.constant 1 : index
    %c0_78 = arith.constant 0 : index
    %c0_79 = arith.constant 0 : index
    %77 = vector.load %arg3[%c2_76, %c1_77, %c0_78, %c0_79] : memref<3x3x8x8xbf16, #tpu.memory_space<vmem>>, vector<1x1x8x8xbf16>
    %78 = vector.shape_cast %77 : vector<1x1x8x8xbf16> to vector<8x8xbf16>
    %cst_80 = arith.constant dense<0.000000e+00> : vector<64x8xf32>
    %79 = tpu.matmul %76, %78, %cst_80 {dimension_numbers = #tpu.dot_dimension_numbers<[1], [0], [0], [1], [0, 0, 1, 1], [], []>} : vector<64x8xbf16>, vector<8x8xbf16>, vector<64x8xf32> -> vector<64x8xf32>
    %80 = arith.addf %70, %79 : vector<64x8xf32>
    %c8_i32_81 = arith.constant 8 : i32
    %81 = arith.muli %arg1, %c8_i32_81 : i32
    %c1_i32_82 = arith.constant 1 : i32
    %82 = arith.addi %81, %c1_i32_82 : i32
    %c0_83 = arith.constant 0 : index
    %c0_84 = arith.constant 0 : index
    %83 = arith.index_cast %82 : i32 to index
    %c1_85 = arith.constant 1 : index
    %c0_86 = arith.constant 0 : index
    %84 = vector.load %arg2[%c0_83, %c0_84, %83, %c1_85, %c0_86] : memref<1x4x9x9x8xbf16, #tpu.memory_space<vmem>>, vector<1x1x8x8x8xbf16>
    %85 = vector.shape_cast %84 : vector<1x1x8x8x8xbf16> to vector<8x8x8xbf16>
    %86 = vector.shape_cast %85 : vector<8x8x8xbf16> to vector<64x8xbf16>
    %c2_87 = arith.constant 2 : index
    %c2_88 = arith.constant 2 : index
    %c0_89 = arith.constant 0 : index
    %c0_90 = arith.constant 0 : index
    %87 = vector.load %arg3[%c2_87, %c2_88, %c0_89, %c0_90] : memref<3x3x8x8xbf16, #tpu.memory_space<vmem>>, vector<1x1x8x8xbf16>
    %88 = vector.shape_cast %87 : vector<1x1x8x8xbf16> to vector<8x8xbf16>
    %cst_91 = arith.constant dense<0.000000e+00> : vector<64x8xf32>
    %89 = tpu.matmul %86, %88, %cst_91 {dimension_numbers = #tpu.dot_dimension_numbers<[1], [0], [0], [1], [0, 0, 1, 1], [], []>} : vector<64x8xbf16>, vector<8x8xbf16>, vector<64x8xf32> -> vector<64x8xf32>
    %90 = arith.addf %80, %89 : vector<64x8xf32>
    %c0_92 = arith.constant 0 : index
    %c0_93 = arith.constant 0 : index
    %91 = vector.load %arg4[%c0_92, %c0_93] : memref<64x8xf32, #tpu.memory_space<vmem>>, vector<64x8xf32>
    tpu.vector_store %arg4[%c0_92, %c0_93], %90 {strides = array<i32>} : memref<64x8xf32, #tpu.memory_space<vmem>>, vector<64x8xf32>,
    %cst_94 = arith.constant dense<0.000000e+00> : vector<8xf32>
    %92 = vector.multi_reduction <add>, %90, %cst_94 [0] : vector<64x8xf32> to vector<8xf32>
    %93 = vector.shape_cast %92 : vector<8xf32> to vector<1x8xf32>
    %c0_95 = arith.constant 0 : index
    %c0_96 = arith.constant 0 : index
    %c0_97 = arith.constant 0 : index
    %94 = vector.load %arg5[%c0_95, %c0_96, %c0_97] : memref<1x2x8xf32, #tpu.memory_space<vmem>>, vector<1x1x8xf32>
    %95 = vector.shape_cast %94 : vector<1x1x8xf32> to vector<1x8xf32>
    %96 = vector.shape_cast %93 : vector<1x8xf32> to vector<1x1x8xf32>
    tpu.vector_store %arg5[%c0_95, %c0_96, %c0_97], %96 {strides = array<i32>} : memref<1x2x8xf32, #tpu.memory_space<vmem>>, vector<1x1x8xf32>,
    %97 = arith.mulf %90, %90 : vector<64x8xf32>
    %cst_98 = arith.constant dense<0.000000e+00> : vector<8xf32>
    %98 = vector.multi_reduction <add>, %97, %cst_98 [0] : vector<64x8xf32> to vector<8xf32>
    %99 = vector.shape_cast %98 : vector<8xf32> to vector<1x8xf32>
    %c0_99 = arith.constant 0 : index
    %c1_100 = arith.constant 1 : index
    %c0_101 = arith.constant 0 : index
    %100 = vector.load %arg5[%c0_99, %c1_100, %c0_101] : memref<1x2x8xf32, #tpu.memory_space<vmem>>, vector<1x1x8xf32>
    %101 = vector.shape_cast %100 : vector<1x1x8xf32> to vector<1x8xf32>
    %102 = vector.shape_cast %99 : vector<1x8xf32> to vector<1x1x8xf32>
    tpu.vector_store %arg5[%c0_99, %c1_100, %c0_101], %102 {strides = array<i32>} : memref<1x2x8xf32, #tpu.memory_space<vmem>>, vector<1x1x8xf32>,
    return
  }
  func.func @transform_0(%arg0: i32, %arg1: i32) -> (i32, i32, i32, i32, i32) {
    %c0_i32 = arith.constant 0 : i32
    %c0_i32_0 = arith.constant 0 : i32
    %c0_i32_1 = arith.constant 0 : i32
    %c0_i32_2 = arith.constant 0 : i32
    %c0_i32_3 = arith.constant 0 : i32
    return %arg0, %c0_i32, %c0_i32_0, %c0_i32_1, %c0_i32_2 : i32, i32, i32, i32, i32
  }
  func.func @transform_1(%arg0: i32, %arg1: i32) -> (i32, i32, i32, i32) {
    %c0_i32 = arith.constant 0 : i32
    %c0_i32_0 = arith.constant 0 : i32
    %c0_i32_1 = arith.constant 0 : i32
    %c0_i32_2 = arith.constant 0 : i32
    %c0_i32_3 = arith.constant 0 : i32
    return %c0_i32, %c0_i32_0, %c0_i32_1, %c0_i32_2 : i32, i32, i32, i32
  }
  func.func @transform_2(%arg0: i32, %arg1: i32) -> (i32, i32) {
    %c1_i32 = arith.constant 1 : i32
    %0 = arith.muli %arg0, %c1_i32 : i32
    %1 = arith.addi %0, %arg1 : i32
    %c0_i32 = arith.constant 0 : i32
    %c0_i32_0 = arith.constant 0 : i32
    return %1, %c0_i32 : i32, i32
  }
  func.func @transform_3(%arg0: i32, %arg1: i32) -> (i32, i32, i32) {
    %c1_i32 = arith.constant 1 : i32
    %0 = arith.muli %arg0, %c1_i32 : i32
    %1 = arith.addi %0, %arg1 : i32
    %c0_i32 = arith.constant 0 : i32
    %c0_i32_0 = arith.constant 0 : i32
    %c0_i32_1 = arith.constant 0 : i32
    return %1, %c0_i32, %c0_i32_0 : i32, i32, i32
  }
}

module attributes {stable_mosaic.version = 11 : i64} {
  func.func @_matmul_stats_kernel(%arg0: i32, %arg1: memref<128x8xf32, #tpu.memory_space<vmem>>, %arg2: memref<8x32xbf16, #tpu.memory_space<vmem>>, %arg3: memref<1x8xf32, #tpu.memory_space<vmem>>, %arg4: memref<1x8xf32, #tpu.memory_space<vmem>>, %arg5: memref<128x32xf32, #tpu.memory_space<vmem>>, %arg6: memref<1x2x32xf32, #tpu.memory_space<vmem>>) attributes {dimension_semantics = [#tpu.dimension_semantics<parallel>], iteration_bounds = array<i64: 1>, scalar_prefetch = 0 : i64, scratch_operands = 0 : i64, tpu.core_type = #tpu.core_type<tc>, window_params = [{transform_indices = @transform_0, window_bounds = array<i64: 128, 8>}, {pipeline_mode = #tpu.pipeline_mode<synchronous>, transform_indices = @transform_1, window_bounds = array<i64: 8, 32>}, {pipeline_mode = #tpu.pipeline_mode<synchronous>, transform_indices = @transform_2, window_bounds = array<i64: 1, 8>}, {pipeline_mode = #tpu.pipeline_mode<synchronous>, transform_indices = @transform_3, window_bounds = array<i64: 1, 8>}, {transform_indices = @transform_4, window_bounds = array<i64: 128, 32>}, {transform_indices = @transform_5, window_bounds = array<i64: 1, 2, 32>}]} {
    %c0 = arith.constant 0 : index
    %c0_0 = arith.constant 0 : index
    %0 = vector.load %arg1[%c0, %c0_0] : memref<128x8xf32, #tpu.memory_space<vmem>>, vector<128x8xf32>
    %c0_1 = arith.constant 0 : index
    %c0_2 = arith.constant 0 : index
    %1 = vector.load %arg3[%c0_1, %c0_2] : memref<1x8xf32, #tpu.memory_space<vmem>>, vector<1x8xf32>
    %2 = vector.broadcast %1 : vector<1x8xf32> to vector<128x8xf32>
    %3 = arith.mulf %0, %2 : vector<128x8xf32>
    %c0_3 = arith.constant 0 : index
    %c0_4 = arith.constant 0 : index
    %4 = vector.load %arg4[%c0_3, %c0_4] : memref<1x8xf32, #tpu.memory_space<vmem>>, vector<1x8xf32>
    %5 = vector.broadcast %4 : vector<1x8xf32> to vector<128x8xf32>
    %6 = arith.addf %3, %5 : vector<128x8xf32>
    %cst = arith.constant 0.000000e+00 : f32
    %7 = vector.broadcast %cst : f32 to vector<128x8xf32>
    %8 = arith.maximumf %6, %7 : vector<128x8xf32>
    %9 = arith.truncf %8 : vector<128x8xf32> to vector<128x8xbf16>
    %c0_5 = arith.constant 0 : index
    %c0_6 = arith.constant 0 : index
    %10 = vector.load %arg2[%c0_5, %c0_6] : memref<8x32xbf16, #tpu.memory_space<vmem>>, vector<8x32xbf16>
    %cst_7 = arith.constant dense<0.000000e+00> : vector<128x32xf32>
    %11 = tpu.matmul %9, %10, %cst_7 {dimension_numbers = #tpu.dot_dimension_numbers<[1], [0], [0], [1], [0, 0, 1, 1], [], []>} : vector<128x8xbf16>, vector<8x32xbf16>, vector<128x32xf32> -> vector<128x32xf32>
    %c0_8 = arith.constant 0 : index
    %c0_9 = arith.constant 0 : index
    %12 = vector.load %arg5[%c0_8, %c0_9] : memref<128x32xf32, #tpu.memory_space<vmem>>, vector<128x32xf32>
    tpu.vector_store %arg5[%c0_8, %c0_9], %11 {strides = array<i32>} : memref<128x32xf32, #tpu.memory_space<vmem>>, vector<128x32xf32>,
    %cst_10 = arith.constant dense<0.000000e+00> : vector<32xf32>
    %13 = vector.multi_reduction <add>, %11, %cst_10 [0] : vector<128x32xf32> to vector<32xf32>
    %14 = vector.shape_cast %13 : vector<32xf32> to vector<1x32xf32>
    %c0_11 = arith.constant 0 : index
    %c0_12 = arith.constant 0 : index
    %c0_13 = arith.constant 0 : index
    %15 = vector.load %arg6[%c0_11, %c0_12, %c0_13] : memref<1x2x32xf32, #tpu.memory_space<vmem>>, vector<1x1x32xf32>
    %16 = vector.shape_cast %15 : vector<1x1x32xf32> to vector<1x32xf32>
    %17 = vector.shape_cast %14 : vector<1x32xf32> to vector<1x1x32xf32>
    tpu.vector_store %arg6[%c0_11, %c0_12, %c0_13], %17 {strides = array<i32>} : memref<1x2x32xf32, #tpu.memory_space<vmem>>, vector<1x1x32xf32>,
    %18 = arith.mulf %11, %11 : vector<128x32xf32>
    %cst_14 = arith.constant dense<0.000000e+00> : vector<32xf32>
    %19 = vector.multi_reduction <add>, %18, %cst_14 [0] : vector<128x32xf32> to vector<32xf32>
    %20 = vector.shape_cast %19 : vector<32xf32> to vector<1x32xf32>
    %c0_15 = arith.constant 0 : index
    %c1 = arith.constant 1 : index
    %c0_16 = arith.constant 0 : index
    %21 = vector.load %arg6[%c0_15, %c1, %c0_16] : memref<1x2x32xf32, #tpu.memory_space<vmem>>, vector<1x1x32xf32>
    %22 = vector.shape_cast %21 : vector<1x1x32xf32> to vector<1x32xf32>
    %23 = vector.shape_cast %20 : vector<1x32xf32> to vector<1x1x32xf32>
    tpu.vector_store %arg6[%c0_15, %c1, %c0_16], %23 {strides = array<i32>} : memref<1x2x32xf32, #tpu.memory_space<vmem>>, vector<1x1x32xf32>,
    return
  }
  func.func @transform_0(%arg0: i32) -> (i32, i32) {
    %c0_i32 = arith.constant 0 : i32
    %c0_i32_0 = arith.constant 0 : i32
    return %arg0, %c0_i32 : i32, i32
  }
  func.func @transform_1(%arg0: i32) -> (i32, i32) {
    %c0_i32 = arith.constant 0 : i32
    %c0_i32_0 = arith.constant 0 : i32
    %c0_i32_1 = arith.constant 0 : i32
    return %c0_i32, %c0_i32_0 : i32, i32
  }
  func.func @transform_2(%arg0: i32) -> (i32, i32) {
    %c0_i32 = arith.constant 0 : i32
    %c0_i32_0 = arith.constant 0 : i32
    %c0_i32_1 = arith.constant 0 : i32
    return %c0_i32, %c0_i32_0 : i32, i32
  }
  func.func @transform_3(%arg0: i32) -> (i32, i32) {
    %c0_i32 = arith.constant 0 : i32
    %c0_i32_0 = arith.constant 0 : i32
    %c0_i32_1 = arith.constant 0 : i32
    return %c0_i32, %c0_i32_0 : i32, i32
  }
  func.func @transform_4(%arg0: i32) -> (i32, i32) {
    %c0_i32 = arith.constant 0 : i32
    %c0_i32_0 = arith.constant 0 : i32
    return %arg0, %c0_i32 : i32, i32
  }
  func.func @transform_5(%arg0: i32) -> (i32, i32, i32) {
    %c0_i32 = arith.constant 0 : i32
    %c0_i32_0 = arith.constant 0 : i32
    %c0_i32_1 = arith.constant 0 : i32
    return %arg0, %c0_i32, %c0_i32_0 : i32, i32, i32
  }
}

module attributes {stable_mosaic.version = 11 : i64} {
  func.func @_bn_act_kernel(%arg0: i32, %arg1: memref<128x32xf32, #tpu.memory_space<vmem>>, %arg2: memref<1x32xf32, #tpu.memory_space<vmem>>, %arg3: memref<1x32xf32, #tpu.memory_space<vmem>>, %arg4: memref<128x32xf32, #tpu.memory_space<vmem>>, %arg5: memref<1x32xf32, #tpu.memory_space<vmem>>, %arg6: memref<1x32xf32, #tpu.memory_space<vmem>>, %arg7: memref<128x32xf32, #tpu.memory_space<vmem>>) attributes {dimension_semantics = [#tpu.dimension_semantics<parallel>], iteration_bounds = array<i64: 1>, scalar_prefetch = 0 : i64, scratch_operands = 0 : i64, tpu.core_type = #tpu.core_type<tc>, window_params = [{transform_indices = @transform_0, window_bounds = array<i64: 128, 32>}, {pipeline_mode = #tpu.pipeline_mode<synchronous>, transform_indices = @transform_1, window_bounds = array<i64: 1, 32>}, {pipeline_mode = #tpu.pipeline_mode<synchronous>, transform_indices = @transform_2, window_bounds = array<i64: 1, 32>}, {transform_indices = @transform_3, window_bounds = array<i64: 128, 32>}, {pipeline_mode = #tpu.pipeline_mode<synchronous>, transform_indices = @transform_4, window_bounds = array<i64: 1, 32>}, {pipeline_mode = #tpu.pipeline_mode<synchronous>, transform_indices = @transform_5, window_bounds = array<i64: 1, 32>}, {transform_indices = @transform_6, window_bounds = array<i64: 128, 32>}]} {
    %c0 = arith.constant 0 : index
    %c0_0 = arith.constant 0 : index
    %0 = vector.load %arg1[%c0, %c0_0] : memref<128x32xf32, #tpu.memory_space<vmem>>, vector<128x32xf32>
    %c0_1 = arith.constant 0 : index
    %c0_2 = arith.constant 0 : index
    %1 = vector.load %arg2[%c0_1, %c0_2] : memref<1x32xf32, #tpu.memory_space<vmem>>, vector<1x32xf32>
    %2 = vector.broadcast %1 : vector<1x32xf32> to vector<128x32xf32>
    %3 = arith.mulf %0, %2 : vector<128x32xf32>
    %c0_3 = arith.constant 0 : index
    %c0_4 = arith.constant 0 : index
    %4 = vector.load %arg3[%c0_3, %c0_4] : memref<1x32xf32, #tpu.memory_space<vmem>>, vector<1x32xf32>
    %5 = vector.broadcast %4 : vector<1x32xf32> to vector<128x32xf32>
    %6 = arith.addf %3, %5 : vector<128x32xf32>
    %c0_5 = arith.constant 0 : index
    %c0_6 = arith.constant 0 : index
    %7 = vector.load %arg4[%c0_5, %c0_6] : memref<128x32xf32, #tpu.memory_space<vmem>>, vector<128x32xf32>
    %c0_7 = arith.constant 0 : index
    %c0_8 = arith.constant 0 : index
    %8 = vector.load %arg5[%c0_7, %c0_8] : memref<1x32xf32, #tpu.memory_space<vmem>>, vector<1x32xf32>
    %9 = vector.broadcast %8 : vector<1x32xf32> to vector<128x32xf32>
    %10 = arith.mulf %7, %9 : vector<128x32xf32>
    %11 = arith.addf %6, %10 : vector<128x32xf32>
    %c0_9 = arith.constant 0 : index
    %c0_10 = arith.constant 0 : index
    %12 = vector.load %arg6[%c0_9, %c0_10] : memref<1x32xf32, #tpu.memory_space<vmem>>, vector<1x32xf32>
    %13 = vector.broadcast %12 : vector<1x32xf32> to vector<128x32xf32>
    %14 = arith.addf %11, %13 : vector<128x32xf32>
    %cst = arith.constant 0.000000e+00 : f32
    %15 = vector.broadcast %cst : f32 to vector<128x32xf32>
    %16 = arith.maximumf %14, %15 : vector<128x32xf32>
    %c0_11 = arith.constant 0 : index
    %c0_12 = arith.constant 0 : index
    %17 = vector.load %arg7[%c0_11, %c0_12] : memref<128x32xf32, #tpu.memory_space<vmem>>, vector<128x32xf32>
    tpu.vector_store %arg7[%c0_11, %c0_12], %16 {strides = array<i32>} : memref<128x32xf32, #tpu.memory_space<vmem>>, vector<128x32xf32>,
    return
  }
  func.func @transform_0(%arg0: i32) -> (i32, i32) {
    %c0_i32 = arith.constant 0 : i32
    %c0_i32_0 = arith.constant 0 : i32
    return %arg0, %c0_i32 : i32, i32
  }
  func.func @transform_1(%arg0: i32) -> (i32, i32) {
    %c0_i32 = arith.constant 0 : i32
    %c0_i32_0 = arith.constant 0 : i32
    %c0_i32_1 = arith.constant 0 : i32
    return %c0_i32, %c0_i32_0 : i32, i32
  }
  func.func @transform_2(%arg0: i32) -> (i32, i32) {
    %c0_i32 = arith.constant 0 : i32
    %c0_i32_0 = arith.constant 0 : i32
    %c0_i32_1 = arith.constant 0 : i32
    return %c0_i32, %c0_i32_0 : i32, i32
  }
  func.func @transform_3(%arg0: i32) -> (i32, i32) {
    %c0_i32 = arith.constant 0 : i32
    %c0_i32_0 = arith.constant 0 : i32
    return %arg0, %c0_i32 : i32, i32
  }
  func.func @transform_4(%arg0: i32) -> (i32, i32) {
    %c0_i32 = arith.constant 0 : i32
    %c0_i32_0 = arith.constant 0 : i32
    %c0_i32_1 = arith.constant 0 : i32
    return %c0_i32, %c0_i32_0 : i32, i32
  }
  func.func @transform_5(%arg0: i32) -> (i32, i32) {
    %c0_i32 = arith.constant 0 : i32
    %c0_i32_0 = arith.constant 0 : i32
    %c0_i32_1 = arith.constant 0 : i32
    return %c0_i32, %c0_i32_0 : i32, i32
  }
  func.func @transform_6(%arg0: i32) -> (i32, i32) {
    %c0_i32 = arith.constant 0 : i32
    %c0_i32_0 = arith.constant 0 : i32
    return %arg0, %c0_i32 : i32, i32
  }
}

</mosaic_0001>

<bundles_post_ra>
// kernel: bottleneck_forward.10
= control target key start
LH: loop header
LB: loop body
LE: loop exit
PB: predicated region body
PF: predicated region fallthrough
CT: control target
= control target key end

     0   :  { %vm78_vm0 = vcmask 130048   ;;  %vm200_vm1 = vcmask 261120   ;;  %vm254_vm2 = vcmask 253952   ;;  %s554_s1 = inlined_call_operand.vmem [shape: bf16[16,32], index: 1, kind: input, shape index: {}]   ;;  %s555_s0 = inlined_call_operand.vmem [shape: bf16[128,16], index: 0, kind: input, shape index: {}]   ;;  %s556_s2 = inlined_call_operand.vmem [shape: f32[128,32], index: 2, kind: output, shape index: {0}]   ;;  %s557_s3 = inlined_call_operand.vmem [shape: f32[1,2,32], index: 3, kind: output, shape index: {1}]  }
   0x1   :  { %v364_v0 = vld [vmem:[%s554_s1] sm:$0xff]   ;;  %v366_v2 = vld [vmem:[%s555_s0 + $0x8] sm:$0xff]   ;;  %v367_v3 = vld [vmem:[%s555_s0 + $0x10] sm:$0xff]  }
   0x2   :  { %v365_v1 = vld [vmem:[%s555_s0] sm:$0xff]   ;;  %344 = vmatprep.subr.bf16.mxu0 %v364_v0  ;;  %362 = vmatprep.subr.bf16.mxu1 %v364_v0  ;;  %v370_v5 = vld [vmem:[%s555_s0 + $0x28] sm:$0xff]   ;;  %v371_v6 = vld [vmem:[%s555_s0 + $0x30] sm:$0xff]  }
   0x3   :  { %345 = vmatpush3.bf16.msra.mxu0 %v364_v0  ;;  %346 = vmatprep.mubr.msk.bf16.mxu0 %vm78_vm0, %v365_v1  ;;  %v369_v4 = vld [vmem:[%s555_s0 + $0x20] sm:$0xff]   ;;  %v368_v7 = vld [vmem:[%s555_s0 + $0x18] sm:$0xff]  }
   0x4   :  { %363 = vmatpush3.bf16.msra.mxu1 %v364_v0  ;;  %354 = vmatprep.mubr.msk.bf16.mxu1 %vm78_vm0, %v369_v4  ;;  %v372_v8 = vld [vmem:[%s555_s0 + $0x38] sm:$0xff]  }
   0x6   :  { %347 = vmatmul.mubr.msk.bf16.vlgmr.msra.gmra.mxu0 %vm78_vm0, %v366_v2 }
   0x7   :  { %350 = vmatprep.mubr.msk.bf16.mxu0 %vm78_vm0, %v367_v3  ;;  %355 = vmatmul.mubr.msk.bf16.vlgmr.msra.gmra.mxu1 %vm78_vm0, %v370_v5 }
   0x8   :  { %358 = vmatprep.mubr.msk.bf16.mxu1 %vm78_vm0, %v371_v6 }
   0xe   :  { %351 = vmatmul.mubr.msk.bf16.gmra.mxu0 %vm78_vm0, %v368_v7 }
   0xf   :  { %359 = vmatmul.mubr.msk.bf16.gmra.mxu1 %vm78_vm0, %v372_v8 }
  0xc6   :  { %v348_v9 = vpop.f32.mrf.mxu0 }
  0xc7   :  { %203 = vst.msk [vmem:[%s556_s2 + $0x10] sm:$0xff] %vm200_vm1, %v348_v9  ;;  %v432_v11 = vpop.f32.mrf.mxu1  ;;  %v258_v17 = vmul.f32 %v348_v9, %v348_v9  ;;  %v220_v24 = vsel %vm200_vm1, %v348_v9, 0.0 }
  0xc8   :  { %v137_v10 = vpop.f32.mrf.mxu0  ;;  %211 = vst.msk [vmem:[%s556_s2 + $0x50] sm:$0xff] %vm200_vm1, %v432_v11  ;;  %v266_v3 = vmul.f32 %v432_v11, %v432_v11  ;;  %v236_v8 = vsel %vm200_vm1, %v432_v11, 0.0 }
  0xc9   :  { %201 = vst.msk [vmem:[%s556_s2] sm:$0xff] %vm200_vm1, %v137_v10  ;;  %v443_v13 = vpop.f32.mrf.mxu1  ;;  %v256_v14 = vmul.f32 %v137_v10, %v137_v10  ;;  %v217_v18 = vsel %vm200_vm1, %v137_v10, 0.0  ;;  %v275_v32 = vsel %vm200_vm1, %v258_v17, 0.0 }
  0xca   :  { %v349_v12 = vpop.f32.mrf.mxu0  ;;  %209 = vst.msk [vmem:[%s556_s2 + $0x40] sm:$0xff] %vm200_vm1, %v443_v13  ;;  %v264_v59 = vmul.f32 %v443_v13, %v443_v13  ;;  %v232_v63 = vsel %vm200_vm1, %v443_v13, 0.0 }
  0xcb   :  { %204 = vst.msk [vmem:[%s556_s2 + $0x18] sm:$0xff] %vm200_vm1, %v349_v12  ;;  %v454_v16 = vpop.f32.mrf.mxu1  ;;  %v272_v25 = vsel %vm200_vm1, %v256_v14, 0.0  ;;  %v259_v26 = vmul.f32 %v349_v12, %v349_v12  ;;  %v222_v33 = vsel %vm200_vm1, %v349_v12, 0.0  ;;  %v291_v14 = vsel %vm200_vm1, %v266_v3, 0.0 }
  0xcc   :  { %v140_v15 = vpop.f32.mrf.mxu0  ;;  %212 = vst.msk [vmem:[%s556_s2 + $0x58] sm:$0xff] %vm200_vm1, %v454_v16  ;;  %v287_v4 = vsel %vm200_vm1, %v264_v59, 0.0  ;;  %v267_v9 = vmul.f32 %v454_v16, %v454_v16 }
  0xcd   :  { %202 = vst.msk [vmem:[%s556_s2 + $0x8] sm:$0xff] %vm200_vm1, %v140_v15  ;;  %v218_v19 = vsel %vm200_vm1, %v140_v15, 0.0  ;;  %v257_v20 = vmul.f32 %v140_v15, %v140_v15  ;;  %v172_v23 = vpop.f32.mrf.mxu1  ;;  %v277_v39 = vsel %vm200_vm1, %v259_v26, 0.0  ;;  %v238_v15 = vsel %vm200_vm1, %v454_v16, 0.0 }
  0xce   :  { %v219_v21 = vadd.f32 %v218_v19, %v217_v18  ;;  %v352_v22 = vpop.f32.mrf.mxu0  ;;  %210 = vst.msk [vmem:[%s556_s2 + $0x48] sm:$0xff] %vm200_vm1, %v172_v23  ;;  %v265_v0 = vmul.f32 %v172_v23, %v172_v23  ;;  %v234_v5 = vsel %vm200_vm1, %v172_v23, 0.0 }
  0xcf   :  { %v273_v27 = vsel %vm200_vm1, %v257_v20, 0.0  ;;  %207 = vst.msk [vmem:[%s556_s2 + $0x30] sm:$0xff] %vm200_vm1, %v352_v22  ;;  %v478_v31 = vpop.f32.mrf.mxu1  ;;  %v262_v45 = vmul.f32 %v352_v22, %v352_v22  ;;  %v228_v52 = vsel %vm200_vm1, %v352_v22, 0.0  ;;  %v293_v20 = vsel %vm200_vm1, %v267_v9, 0.0 }
  0xd0   :  { %v221_v28 = vadd.f32 %v220_v24, %v219_v21  ;;  %v274_v29 = vadd.f32 %v273_v27, %v272_v25  ;;  %v153_v30 = vpop.f32.mrf.mxu0  ;;  %215 = vst.msk [vmem:[%s556_s2 + $0x70] sm:$0xff] %vm200_vm1, %v478_v31  ;;  %v289_v10 = vsel %vm200_vm1, %v265_v0, 0.0  ;;  %v270_v24 = vmul.f32 %v478_v31, %v478_v31 }
  0xd1   :  { %205 = vst.msk [vmem:[%s556_s2 + $0x20] sm:$0xff] %vm200_vm1, %v153_v30  ;;  %v260_v34 = vmul.f32 %v153_v30, %v153_v30  ;;  %v185_v38 = vpop.f32.mrf.mxu1  ;;  %v224_v40 = vsel %vm200_vm1, %v153_v30, 0.0  ;;  %v283_v57 = vsel %vm200_vm1, %v262_v45, 0.0  ;;  %v244_v16 = vsel %vm200_vm1, %v478_v31, 0.0 }
  0xd2   :  { %v276_v35 = vadd.f32 %v275_v32, %v274_v29  ;;  %v223_v36 = vadd.f32 %v222_v33, %v221_v28  ;;  %v353_v37 = vpop.f32.mrf.mxu0  ;;  %213 = vst.msk [vmem:[%s556_s2 + $0x60] sm:$0xff] %vm200_vm1, %v185_v38  ;;  %v268_v17 = vmul.f32 %v185_v38, %v185_v38  ;;  %v240_v21 = vsel %vm200_vm1, %v185_v38, 0.0 }
  0xd3   :  { %208 = vst.msk [vmem:[%s556_s2 + $0x38] sm:$0xff] %vm200_vm1, %v353_v37  ;;  %v361_v44 = vpop.f32.mrf.mxu1  ;;  %v279_v46 = vsel %vm200_vm1, %v260_v34, 0.0  ;;  %v263_v53 = vmul.f32 %v353_v37, %v353_v37  ;;  %v230_v58 = vsel %vm200_vm1, %v353_v37, 0.0  ;;  %v299_v34 = vsel %vm200_vm1, %v270_v24, 0.0 }
  0xd4   :  { %v225_v41 = vadd.f32 %v224_v40, %v223_v36  ;;  %v278_v42 = vadd.f32 %v277_v39, %v276_v35  ;;  %v156_v43 = vpop.f32.mrf.mxu0  ;;  %216 = vst.msk [vmem:[%s556_s2 + $0x78] sm:$0xff] %vm200_vm1, %v361_v44  ;;  %v295_v25 = vsel %vm200_vm1, %v268_v17, 0.0  ;;  %v271_v29 = vmul.f32 %v361_v44, %v361_v44 }
  0xd5   :  { %206 = vst.msk [vmem:[%s556_s2 + $0x28] sm:$0xff] %vm200_vm1, %v156_v43  ;;  %v226_v47 = vsel %vm200_vm1, %v156_v43, 0.0  ;;  %v261_v48 = vmul.f32 %v156_v43, %v156_v43  ;;  %v188_v51 = vpop.f32.mrf.mxu1  ;;  %v285_v62 = vsel %vm200_vm1, %v263_v53, 0.0  ;;  %v246_v35 = vsel %vm200_vm1, %v361_v44, 0.0 }
  0xd6   :  { %v280_v49 = vadd.f32 %v279_v46, %v278_v42  ;;  %v227_v50 = vadd.f32 %v226_v47, %v225_v41  ;;  %214 = vst.msk [vmem:[%s556_s2 + $0x68] sm:$0xff] %vm200_vm1, %v188_v51  ;;  %v269_v11 = vmul.f32 %v188_v51, %v188_v51  ;;  %v242_v26 = vsel %vm200_vm1, %v188_v51, 0.0 }
  0xd7   :  { %v281_v54 = vsel %vm200_vm1, %v261_v48, 0.0  ;;  %v301_v38 = vsel %vm200_vm1, %v271_v29, 0.0 }
  0xd8   :  { %v229_v55 = vadd.f32 %v228_v52, %v227_v50  ;;  %v282_v56 = vadd.f32 %v281_v54, %v280_v49  ;;  %v297_v30 = vsel %vm200_vm1, %v269_v11, 0.0 }
  0xda   :  { %v231_v60 = vadd.f32 %v230_v58, %v229_v55  ;;  %v284_v61 = vadd.f32 %v283_v57, %v282_v56 }
  0xdc   :  { %v286_v1 = vadd.f32 %v285_v62, %v284_v61  ;;  %v233_v2 = vadd.f32 %v232_v63, %v231_v60 }
  0xde   :  { %v235_v6 = vadd.f32 %v234_v5, %v233_v2  ;;  %v288_v7 = vadd.f32 %v287_v4, %v286_v1 }
  0xe0   :  { %v237_v12 = vadd.f32 %v236_v8, %v235_v6  ;;  %v290_v13 = vadd.f32 %v289_v10, %v288_v7 }
  0xe2   :  { %v292_v18 = vadd.f32 %v291_v14, %v290_v13  ;;  %v239_v19 = vadd.f32 %v238_v15, %v237_v12 }
  0xe4   :  { %v241_v22 = vadd.f32 %v240_v21, %v239_v19  ;;  %v294_v23 = vadd.f32 %v293_v20, %v292_v18 }
  0xe6   :  { %v296_v27 = vadd.f32 %v295_v25, %v294_v23  ;;  %v243_v28 = vadd.f32 %v242_v26, %v241_v22 }
  0xe8   :  { %v245_v32 = vadd.f32 %v244_v16, %v243_v28  ;;  %v298_v33 = vadd.f32 %v297_v30, %v296_v27 }
  0xea   :  { %v247_v36 = vadd.f32 %v246_v35, %v245_v32  ;;  %v300_v37 = vadd.f32 %v299_v34, %v298_v33 }
  0xec   :  { %v248_v39 = vrot.slane %v247_v36, 4  ;;  %v302_v40 = vadd.f32 %v301_v38, %v300_v37 }
  0xee   :  { %v249_v41 = vadd.f32 %v248_v39, %v247_v36  ;;  %v303_v42 = vrot.slane %v302_v40, 4 }
  0xf0   :  { %v250_v43 = vrot.slane %v249_v41, 2  ;;  %v304_v45 = vadd.f32 %v303_v42, %v302_v40 }
  0xf2   :  { %v251_v31 = vadd.f32 %v250_v43, %v249_v41  ;;  %v305_v46 = vrot.slane %v304_v45, 2 }
  0xf4   :  { %v252_v47 = vrot.slane %v251_v31, 1  ;;  %v306_v48 = vadd.f32 %v305_v46, %v304_v45 }
  0xf6   :  { %v253_v49 = vadd.f32 %v252_v47, %v251_v31  ;;  %v307_v50 = vrot.slane %v306_v48, 1 }
  0xf8   :  { %255 = vst.msk [vmem:[%s557_s3] sm:$0x1] %vm254_vm2, %v253_v49  ;;  %v308_v44 = vadd.f32 %v307_v50, %v306_v48 }
  0xfa   :  { %309 = vst.msk [vmem:[%s557_s3 + $0x1] sm:$0x1] %vm254_vm2, %v308_v44 }

// kernel: bottleneck_forward.7
= control target key start
LH: loop header
LB: loop body
LE: loop exit
PB: predicated region body
PF: predicated region fallthrough
CT: control target
= control target key end

     0   :  { %s646_s12 = smov 0   ;;  %s841_s0 = inlined_call_operand.vmem [shape: f32[512,8], index: 0, kind: input, shape index: {}]   ;;  %s842_s1 = inlined_call_operand.vmem [shape: f32[1,8], index: 1, kind: input, shape index: {}]   ;;  %s843_s2 = inlined_call_operand.vmem [shape: f32[1,8], index: 2, kind: input, shape index: {}]   ;;  %s844_s3 = inlined_call_operand.vmem [shape: bf16[512,8], index: 3, kind: output, shape index: {}]  }
   0x1 LB: > { %s533_s13 = sadd.s32 4294967295, %s624_s12   ;;  %p537_p0 = scmp.ge.s32.totalorder %s624_s12, 1  ;;  %s624_s12 = sphi %s646_s12, %s13_s12  }
   0x2   : > { %p138_p1 = scmp.lt.s32.totalorder %s624_s12, 3 }
   0x4   : > { %p139_p2 = pnand %p537_p0, %p138_p1 }
   0x5   : > { %s538_s14 = sshll.u32 (!%p139_p2), %s533_s13, 5 }
   0x6   : > { %142 = sbr.rel (%p139_p2) target bundleno = 54 (0x36), region = 32  ;;  %p163_p3 = scmp.lt.s32.totalorder (!%p139_p2), %s538_s14, 63 }
   0xb   : > { %s846_s14 = smov (!%p163_p3, %s538_s14), 63  ;;  %v660_v0 = vld [vmem:[%s842_s1] ss:$0 sm:$0xff]  ;;  %vm444_vm0 = vcmask 60416  }
   0xc   : > { %s539_s15 = sshll.u32 %s846_s14, 3  ;;  %v670_v1 = vld [vmem:[%s843_s2] ss:$0 sm:$0xff]  ;;  %s541_s23 = sshll.u32 %s846_s14, 2 }
   0xd   : > { %s665_s20 = scalar_lea.vmem %s841_s0, %s539_s15  ;;  %s699_s26 = scalar_lea.vmem %s844_s3, %s541_s23 }
   0xe   : > { %v174_v2 = vld [vmem:[%s665_s20] sm:$0xff]  ;;  %v175_v3 = vld [vmem:[%s665_s20 + $0x8] sm:$0xff]  ;;  %v176_v4 = vld [vmem:[%s665_s20 + $0x10] sm:$0xff] }
   0xf   : > { %v213_v5 = vmul.f32 %v660_v0, %v174_v2  ;;  %v214_v6 = vmul.f32 %v660_v0, %v175_v3  ;;  %v215_v7 = vmul.f32 %v660_v0, %v176_v4  ;;  %v177_v8 = vld [vmem:[%s665_s20 + $0x18] sm:$0xff]  ;;  %v178_v9 = vld [vmem:[%s665_s20 + $0x20] sm:$0xff]  ;;  %v179_v10 = vld [vmem:[%s665_s20 + $0x28] sm:$0xff] }
  0x10   : > { %v216_v11 = vmul.f32 %v660_v0, %v177_v8  ;;  %v217_v12 = vmul.f32 %v660_v0, %v178_v9  ;;  %v218_v13 = vmul.f32 %v660_v0, %v179_v10  ;;  %v180_v14 = vld [vmem:[%s665_s20 + $0x30] sm:$0xff]  ;;  %v181_v15 = vld [vmem:[%s665_s20 + $0x38] sm:$0xff]  ;;  %v182_v32 = vld [vmem:[%s665_s20 + $0x40] sm:$0xff] }
  0x11   : > { %v252_v16 = vadd.f32 %v670_v1, %v213_v5  ;;  %v253_v17 = vadd.f32 %v670_v1, %v214_v6  ;;  %v254_v18 = vadd.f32 %v670_v1, %v215_v7  ;;  %v219_v19 = vmul.f32 %v660_v0, %v180_v14  ;;  %v183_v33 = vld [vmem:[%s665_s20 + $0x48] sm:$0xff]  ;;  %v184_v34 = vld [vmem:[%s665_s20 + $0x50] sm:$0xff]  ;;  %v185_v39 = vld [vmem:[%s665_s20 + $0x58] sm:$0xff] }
  0x12   : > { %v255_v20 = vadd.f32 %v670_v1, %v216_v11  ;;  %v256_v21 = vadd.f32 %v670_v1, %v217_v12  ;;  %v257_v22 = vadd.f32 %v670_v1, %v218_v13  ;;  %v220_v23 = vmul.f32 %v660_v0, %v181_v15  ;;  %v186_v40 = vld [vmem:[%s665_s20 + $0x60] sm:$0xff]  ;;  %v187_v41 = vld [vmem:[%s665_s20 + $0x68] sm:$0xff]  ;;  %v188_v46 = vld [vmem:[%s665_s20 + $0x70] sm:$0xff] }
  0x13   : > { %v284_v24 = vmax.f32 %v252_v16, 0.0  ;;  %v285_v25 = vmax.f32 %v253_v17, 0.0  ;;  %v286_v26 = vmax.f32 %v254_v18, 0.0  ;;  %v258_v27 = vadd.f32 %v670_v1, %v219_v19  ;;  %v189_v51 = vld [vmem:[%s665_s20 + $0x78] sm:$0xff]  ;;  %v190_v10 = vld [vmem:[%s665_s20 + $0x80] sm:$0xff]  ;;  %v191_v11 = vld [vmem:[%s665_s20 + $0x88] sm:$0xff] }
  0x14   : > { %v287_v28 = vmax.f32 %v255_v20, 0.0  ;;  %v288_v29 = vmax.f32 %v256_v21, 0.0  ;;  %v289_v30 = vmax.f32 %v257_v22, 0.0  ;;  %v259_v31 = vadd.f32 %v670_v1, %v220_v23  ;;  %v192_v12 = vld [vmem:[%s665_s20 + $0x90] sm:$0xff]  ;;  %v193_v17 = vld [vmem:[%s665_s20 + $0x98] sm:$0xff]  ;;  %v194_v18 = vld [vmem:[%s665_s20 + $0xa0] sm:$0xff] }
  0x15   : > { %v578_v35 = vpack.c.bf16 %v284_v24, %v284_v24  ;;  %v579_v36 = vpack.c.bf16 %v285_v25, %v285_v25  ;;  %v580_v37 = vpack.c.bf16 %v286_v26, %v286_v26  ;;  %v290_v38 = vmax.f32 %v258_v27, 0.0  ;;  %v195_v19 = vld [vmem:[%s665_s20 + $0xa8] sm:$0xff]  ;;  %v196_v24 = vld [vmem:[%s665_s20 + $0xb0] sm:$0xff] }
  0x16   : > { %v581_v42 = vpack.c.bf16 %v287_v28, %v287_v28  ;;  %v582_v43 = vpack.c.bf16 %v288_v29, %v288_v29  ;;  %v583_v44 = vpack.c.bf16 %v289_v30, %v289_v30  ;;  %v291_v45 = vmax.f32 %v259_v31, 0.0  ;;  %v197_v29 = vld [vmem:[%s665_s20 + $0xb8] sm:$0xff] }
  0x17   : > { %445 = vst.msk [vmem:[%s699_s26] sm:$0xf] %vm444_vm0, %v578_v35  ;;  %446 = vst.msk [vmem:[%s699_s26 + $0x4] sm:$0xf] %vm444_vm0, %v579_v36  ;;  %v584_v47 = vpack.c.bf16 %v290_v38, %v290_v38  ;;  %v221_v48 = vmul.f32 %v660_v0, %v182_v32  ;;  %v222_v49 = vmul.f32 %v660_v0, %v183_v33 }
  0x18   : > { %447 = vst.msk [vmem:[%s699_s26 + $0x8] sm:$0xf] %vm444_vm0, %v580_v37  ;;  %v223_v50 = vmul.f32 %v660_v0, %v184_v34  ;;  %448 = vst.msk [vmem:[%s699_s26 + $0xc] sm:$0xf] %vm444_vm0, %v581_v42  ;;  %v585_v52 = vpack.c.bf16 %v291_v45, %v291_v45  ;;  %v224_v53 = vmul.f32 %v660_v0, %v185_v39 }
  0x19   : > { %449 = vst.msk [vmem:[%s699_s26 + $0x10] sm:$0xf] %vm444_vm0, %v582_v43  ;;  %450 = vst.msk [vmem:[%s699_s26 + $0x14] sm:$0xf] %vm444_vm0, %v583_v44  ;;  %v225_v54 = vmul.f32 %v660_v0, %v186_v40  ;;  %v226_v55 = vmul.f32 %v660_v0, %v187_v41  ;;  %v260_v56 = vadd.f32 %v670_v1, %v221_v48 }
  0x1a   : > { %451 = vst.msk [vmem:[%s699_s26 + $0x18] sm:$0xf] %vm444_vm0, %v584_v47  ;;  %v261_v57 = vadd.f32 %v670_v1, %v222_v49  ;;  %v262_v58 = vadd.f32 %v670_v1, %v223_v50  ;;  %v227_v59 = vmul.f32 %v660_v0, %v188_v46  ;;  %452 = vst.msk [vmem:[%s699_s26 + $0x1c] sm:$0xf] %vm444_vm0, %v585_v52  ;;  %v198_v50 = vld [vmem:[%s665_s20 + $0xc0] sm:$0xff]  ;;  %v200_v52 = vld [vmem:[%s665_s20 + $0xd0] sm:$0xff] }
  0x1b   : > { %v263_v60 = vadd.f32 %v670_v1, %v224_v53  ;;  %v264_v61 = vadd.f32 %v670_v1, %v225_v54  ;;  %v265_v62 = vadd.f32 %v670_v1, %v226_v55  ;;  %v228_v63 = vmul.f32 %v660_v0, %v189_v51  ;;  %v199_v51 = vld [vmem:[%s665_s20 + $0xc8] sm:$0xff] }
  0x1c   : > { %v292_v2 = vmax.f32 %v260_v56, 0.0  ;;  %v293_v3 = vmax.f32 %v261_v57, 0.0  ;;  %v294_v4 = vmax.f32 %v262_v58, 0.0  ;;  %v266_v5 = vadd.f32 %v670_v1, %v227_v59  ;;  %v201_v57 = vld [vmem:[%s665_s20 + $0xd8] sm:$0xff]  ;;  %v202_v58 = vld [vmem:[%s665_s20 + $0xe0] sm:$0xff]  ;;  %v203_v59 = vld [vmem:[%s665_s20 + $0xe8] sm:$0xff] }
  0x1d   : > { %v295_v6 = vmax.f32 %v263_v60, 0.0  ;;  %v296_v7 = vmax.f32 %v264_v61, 0.0  ;;  %v297_v8 = vmax.f32 %v265_v62, 0.0  ;;  %v267_v9 = vadd.f32 %v670_v1, %v228_v63 }
  0x1e   : > { %v586_v13 = vpack.c.bf16 %v292_v2, %v292_v2  ;;  %v587_v14 = vpack.c.bf16 %v293_v3, %v293_v3  ;;  %v588_v15 = vpack.c.bf16 %v294_v4, %v294_v4  ;;  %v298_v16 = vmax.f32 %v266_v5, 0.0  ;;  %v204_v2 = vld [vmem:[%s665_s20 + $0xf0] sm:$0xff] }
  0x1f   : > { %v589_v20 = vpack.c.bf16 %v295_v6, %v295_v6  ;;  %v590_v21 = vpack.c.bf16 %v296_v7, %v296_v7  ;;  %v591_v22 = vpack.c.bf16 %v297_v8, %v297_v8  ;;  %v299_v23 = vmax.f32 %v267_v9, 0.0  ;;  %v205_v7 = vld [vmem:[%s665_s20 + $0xf8] sm:$0xff] }
  0x20   : > { %453 = vst.msk [vmem:[%s699_s26 + $0x20] sm:$0xf] %vm444_vm0, %v586_v13  ;;  %454 = vst.msk [vmem:[%s699_s26 + $0x24] sm:$0xf] %vm444_vm0, %v587_v14  ;;  %v592_v25 = vpack.c.bf16 %v298_v16, %v298_v16  ;;  %v229_v26 = vmul.f32 %v660_v0, %v190_v10  ;;  %v230_v27 = vmul.f32 %v660_v0, %v191_v11 }
  0x21   : > { %455 = vst.msk [vmem:[%s699_s26 + $0x28] sm:$0xf] %vm444_vm0, %v588_v15  ;;  %v231_v28 = vmul.f32 %v660_v0, %v192_v12  ;;  %456 = vst.msk [vmem:[%s699_s26 + $0x2c] sm:$0xf] %vm444_vm0, %v589_v20  ;;  %v593_v30 = vpack.c.bf16 %v299_v23, %v299_v23  ;;  %v232_v31 = vmul.f32 %v660_v0, %v193_v17 }
  0x22   : > { %457 = vst.msk [vmem:[%s699_s26 + $0x30] sm:$0xf] %vm444_vm0, %v590_v21  ;;  %458 = vst.msk [vmem:[%s699_s26 + $0x34] sm:$0xf] %vm444_vm0, %v591_v22  ;;  %v233_v32 = vmul.f32 %v660_v0, %v194_v18  ;;  %v234_v33 = vmul.f32 %v660_v0, %v195_v19  ;;  %v268_v34 = vadd.f32 %v670_v1, %v229_v26 }
  0x23   : > { %459 = vst.msk [vmem:[%s699_s26 + $0x38] sm:$0xf] %vm444_vm0, %v592_v25  ;;  %v269_v35 = vadd.f32 %v670_v1, %v230_v27  ;;  %v270_v36 = vadd.f32 %v670_v1, %v231_v28  ;;  %v235_v37 = vmul.f32 %v660_v0, %v196_v24  ;;  %460 = vst.msk [vmem:[%s699_s26 + $0x3c] sm:$0xf] %vm444_vm0, %v593_v30 }
  0x24   : > { %v271_v38 = vadd.f32 %v670_v1, %v232_v31  ;;  %v272_v39 = vadd.f32 %v670_v1, %v233_v32  ;;  %v273_v40 = vadd.f32 %v670_v1, %v234_v33  ;;  %v236_v41 = vmul.f32 %v660_v0, %v197_v29 }
  0x25   : > { %v300_v42 = vmax.f32 %v268_v34, 0.0  ;;  %v301_v43 = vmax.f32 %v269_v35, 0.0  ;;  %v302_v44 = vmax.f32 %v270_v36, 0.0  ;;  %v274_v45 = vadd.f32 %v670_v1, %v235_v37 }
  0x26   : > { %v303_v46 = vmax.f32 %v271_v38, 0.0  ;;  %v304_v47 = vmax.f32 %v272_v39, 0.0  ;;  %v305_v48 = vmax.f32 %v273_v40, 0.0  ;;  %v275_v49 = vadd.f32 %v670_v1, %v236_v41 }
  0x27   : > { %v594_v53 = vpack.c.bf16 %v300_v42, %v300_v42  ;;  %v595_v54 = vpack.c.bf16 %v301_v43, %v301_v43  ;;  %v596_v55 = vpack.c.bf16 %v302_v44, %v302_v44  ;;  %v306_v56 = vmax.f32 %v274_v45, 0.0 }
  0x28   : > { %v597_v60 = vpack.c.bf16 %v303_v46, %v303_v46  ;;  %v598_v61 = vpack.c.bf16 %v304_v47, %v304_v47  ;;  %v599_v62 = vpack.c.bf16 %v305_v48, %v305_v48  ;;  %v307_v63 = vmax.f32 %v275_v49, 0.0 }
  0x29   : > { %461 = vst.msk [vmem:[%s699_s26 + $0x40] sm:$0xf] %vm444_vm0, %v594_v53  ;;  %462 = vst.msk [vmem:[%s699_s26 + $0x44] sm:$0xf] %vm444_vm0, %v595_v54  ;;  %v600_v3 = vpack.c.bf16 %v306_v56, %v306_v56  ;;  %v237_v4 = vmul.f32 %v660_v0, %v198_v50  ;;  %v238_v5 = vmul.f32 %v660_v0, %v199_v51 }
  0x2a   : > { %463 = vst.msk [vmem:[%s699_s26 + $0x48] sm:$0xf] %vm444_vm0, %v596_v55  ;;  %v239_v6 = vmul.f32 %v660_v0, %v200_v52  ;;  %464 = vst.msk [vmem:[%s699_s26 + $0x4c] sm:$0xf] %vm444_vm0, %v597_v60  ;;  %v601_v8 = vpack.c.bf16 %v307_v63, %v307_v63  ;;  %v240_v9 = vmul.f32 %v660_v0, %v201_v57 }
  0x2b   : > { %465 = vst.msk [vmem:[%s699_s26 + $0x50] sm:$0xf] %vm444_vm0, %v598_v61  ;;  %466 = vst.msk [vmem:[%s699_s26 + $0x54] sm:$0xf] %vm444_vm0, %v599_v62  ;;  %v241_v10 = vmul.f32 %v660_v0, %v202_v58  ;;  %v242_v11 = vmul.f32 %v660_v0, %v203_v59  ;;  %v276_v12 = vadd.f32 %v670_v1, %v237_v4 }
  0x2c   : > { %467 = vst.msk [vmem:[%s699_s26 + $0x58] sm:$0xf] %vm444_vm0, %v600_v3  ;;  %v277_v13 = vadd.f32 %v670_v1, %v238_v5  ;;  %v278_v14 = vadd.f32 %v670_v1, %v239_v6  ;;  %v243_v15 = vmul.f32 %v660_v0, %v204_v2  ;;  %468 = vst.msk [vmem:[%s699_s26 + $0x5c] sm:$0xf] %vm444_vm0, %v601_v8 }
  0x2d   : > { %v279_v16 = vadd.f32 %v670_v1, %v240_v9  ;;  %v280_v17 = vadd.f32 %v670_v1, %v241_v10  ;;  %v281_v18 = vadd.f32 %v670_v1, %v242_v11  ;;  %v244_v19 = vmul.f32 %v660_v0, %v205_v7 }
  0x2e   : > { %v308_v20 = vmax.f32 %v276_v12, 0.0  ;;  %v309_v21 = vmax.f32 %v277_v13, 0.0  ;;  %v310_v22 = vmax.f32 %v278_v14, 0.0  ;;  %v282_v23 = vadd.f32 %v670_v1, %v243_v15 }
  0x2f   : > { %v311_v24 = vmax.f32 %v279_v16, 0.0  ;;  %v312_v25 = vmax.f32 %v280_v17, 0.0  ;;  %v313_v26 = vmax.f32 %v281_v18, 0.0  ;;  %v283_v27 = vadd.f32 %v670_v1, %v244_v19 }
  0x30   : > { %v602_v28 = vpack.c.bf16 %v308_v20, %v308_v20  ;;  %v603_v29 = vpack.c.bf16 %v309_v21, %v309_v21  ;;  %v604_v0 = vpack.c.bf16 %v310_v22, %v310_v22  ;;  %v314_v30 = vmax.f32 %v282_v23, 0.0 }
  0x31   : > { %v605_v31 = vpack.c.bf16 %v311_v24, %v311_v24  ;;  %v606_v32 = vpack.c.bf16 %v312_v25, %v312_v25  ;;  %v607_v33 = vpack.c.bf16 %v313_v26, %v313_v26  ;;  %v315_v34 = vmax.f32 %v283_v27, 0.0 }
  0x32   : > { %469 = vst.msk [vmem:[%s699_s26 + $0x60] sm:$0xf] %vm444_vm0, %v602_v28  ;;  %470 = vst.msk [vmem:[%s699_s26 + $0x64] sm:$0xf] %vm444_vm0, %v603_v29  ;;  %v608_v35 = vpack.c.bf16 %v314_v30, %v314_v30 }
  0x33   : > { %471 = vst.msk [vmem:[%s699_s26 + $0x68] sm:$0xf] %vm444_vm0, %v604_v0  ;;  %472 = vst.msk [vmem:[%s699_s26 + $0x6c] sm:$0xf] %vm444_vm0, %v605_v31  ;;  %v609_v1 = vpack.c.bf16 %v315_v34, %v315_v34 }
  0x34   : > { %473 = vst.msk [vmem:[%s699_s26 + $0x70] sm:$0xf] %vm444_vm0, %v606_v32  ;;  %474 = vst.msk [vmem:[%s699_s26 + $0x74] sm:$0xf] %vm444_vm0, %v607_v33 }
  0x35   : > { %475 = vst.msk [vmem:[%s699_s26 + $0x78] sm:$0xf] %vm444_vm0, %v608_v35  ;;  %476 = vst.msk [vmem:[%s699_s26 + $0x7c] sm:$0xf] %vm444_vm0, %v609_v1 }
  0x36 PF: > { %s13_s12 = sadd.s32 1, %s624_s12  }
  0x37   : > { %p10_p4 = scmp.ge.s32.totalorder %s13_s12, 4  }
  0x39   :  { %12 = sbr.rel (!%p10_p4) target bundleno = 1 (0x1), region = 62 }

// kernel: bottleneck_forward.6
= control target key start
LH: loop header
LB: loop body
LE: loop exit
PB: predicated region body
PF: predicated region fallthrough
CT: control target
= control target key end

     0   :  { %s960_s12 = smov 0   ;;  %s1252_s0 = inlined_call_operand.vmem [shape: bf16[512,16], index: 0, kind: input, shape index: {}]   ;;  %s1253_s1 = inlined_call_operand.vmem [shape: bf16[16,8], index: 1, kind: input, shape index: {}]   ;;  %s1254_s2 = inlined_call_operand.vmem [shape: f32[512,8], index: 2, kind: output, shape index: {0}]   ;;  %s1255_s3 = inlined_call_operand.vmem [shape: f32[2,2,8], index: 3, kind: output, shape index: {1}]  }
   0x1 LB: > { %s966_s13 = sadd.s32 4294967295, %s938_s12   ;;  %p813_p0 = scmp.ge.s32.totalorder %s938_s12, 1  ;;  %s938_s12 = sphi %s960_s12, %s14_s12  }
   0x2   : > { %p141_p1 = scmp.lt.s32.totalorder %s938_s12, 3 }
   0x4   : > { %p142_p2 = pnand %p813_p0, %p141_p1 }
   0x5   : > { %s814_s16 = sshll.u32 (!%p142_p2), %s966_s13, 5  ;;  %p181_p4 = scmp.lt.s32.totalorder (!%p142_p2), %s966_s13, 1 }
   0x6   : > { %145 = sbr.rel (%p142_p2) target bundleno = 293 (0x125), region = 28  ;;  %p170_p3 = scmp.lt.s32.totalorder (!%p142_p2), %s814_s16, 63 }
   0xb   : > { %v915_v0 = vld [vmem:[%s1253_s1] sm:$0xff]   ;;  %s1257_s16 = smov (!%p170_p3, %s814_s16), 63  ;;  %vm306_vm0 = vcmask 130048   ;;  %vm516_vm1 = vcmask 64512   ;;  %s1259_s13 = smov (!%p181_p4, %s966_s13), 1  ;;  %vm618_vm2 = vcmask 57344  }
   0xc   : > { %871 = vmatprep.subr.bf16.mxu0 %v915_v0  ;;  %905 = vmatprep.subr.bf16.mxu1 %v915_v0  ;;  %s815_s17 = sshll.u32 %s1257_s16, 2  ;;  %s817_s21 = sshll.u32 %s1257_s16, 3 }
   0xd   : > { %872 = vmatpush3.bf16.msra.mxu0 %v915_v0  ;;  %906 = vmatpush3.bf16.msra.mxu1 %v915_v0  ;;  %s980_s20 = scalar_lea.vmem %s1252_s0, %s815_s17  ;;  %s1018_s24 = scalar_lea.vmem %s1254_s2, %s817_s21 }
   0xe   : > { %v916_v1 = vld [vmem:[%s980_s20] sm:$0xff]   ;;  %v917_v2 = vld [vmem:[%s980_s20 + $0x8] sm:$0xff]   ;;  %v918_v3 = vld [vmem:[%s980_s20 + $0x10] sm:$0xff]   ;;  %s818_s25 = sshll.u32 %s1259_s13, 1 }
   0xf   : > { %873 = vmatprep.mubr.msk.bf16.mxu0 %vm306_vm0, %v916_v1  ;;  %v919_v4 = vld [vmem:[%s980_s20 + $0x18] sm:$0xff]   ;;  %v920_v5 = vld [vmem:[%s980_s20 + $0x20] sm:$0xff]   ;;  %v925_v7 = vld [vmem:[%s980_s20 + $0x48] sm:$0xff]   ;;  %s184_s28 = scalar_lea.vmem %s1255_s3, %s818_s25 }
  0x10   : > { %874 = vmatmul.mubr.msk.bf16.vlgmr.msra.gmra.mxu0 %vm306_vm0, %v917_v2  ;;  %v924_v6 = vld [vmem:[%s980_s20 + $0x40] sm:$0xff]   ;;  %v926_v8 = vld [vmem:[%s980_s20 + $0x50] sm:$0xff]   ;;  %v921_v9 = vld [vmem:[%s980_s20 + $0x28] sm:$0xff]  }
  0x11   : > { %877 = vmatprep.mubr.msk.bf16.mxu0 %vm306_vm0, %v918_v3  ;;  %889 = vmatprep.mubr.msk.bf16.mxu1 %vm306_vm0, %v924_v6  ;;  %v927_v10 = vld [vmem:[%s980_s20 + $0x58] sm:$0xff]   ;;  %v922_v11 = vld [vmem:[%s980_s20 + $0x30] sm:$0xff]   ;;  %v928_v12 = vld [vmem:[%s980_s20 + $0x60] sm:$0xff]  }
  0x12   : > { %890 = vmatmul.mubr.msk.bf16.vlgmr.msra.gmra.mxu1 %vm306_vm0, %v925_v7  ;;  %v923_v13 = vld [vmem:[%s980_s20 + $0x38] sm:$0xff]   ;;  %v929_v14 = vld [vmem:[%s980_s20 + $0x68] sm:$0xff]   ;;  %v930_v15 = vld [vmem:[%s980_s20 + $0x70] sm:$0xff]  }
  0x13   : > { %893 = vmatprep.mubr.msk.bf16.mxu1 %vm306_vm0, %v926_v8  ;;  %v931_v16 = vld [vmem:[%s980_s20 + $0x78] sm:$0xff]  }
  0x18   : > { %878 = vmatmul.mubr.msk.bf16.gmra.mxu0 %vm306_vm0, %v919_v4 }
  0x19   : > { %881 = vmatprep.mubr.msk.bf16.mxu0 %vm306_vm0, %v920_v5 }
  0x1a   : > { %894 = vmatmul.mubr.msk.bf16.gmra.mxu1 %vm306_vm0, %v927_v10 }
  0x1b   : > { %897 = vmatprep.mubr.msk.bf16.mxu1 %vm306_vm0, %v928_v12 }
  0x20   : > { %882 = vmatmul.mubr.msk.bf16.gmra.mxu0 %vm306_vm0, %v921_v9 }
  0x21   : > { %885 = vmatprep.mubr.msk.bf16.mxu0 %vm306_vm0, %v922_v11 }
  0x22   : > { %898 = vmatmul.mubr.msk.bf16.gmra.mxu1 %vm306_vm0, %v929_v14 }
  0x23   : > { %901 = vmatprep.mubr.msk.bf16.mxu1 %vm306_vm0, %v930_v15 }
  0x28   : > { %886 = vmatmul.mubr.msk.bf16.gmra.mxu0 %vm306_vm0, %v923_v13 }
  0x2a   : > { %902 = vmatmul.mubr.msk.bf16.gmra.mxu1 %vm306_vm0, %v931_v16 }
  0xd0   : > { %v875_v17 = vpop.f32.mrf.mxu0 }
  0xd1   : > { %519 = vst.msk [vmem:[%s1018_s24 + $0x10] sm:$0xff] %vm516_vm1, %v875_v17  ;;  %v622_v22 = vmul.f32 %v875_v17, %v875_v17  ;;  %v552_v29 = vsel %vm516_vm1, %v875_v17, 0.0 }
  0xd2   : > { %v389_v18 = vpop.f32.mrf.mxu0  ;;  %v1030_v28 = vpop.f32.mrf.mxu1 }
  0xd3   : > { %517 = vst.msk [vmem:[%s1018_s24] sm:$0xff] %vm516_vm1, %v389_v18  ;;  %v620_v20 = vmul.f32 %v389_v18, %v389_v18  ;;  %v549_v23 = vsel %vm516_vm1, %v389_v18, 0.0  ;;  %535 = vst.msk [vmem:[%s1018_s24 + $0x90] sm:$0xff] %vm516_vm1, %v1030_v28  ;;  %v655_v37 = vsel %vm516_vm1, %v622_v22, 0.0 }
  0xd4   : > { %v876_v19 = vpop.f32.mrf.mxu0  ;;  %v1040_v36 = vpop.f32.mrf.mxu1 }
  0xd5   : > { %520 = vst.msk [vmem:[%s1018_s24 + $0x18] sm:$0xff] %vm516_vm1, %v876_v19  ;;  %v652_v30 = vsel %vm516_vm1, %v620_v20, 0.0  ;;  %v623_v31 = vmul.f32 %v876_v19, %v876_v19  ;;  %v554_v38 = vsel %vm516_vm1, %v876_v19, 0.0  ;;  %533 = vst.msk [vmem:[%s1018_s24 + $0x80] sm:$0xff] %vm516_vm1, %v1040_v36 }
  0xd6   : > { %v392_v21 = vpop.f32.mrf.mxu0  ;;  %v1049_v43 = vpop.f32.mrf.mxu1 }
  0xd7   : > { %518 = vst.msk [vmem:[%s1018_s24 + $0x8] sm:$0xff] %vm516_vm1, %v392_v21  ;;  %v550_v24 = vsel %vm516_vm1, %v392_v21, 0.0  ;;  %v621_v25 = vmul.f32 %v392_v21, %v392_v21  ;;  %v657_v44 = vsel %vm516_vm1, %v623_v31, 0.0  ;;  %536 = vst.msk [vmem:[%s1018_s24 + $0x98] sm:$0xff] %vm516_vm1, %v1049_v43 }
  0xd8   : > { %v551_v26 = vadd.f32 %v550_v24, %v549_v23  ;;  %v879_v27 = vpop.f32.mrf.mxu0  ;;  %v1058_v49 = vpop.f32.mrf.mxu1 }
  0xd9   : > { %v653_v32 = vsel %vm516_vm1, %v621_v25, 0.0  ;;  %523 = vst.msk [vmem:[%s1018_s24 + $0x30] sm:$0xff] %vm516_vm1, %v879_v27  ;;  %v626_v50 = vmul.f32 %v879_v27, %v879_v27  ;;  %534 = vst.msk [vmem:[%s1018_s24 + $0x88] sm:$0xff] %vm516_vm1, %v1058_v49  ;;  %v560_v58 = vsel %vm516_vm1, %v879_v27, 0.0 }
  0xda   : > { %v553_v33 = vadd.f32 %v552_v29, %v551_v26  ;;  %v654_v34 = vadd.f32 %v653_v32, %v652_v30  ;;  %v405_v35 = vpop.f32.mrf.mxu0  ;;  %v1067_v57 = vpop.f32.mrf.mxu1 }
  0xdb   : > { %521 = vst.msk [vmem:[%s1018_s24 + $0x20] sm:$0xff] %vm516_vm1, %v405_v35  ;;  %v624_v39 = vmul.f32 %v405_v35, %v405_v35  ;;  %v556_v45 = vsel %vm516_vm1, %v405_v35, 0.0  ;;  %539 = vst.msk [vmem:[%s1018_s24 + $0xb0] sm:$0xff] %vm516_vm1, %v1067_v57  ;;  %v663_v1 = vsel %vm516_vm1, %v626_v50, 0.0 }
  0xdc   : > { %v656_v40 = vadd.f32 %v655_v37, %v654_v34  ;;  %v555_v41 = vadd.f32 %v554_v38, %v553_v33  ;;  %v880_v42 = vpop.f32.mrf.mxu0  ;;  %v1076_v0 = vpop.f32.mrf.mxu1 }
  0xdd   : > { %524 = vst.msk [vmem:[%s1018_s24 + $0x38] sm:$0xff] %vm516_vm1, %v880_v42  ;;  %v659_v51 = vsel %vm516_vm1, %v624_v39, 0.0  ;;  %v627_v59 = vmul.f32 %v880_v42, %v880_v42  ;;  %v562_v2 = vsel %vm516_vm1, %v880_v42, 0.0  ;;  %537 = vst.msk [vmem:[%s1018_s24 + $0xa0] sm:$0xff] %vm516_vm1, %v1076_v0 }
  0xde   : > { %v557_v46 = vadd.f32 %v556_v45, %v555_v41  ;;  %v658_v47 = vadd.f32 %v657_v44, %v656_v40  ;;  %v408_v48 = vpop.f32.mrf.mxu0  ;;  %v1085_v7 = vpop.f32.mrf.mxu1 }
  0xdf   : > { %522 = vst.msk [vmem:[%s1018_s24 + $0x28] sm:$0xff] %vm516_vm1, %v408_v48  ;;  %v558_v52 = vsel %vm516_vm1, %v408_v48, 0.0  ;;  %v625_v53 = vmul.f32 %v408_v48, %v408_v48  ;;  %v665_v8 = vsel %vm516_vm1, %v627_v59, 0.0  ;;  %540 = vst.msk [vmem:[%s1018_s24 + $0xb8] sm:$0xff] %vm516_vm1, %v1085_v7 }
  0xe0   : > { %v660_v54 = vadd.f32 %v659_v51, %v658_v47  ;;  %v559_v55 = vadd.f32 %v558_v52, %v557_v46  ;;  %v883_v56 = vpop.f32.mrf.mxu0  ;;  %v1094_v13 = vpop.f32.mrf.mxu1 }
  0xe1   : > { %v661_v60 = vsel %vm516_vm1, %v625_v53, 0.0  ;;  %527 = vst.msk [vmem:[%s1018_s24 + $0x50] sm:$0xff] %vm516_vm1, %v883_v56  ;;  %v630_v14 = vmul.f32 %v883_v56, %v883_v56  ;;  %538 = vst.msk [vmem:[%s1018_s24 + $0xa8] sm:$0xff] %vm516_vm1, %v1094_v13  ;;  %v568_v22 = vsel %vm516_vm1, %v883_v56, 0.0 }
  0xe2   : > { %v561_v61 = vadd.f32 %v560_v58, %v559_v55  ;;  %v662_v62 = vadd.f32 %v661_v60, %v660_v54  ;;  %v421_v63 = vpop.f32.mrf.mxu0  ;;  %v1103_v21 = vpop.f32.mrf.mxu1 }
  0xe3   : > { %525 = vst.msk [vmem:[%s1018_s24 + $0x40] sm:$0xff] %vm516_vm1, %v421_v63  ;;  %v628_v3 = vmul.f32 %v421_v63, %v421_v63  ;;  %v564_v9 = vsel %vm516_vm1, %v421_v63, 0.0  ;;  %543 = vst.msk [vmem:[%s1018_s24 + $0xd0] sm:$0xff] %vm516_vm1, %v1103_v21  ;;  %v671_v30 = vsel %vm516_vm1, %v630_v14, 0.0 }
  0xe4   : > { %v664_v4 = vadd.f32 %v663_v1, %v662_v62  ;;  %v563_v5 = vadd.f32 %v562_v2, %v561_v61  ;;  %v884_v6 = vpop.f32.mrf.mxu0  ;;  %v1112_v29 = vpop.f32.mrf.mxu1  ;;  %v636_v62 = vmul.f32 %v1040_v36, %v1040_v36 }
  0xe5   : > { %528 = vst.msk [vmem:[%s1018_s24 + $0x58] sm:$0xff] %vm516_vm1, %v884_v6  ;;  %v667_v15 = vsel %vm516_vm1, %v628_v3, 0.0  ;;  %v631_v23 = vmul.f32 %v884_v6, %v884_v6  ;;  %v570_v31 = vsel %vm516_vm1, %v884_v6, 0.0  ;;  %541 = vst.msk [vmem:[%s1018_s24 + $0xc0] sm:$0xff] %vm516_vm1, %v1112_v29 }
  0xe6   : > { %v565_v10 = vadd.f32 %v564_v9, %v563_v5  ;;  %v666_v11 = vadd.f32 %v665_v8, %v664_v4  ;;  %v424_v12 = vpop.f32.mrf.mxu0  ;;  %v1121_v37 = vpop.f32.mrf.mxu1  ;;  %v580_v4 = vsel %vm516_vm1, %v1040_v36, 0.0  ;;  %v637_v5 = vmul.f32 %v1058_v49, %v1058_v49 }
  0xe7   : > { %526 = vst.msk [vmem:[%s1018_s24 + $0x48] sm:$0xff] %vm516_vm1, %v424_v12  ;;  %v566_v16 = vsel %vm516_vm1, %v424_v12, 0.0  ;;  %v629_v17 = vmul.f32 %v424_v12, %v424_v12  ;;  %v673_v38 = vsel %vm516_vm1, %v631_v23, 0.0  ;;  %544 = vst.msk [vmem:[%s1018_s24 + $0xd8] sm:$0xff] %vm516_vm1, %v1121_v37  ;;  %v582_v12 = vsel %vm516_vm1, %v1058_v49, 0.0 }
  0xe8   : > { %v668_v18 = vadd.f32 %v667_v15, %v666_v11  ;;  %v567_v19 = vadd.f32 %v566_v16, %v565_v10  ;;  %v887_v20 = vpop.f32.mrf.mxu0  ;;  %v1130_v44 = vpop.f32.mrf.mxu1  ;;  %v638_v10 = vmul.f32 %v1030_v28, %v1030_v28  ;;  %v683_v11 = vsel %vm516_vm1, %v636_v62, 0.0 }
  0xe9   : > { %v669_v24 = vsel %vm516_vm1, %v629_v17, 0.0  ;;  %531 = vst.msk [vmem:[%s1018_s24 + $0x70] sm:$0xff] %vm516_vm1, %v887_v20  ;;  %v634_v45 = vmul.f32 %v887_v20, %v887_v20  ;;  %542 = vst.msk [vmem:[%s1018_s24 + $0xc8] sm:$0xff] %vm516_vm1, %v1130_v44  ;;  %v576_v53 = vsel %vm516_vm1, %v887_v20, 0.0  ;;  %v584_v15 = vsel %vm516_vm1, %v1030_v28, 0.0 }
  0xea   : > { %v569_v25 = vadd.f32 %v568_v22, %v567_v19  ;;  %v670_v26 = vadd.f32 %v669_v24, %v668_v18  ;;  %v437_v27 = vpop.f32.mrf.mxu0  ;;  %v1139_v52 = vpop.f32.mrf.mxu1  ;;  %v639_v16 = vmul.f32 %v1049_v43, %v1049_v43  ;;  %v685_v17 = vsel %vm516_vm1, %v637_v5, 0.0 }
  0xeb   : > { %529 = vst.msk [vmem:[%s1018_s24 + $0x60] sm:$0xff] %vm516_vm1, %v437_v27  ;;  %v632_v32 = vmul.f32 %v437_v27, %v437_v27  ;;  %v572_v39 = vsel %vm516_vm1, %v437_v27, 0.0  ;;  %547 = vst.msk [vmem:[%s1018_s24 + $0xf0] sm:$0xff] %vm516_vm1, %v1139_v52  ;;  %v679_v60 = vsel %vm516_vm1, %v634_v45, 0.0  ;;  %v687_v20 = vsel %vm516_vm1, %v638_v10, 0.0 }
  0xec   : > { %v672_v33 = vadd.f32 %v671_v30, %v670_v26  ;;  %v571_v34 = vadd.f32 %v570_v31, %v569_v25  ;;  %v888_v35 = vpop.f32.mrf.mxu0  ;;  %v1146_v59 = vpop.f32.mrf.mxu1  ;;  %v586_v49 = vsel %vm516_vm1, %v1049_v43, 0.0  ;;  %v640_v22 = vmul.f32 %v1076_v0, %v1076_v0 }
  0xed   : > { %532 = vst.msk [vmem:[%s1018_s24 + $0x78] sm:$0xff] %vm516_vm1, %v888_v35  ;;  %v675_v46 = vsel %vm516_vm1, %v632_v32, 0.0  ;;  %v635_v54 = vmul.f32 %v888_v35, %v888_v35  ;;  %v578_v61 = vsel %vm516_vm1, %v888_v35, 0.0  ;;  %545 = vst.msk [vmem:[%s1018_s24 + $0xe0] sm:$0xff] %vm516_vm1, %v1146_v59  ;;  %v689_v25 = vsel %vm516_vm1, %v639_v16, 0.0 }
  0xee   : > { %v573_v40 = vadd.f32 %v572_v39, %v571_v34  ;;  %v674_v41 = vadd.f32 %v673_v38, %v672_v33  ;;  %v440_v42 = vpop.f32.mrf.mxu0  ;;  %v1155_v2 = vpop.f32.mrf.mxu1  ;;  %v588_v28 = vsel %vm516_vm1, %v1076_v0, 0.0  ;;  %v641_v26 = vmul.f32 %v1094_v13, %v1094_v13 }
  0xef   : > { %530 = vst.msk [vmem:[%s1018_s24 + $0x68] sm:$0xff] %vm516_vm1, %v440_v42  ;;  %v574_v47 = vsel %vm516_vm1, %v440_v42, 0.0  ;;  %v633_v48 = vmul.f32 %v440_v42, %v440_v42  ;;  %v681_v3 = vsel %vm516_vm1, %v635_v54, 0.0  ;;  %548 = vst.msk [vmem:[%s1018_s24 + $0xf8] sm:$0xff] %vm516_vm1, %v1155_v2  ;;  %v642_v31 = vmul.f32 %v1067_v57, %v1067_v57 }
  0xf0   : > { %v676_v50 = vadd.f32 %v675_v46, %v674_v41  ;;  %v575_v51 = vadd.f32 %v574_v47, %v573_v40  ;;  %v1165_v9 = vpop.f32.mrf.mxu1  ;;  %v691_v43 = vsel %vm516_vm1, %v640_v22, 0.0  ;;  %v590_v32 = vsel %vm516_vm1, %v1094_v13, 0.0 }
  0xf1   : > { %v677_v55 = vsel %vm516_vm1, %v633_v48, 0.0  ;;  %546 = vst.msk [vmem:[%s1018_s24 + $0xe8] sm:$0xff] %vm516_vm1, %v1165_v9  ;;  %v592_v35 = vsel %vm516_vm1, %v1067_v57, 0.0  ;;  %v643_v0 = vmul.f32 %v1085_v7, %v1085_v7  ;;  %v693_v38 = vsel %vm516_vm1, %v641_v26, 0.0 }
  0xf2   : > { %v577_v56 = vadd.f32 %v576_v53, %v575_v51  ;;  %v678_v58 = vadd.f32 %v677_v55, %v676_v50  ;;  %v695_v41 = vsel %vm516_vm1, %v642_v31, 0.0  ;;  %v594_v42 = vsel %vm516_vm1, %v1085_v7, 0.0 }
  0xf3   : > { %v644_v13 = vmul.f32 %v1112_v29, %v1112_v29  ;;  %v697_v47 = vsel %vm516_vm1, %v643_v0, 0.0  ;;  %v596_v57 = vsel %vm516_vm1, %v1112_v29, 0.0  ;;  %v645_v48 = vmul.f32 %v1130_v44, %v1130_v44 }
  0xf4   : > { %v579_v63 = vadd.f32 %v578_v61, %v577_v56  ;;  %v680_v1 = vadd.f32 %v679_v60, %v678_v58  ;;  %v646_v53 = vmul.f32 %v1103_v21, %v1103_v21  ;;  %v598_v54 = vsel %vm516_vm1, %v1130_v44, 0.0 }
  0xf5   : > { %v699_v7 = vsel %vm516_vm1, %v644_v13, 0.0  ;;  %v600_v58 = vsel %vm516_vm1, %v1103_v21, 0.0  ;;  %v647_v29 = vmul.f32 %v1121_v37, %v1121_v37  ;;  %v701_v60 = vsel %vm516_vm1, %v645_v48, 0.0 }
  0xf6   : > { %v682_v6 = vadd.f32 %v681_v3, %v680_v1  ;;  %v581_v8 = vadd.f32 %v580_v4, %v579_v63  ;;  %v703_v63 = vsel %vm516_vm1, %v646_v53, 0.0  ;;  %v602_v1 = vsel %vm516_vm1, %v1121_v37, 0.0 }
  0xf7   : > { %v648_v44 = vmul.f32 %v1146_v59, %v1146_v59  ;;  %v705_v5 = vsel %vm516_vm1, %v647_v29, 0.0  ;;  %v604_v21 = vsel %vm516_vm1, %v1146_v59, 0.0  ;;  %v608_v59 = vsel %vm516_vm1, %v1139_v52, 0.0 }
  0xf8   : > { %v583_v36 = vadd.f32 %v582_v12, %v581_v8  ;;  %v684_v14 = vadd.f32 %v683_v11, %v682_v6  ;;  %v649_v6 = vmul.f32 %v1165_v9, %v1165_v9  ;;  %v650_v11 = vmul.f32 %v1139_v52, %v1139_v52 }
  0xf9   : > { %v707_v37 = vsel %vm516_vm1, %v648_v44, 0.0  ;;  %v606_v12 = vsel %vm516_vm1, %v1165_v9, 0.0 }
  0xfa   : > { %v585_v18 = vadd.f32 %v584_v15, %v583_v36  ;;  %v686_v19 = vadd.f32 %v685_v17, %v684_v14  ;;  %v651_v15 = vmul.f32 %v1155_v2, %v1155_v2  ;;  %v709_v16 = vsel %vm516_vm1, %v649_v6, 0.0 }
  0xfc   : > { %v688_v23 = vadd.f32 %v687_v20, %v686_v19  ;;  %v587_v24 = vadd.f32 %v586_v49, %v585_v18  ;;  %v711_v19 = vsel %vm516_vm1, %v650_v11, 0.0  ;;  %v610_v20 = vsel %vm516_vm1, %v1155_v2, 0.0 }
  0xfd   : > { %v713_v22 = vsel %vm516_vm1, %v651_v15, 0.0 }
  0xfe   : > { %v589_v27 = vadd.f32 %v588_v28, %v587_v24  ;;  %v690_v30 = vadd.f32 %v689_v25, %v688_v23 }
 0x100   : > { %v692_v33 = vadd.f32 %v691_v43, %v690_v30  ;;  %v591_v34 = vadd.f32 %v590_v32, %v589_v27 }
 0x102   : > { %v593_v39 = vadd.f32 %v592_v35, %v591_v34  ;;  %v694_v40 = vadd.f32 %v693_v38, %v692_v33 }
 0x104   : > { %v696_v45 = vadd.f32 %v695_v41, %v694_v40  ;;  %v595_v46 = vadd.f32 %v594_v42, %v593_v39 }
 0x106   : > { %v597_v50 = vadd.f32 %v596_v57, %v595_v46  ;;  %v698_v51 = vadd.f32 %v697_v47, %v696_v45 }
 0x108   : > { %v700_v55 = vadd.f32 %v699_v7, %v698_v51  ;;  %v599_v56 = vadd.f32 %v598_v54, %v597_v50 }
 0x10a   : > { %v601_v61 = vadd.f32 %v600_v58, %v599_v56  ;;  %v702_v62 = vadd.f32 %v701_v60, %v700_v55 }
 0x10c   : > { %v704_v3 = vadd.f32 %v703_v63, %v702_v62  ;;  %v603_v4 = vadd.f32 %v602_v1, %v601_v61 }
 0x10e   : > { %v605_v8 = vadd.f32 %v604_v21, %v603_v4  ;;  %v706_v10 = vadd.f32 %v705_v5, %v704_v3 }
 0x110   : > { %v708_v36 = vadd.f32 %v707_v37, %v706_v10  ;;  %v607_v14 = vadd.f32 %v606_v12, %v605_v8 }
 0x112   : > { %v609_v17 = vadd.f32 %v608_v59, %v607_v14  ;;  %v710_v18 = vadd.f32 %v709_v16, %v708_v36 }
 0x114   : > { %v611_v9 = vadd.f32 %v610_v20, %v609_v17  ;;  %v712_v49 = vadd.f32 %v711_v19, %v710_v18 }
 0x116   : > { %v612_v23 = vrot.slane %v611_v9, 4  ;;  %v714_v24 = vadd.f32 %v713_v22, %v712_v49 }
 0x118   : > { %v613_v52 = vadd.f32 %v612_v23, %v611_v9  ;;  %v715_v25 = vrot.slane %v714_v24, 4 }
 0x11a   : > { %v614_v28 = vrot.slane %v613_v52, 2  ;;  %v716_v26 = vadd.f32 %v715_v25, %v714_v24 }
 0x11c   : > { %v615_v27 = vadd.f32 %v614_v28, %v613_v52  ;;  %v717_v30 = vrot.slane %v716_v26, 2 }
 0x11e   : > { %v616_v31 = vrot.slane %v615_v27, 1  ;;  %v718_v43 = vadd.f32 %v717_v30, %v716_v26 }
 0x120   : > { %v617_v2 = vadd.f32 %v616_v31, %v615_v27  ;;  %v719_v32 = vrot.slane %v718_v43, 1 }
 0x122   : > { %619 = vst.msk [vmem:[%s184_s28] sm:$0x1] %vm618_vm2, %v617_v2  ;;  %v720_v33 = vadd.f32 %v719_v32, %v718_v43 }
 0x124   : > { %721 = vst.msk [vmem:[%s184_s28 + $0x1] sm:$0x1] %vm618_vm2, %v720_v33 }
 0x125 PF: > { %s14_s12 = sadd.s32 1, %s938_s12  }
 0x126   : > { %p11_p5 = scmp.ge.s32.totalorder %s14_s12, 4  }
 0x128   :  { %13 = sbr.rel (!%p11_p5) target bundleno = 1 (0x1), region = 70 }

// kernel: bottleneck_forward.9
= control target key start
LH: loop header
LB: loop body
LE: loop exit
PB: predicated region body
PF: predicated region fallthrough
CT: control target
= control target key end

     0   :  { %vm132_vm0 = vcmask 1043456   ;;  %vm107_vm1 = vcmask 64512   ;;  %vm233_vm2 = vcmask 261120   ;;  %vm287_vm3 = vcmask 253952   ;;  %s631_s1 = inlined_call_operand.vmem [shape: bf16[8,32], index: 1, kind: input, shape index: {}]   ;;  %s632_s0 = inlined_call_operand.vmem [shape: f32[128,8], index: 0, kind: input, shape index: {}]   ;;  %s633_s2 = inlined_call_operand.vmem [shape: f32[1,8], index: 2, kind: input, shape index: {}]   ;;  %s634_s3 = inlined_call_operand.vmem [shape: f32[1,8], index: 3, kind: input, shape index: {}]   ;;  %s635_s4 = inlined_call_operand.vmem [shape: f32[128,32], index: 4, kind: output, shape index: {0}]   ;;  %s636_s5 = inlined_call_operand.vmem [shape: f32[1,2,32], index: 5, kind: output, shape index: {1}]  }
   0x1   :  { %v106_v0 = vld [vmem:[%s631_s1] sm:$0xf]  ;;  %v21_v2 = vld [vmem:[%s632_s0 + $0x8] sm:$0xff]  ;;  %v22_v6 = vld [vmem:[%s632_s0 + $0x10] sm:$0xff] }
   0x2   :  { %v20_v1 = vld [vmem:[%s632_s0] sm:$0xff]  ;;  %390 = vmatprep.subr.msk.bf16.mxu0 %vm132_vm0, %v106_v0  ;;  %v134_v3 = vsel %vm132_vm0, %v106_v0, 0  ;;  %391 = vmatprep.subr.msk.bf16.mxu1 %vm132_vm0, %v106_v0  ;;  %v23_v9 = vld [vmem:[%s632_s0 + $0x18] sm:$0xff]  ;;  %v25_v12 = vld [vmem:[%s632_s0 + $0x28] sm:$0xff] }
   0x3   :  { %v434_v4 = vld [vmem:[%s633_s2] ss:$0 sm:$0xff]  ;;  %371 = vmatpush3.bf16.msra.mxu0 %v134_v3  ;;  %389 = vmatpush3.bf16.msra.mxu1 %v134_v3  ;;  %v26_v16 = vld [vmem:[%s632_s0 + $0x30] sm:$0xff]  ;;  %v27_v17 = vld [vmem:[%s632_s0 + $0x38] sm:$0xff] }
   0x4   :  { %v439_v5 = vld [vmem:[%s634_s3] ss:$0 sm:$0xff]  ;;  %v43_v7 = vmul.f32 %v434_v4, %v20_v1  ;;  %v44_v8 = vmul.f32 %v434_v4, %v21_v2  ;;  %v45_v10 = vmul.f32 %v434_v4, %v22_v6  ;;  %v46_v13 = vmul.f32 %v434_v4, %v23_v9  ;;  %v29_v27 = vld [vmem:[%s632_s0 + $0x48] sm:$0xff]  ;;  %v30_v32 = vld [vmem:[%s632_s0 + $0x50] sm:$0xff] }
   0x5   :  { %v24_v11 = vld [vmem:[%s632_s0 + $0x20] sm:$0xff]  ;;  %v48_v15 = vmul.f32 %v434_v4, %v25_v12  ;;  %v49_v21 = vmul.f32 %v434_v4, %v26_v16  ;;  %v50_v25 = vmul.f32 %v434_v4, %v27_v17  ;;  %v31_v37 = vld [vmem:[%s632_s0 + $0x58] sm:$0xff]  ;;  %v52_v41 = vmul.f32 %v434_v4, %v29_v27  ;;  %v33_v42 = vld [vmem:[%s632_s0 + $0x68] sm:$0xff] }
   0x6   :  { %v47_v14 = vmul.f32 %v434_v4, %v24_v11  ;;  %v66_v18 = vadd.f32 %v439_v5, %v43_v7  ;;  %v67_v19 = vadd.f32 %v439_v5, %v44_v8  ;;  %v68_v20 = vadd.f32 %v439_v5, %v45_v10  ;;  %v28_v26 = vld [vmem:[%s632_s0 + $0x40] sm:$0xff]  ;;  %v34_v43 = vld [vmem:[%s632_s0 + $0x70] sm:$0xff]  ;;  %v35_v52 = vld [vmem:[%s632_s0 + $0x78] sm:$0xff] }
   0x7   :  { %v69_v22 = vadd.f32 %v439_v5, %v46_v13  ;;  %v71_v24 = vadd.f32 %v439_v5, %v48_v15  ;;  %v72_v31 = vadd.f32 %v439_v5, %v49_v21  ;;  %v73_v36 = vadd.f32 %v439_v5, %v50_v25  ;;  %v32_v38 = vld [vmem:[%s632_s0 + $0x60] sm:$0xff] }
   0x8   :  { %v70_v23 = vadd.f32 %v439_v5, %v47_v14  ;;  %v82_v28 = vmax.f32 %v66_v18, 0.0  ;;  %v83_v29 = vmax.f32 %v67_v19, 0.0  ;;  %v84_v30 = vmax.f32 %v68_v20, 0.0 }
   0x9   :  { %v85_v33 = vmax.f32 %v69_v22, 0.0  ;;  %v87_v35 = vmax.f32 %v71_v24, 0.0  ;;  %v51_v40 = vmul.f32 %v434_v4, %v28_v26  ;;  %v88_v46 = vmax.f32 %v72_v31, 0.0 }
   0xa   :  { %v86_v34 = vmax.f32 %v70_v23, 0.0  ;;  %v98_v39 = vpack.c.bf16 %v83_v29, %v82_v28  ;;  %v53_v47 = vmul.f32 %v434_v4, %v30_v32  ;;  %v75_v49 = vadd.f32 %v439_v5, %v52_v41 }
   0xb   :  { %v99_v44 = vpack.c.bf16 %v85_v33, %v84_v30  ;;  %v74_v48 = vadd.f32 %v439_v5, %v51_v40  ;;  %v54_v50 = vmul.f32 %v434_v4, %v31_v37  ;;  %v55_v51 = vmul.f32 %v434_v4, %v32_v38 }
   0xc   :  { %v100_v45 = vpack.c.bf16 %v87_v35, %v86_v34  ;;  %372 = vmatprep.mubr.msk.bf16.mxu0 %vm107_vm1, %v98_v39  ;;  %v89_v53 = vmax.f32 %v73_v36, 0.0  ;;  %v76_v54 = vadd.f32 %v439_v5, %v53_v47  ;;  %v56_v55 = vmul.f32 %v434_v4, %v33_v42 }
   0xd   :  { %373 = vmatmul.mubr.msk.bf16.vlgmr.msra.gmra.mxu0 %vm107_vm1, %v99_v44  ;;  %v57_v56 = vmul.f32 %v434_v4, %v34_v43  ;;  %v90_v57 = vmax.f32 %v74_v48, 0.0  ;;  %v91_v58 = vmax.f32 %v75_v49, 0.0  ;;  %v77_v59 = vadd.f32 %v439_v5, %v54_v50 }
   0xe   :  { %376 = vmatprep.mubr.msk.bf16.mxu0 %vm107_vm1, %v100_v45  ;;  %v78_v60 = vadd.f32 %v439_v5, %v55_v51  ;;  %v92_v61 = vmax.f32 %v76_v54, 0.0  ;;  %v79_v62 = vadd.f32 %v439_v5, %v56_v55  ;;  %v58_v63 = vmul.f32 %v434_v4, %v35_v52 }
   0xf   :  { %v102_v0 = vpack.c.bf16 %v91_v58, %v90_v57  ;;  %v93_v1 = vmax.f32 %v77_v59, 0.0  ;;  %v80_v3 = vadd.f32 %v439_v5, %v57_v56  ;;  %v101_v6 = vpack.c.bf16 %v89_v53, %v88_v46 }
  0x10   :  { %v94_v2 = vmax.f32 %v78_v60, 0.0  ;;  %v95_v7 = vmax.f32 %v79_v62, 0.0  ;;  %v81_v8 = vadd.f32 %v439_v5, %v58_v63 }
  0x11   :  { %380 = vmatprep.mubr.msk.bf16.mxu1 %vm107_vm1, %v102_v0  ;;  %v103_v9 = vpack.c.bf16 %v93_v1, %v92_v61  ;;  %v96_v11 = vmax.f32 %v80_v3, 0.0 }
  0x12   :  { %v104_v10 = vpack.c.bf16 %v95_v7, %v94_v2  ;;  %v97_v12 = vmax.f32 %v81_v8, 0.0 }
  0x13   :  { %381 = vmatmul.mubr.msk.bf16.vlgmr.msra.gmra.mxu1 %vm107_vm1, %v103_v9 }
  0x14   :  { %384 = vmatprep.mubr.msk.bf16.mxu1 %vm107_vm1, %v104_v10  ;;  %v105_v4 = vpack.c.bf16 %v97_v12, %v96_v11 }
  0x15   :  { %377 = vmatmul.mubr.msk.bf16.gmra.mxu0 %vm107_vm1, %v101_v6 }
  0x1b   :  { %385 = vmatmul.mubr.msk.bf16.gmra.mxu1 %vm107_vm1, %v105_v4 }
  0xcd   :  { %v374_v13 = vpop.f32.mrf.mxu0 }
  0xce   :  { %236 = vst.msk [vmem:[%s635_s4 + $0x10] sm:$0xff] %vm233_vm2, %v374_v13  ;;  %v291_v17 = vmul.f32 %v374_v13, %v374_v13  ;;  %v253_v24 = vsel %vm233_vm2, %v374_v13, 0.0 }
  0xcf   :  { %v170_v5 = vpop.f32.mrf.mxu0 }
  0xd0   :  { %234 = vst.msk [vmem:[%s635_s4] sm:$0xff] %vm233_vm2, %v170_v5  ;;  %v289_v15 = vmul.f32 %v170_v5, %v170_v5  ;;  %v250_v18 = vsel %vm233_vm2, %v170_v5, 0.0  ;;  %v308_v32 = vsel %vm233_vm2, %v291_v17, 0.0 }
  0xd1   :  { %v375_v14 = vpop.f32.mrf.mxu0 }
  0xd2   :  { %237 = vst.msk [vmem:[%s635_s4 + $0x18] sm:$0xff] %vm233_vm2, %v375_v14  ;;  %v305_v25 = vsel %vm233_vm2, %v289_v15, 0.0  ;;  %v292_v26 = vmul.f32 %v375_v14, %v375_v14  ;;  %v255_v33 = vsel %vm233_vm2, %v375_v14, 0.0 }
  0xd3   :  { %v173_v16 = vpop.f32.mrf.mxu0  ;;  %v541_v21 = vpop.f32.mrf.mxu1 }
  0xd4   :  { %235 = vst.msk [vmem:[%s635_s4 + $0x8] sm:$0xff] %vm233_vm2, %v173_v16  ;;  %v251_v19 = vsel %vm233_vm2, %v173_v16, 0.0  ;;  %v290_v20 = vmul.f32 %v173_v16, %v173_v16  ;;  %244 = vst.msk [vmem:[%s635_s4 + $0x50] sm:$0xff] %vm233_vm2, %v541_v21  ;;  %v310_v39 = vsel %vm233_vm2, %v292_v26, 0.0  ;;  %v299_v8 = vmul.f32 %v541_v21, %v541_v21 }
  0xd5   :  { %v252_v22 = vadd.f32 %v251_v19, %v250_v18  ;;  %v378_v23 = vpop.f32.mrf.mxu0  ;;  %v202_v28 = vpop.f32.mrf.mxu1  ;;  %v269_v4 = vsel %vm233_vm2, %v541_v21, 0.0 }
  0xd6   :  { %v306_v27 = vsel %vm233_vm2, %v290_v20, 0.0  ;;  %240 = vst.msk [vmem:[%s635_s4 + $0x30] sm:$0xff] %vm233_vm2, %v378_v23  ;;  %242 = vst.msk [vmem:[%s635_s4 + $0x40] sm:$0xff] %vm233_vm2, %v202_v28  ;;  %v295_v45 = vmul.f32 %v378_v23, %v378_v23  ;;  %v261_v52 = vsel %vm233_vm2, %v378_v23, 0.0  ;;  %v297_v60 = vmul.f32 %v202_v28, %v202_v28 }
  0xd7   :  { %v254_v29 = vadd.f32 %v253_v24, %v252_v22  ;;  %v307_v30 = vadd.f32 %v306_v27, %v305_v25  ;;  %v186_v31 = vpop.f32.mrf.mxu0  ;;  %v383_v35 = vpop.f32.mrf.mxu1  ;;  %v265_v1 = vsel %vm233_vm2, %v202_v28, 0.0  ;;  %v324_v16 = vsel %vm233_vm2, %v299_v8, 0.0 }
  0xd8   :  { %238 = vst.msk [vmem:[%s635_s4 + $0x20] sm:$0xff] %vm233_vm2, %v186_v31  ;;  %v293_v34 = vmul.f32 %v186_v31, %v186_v31  ;;  %245 = vst.msk [vmem:[%s635_s4 + $0x58] sm:$0xff] %vm233_vm2, %v383_v35  ;;  %v257_v40 = vsel %vm233_vm2, %v186_v31, 0.0  ;;  %v316_v58 = vsel %vm233_vm2, %v295_v45, 0.0  ;;  %v320_v9 = vsel %vm233_vm2, %v297_v60, 0.0 }
  0xd9   :  { %v309_v36 = vadd.f32 %v308_v32, %v307_v30  ;;  %v256_v37 = vadd.f32 %v255_v33, %v254_v29  ;;  %v379_v38 = vpop.f32.mrf.mxu0  ;;  %v205_v41 = vpop.f32.mrf.mxu1  ;;  %v300_v13 = vmul.f32 %v383_v35, %v383_v35  ;;  %v271_v17 = vsel %vm233_vm2, %v383_v35, 0.0 }
  0xda   :  { %241 = vst.msk [vmem:[%s635_s4 + $0x38] sm:$0xff] %vm233_vm2, %v379_v38  ;;  %243 = vst.msk [vmem:[%s635_s4 + $0x48] sm:$0xff] %vm233_vm2, %v205_v41  ;;  %v312_v46 = vsel %vm233_vm2, %v293_v34, 0.0  ;;  %v296_v53 = vmul.f32 %v379_v38, %v379_v38  ;;  %v263_v59 = vsel %vm233_vm2, %v379_v38, 0.0  ;;  %v298_v2 = vmul.f32 %v205_v41, %v205_v41 }
  0xdb   :  { %v258_v42 = vadd.f32 %v257_v40, %v256_v37  ;;  %v311_v43 = vadd.f32 %v310_v39, %v309_v36  ;;  %v189_v44 = vpop.f32.mrf.mxu0  ;;  %v386_v49 = vpop.f32.mrf.mxu1  ;;  %v267_v10 = vsel %vm233_vm2, %v205_v41, 0.0  ;;  %v326_v22 = vsel %vm233_vm2, %v300_v13, 0.0 }
  0xdc   :  { %239 = vst.msk [vmem:[%s635_s4 + $0x28] sm:$0xff] %vm233_vm2, %v189_v44  ;;  %v259_v47 = vsel %vm233_vm2, %v189_v44, 0.0  ;;  %v294_v48 = vmul.f32 %v189_v44, %v189_v44  ;;  %248 = vst.msk [vmem:[%s635_s4 + $0x70] sm:$0xff] %vm233_vm2, %v386_v49  ;;  %v318_v0 = vsel %vm233_vm2, %v296_v53, 0.0  ;;  %v322_v5 = vsel %vm233_vm2, %v298_v2, 0.0 }
  0xdd   :  { %v313_v50 = vadd.f32 %v312_v46, %v311_v43  ;;  %v260_v51 = vadd.f32 %v259_v47, %v258_v42  ;;  %v218_v55 = vpop.f32.mrf.mxu1  ;;  %v303_v21 = vmul.f32 %v386_v49, %v386_v49  ;;  %v277_v31 = vsel %vm233_vm2, %v386_v49, 0.0 }
  0xde   :  { %v314_v54 = vsel %vm233_vm2, %v294_v48, 0.0  ;;  %246 = vst.msk [vmem:[%s635_s4 + $0x60] sm:$0xff] %vm233_vm2, %v218_v55  ;;  %v301_v18 = vmul.f32 %v218_v55, %v218_v55  ;;  %v273_v23 = vsel %vm233_vm2, %v218_v55, 0.0 }
  0xdf   :  { %v262_v56 = vadd.f32 %v261_v52, %v260_v51  ;;  %v315_v57 = vadd.f32 %v314_v54, %v313_v50  ;;  %v387_v61 = vpop.f32.mrf.mxu1  ;;  %v332_v36 = vsel %vm233_vm2, %v303_v21, 0.0 }
  0xe0   :  { %249 = vst.msk [vmem:[%s635_s4 + $0x78] sm:$0xff] %vm233_vm2, %v387_v61  ;;  %v328_v27 = vsel %vm233_vm2, %v301_v18, 0.0  ;;  %v304_v32 = vmul.f32 %v387_v61, %v387_v61  ;;  %v279_v37 = vsel %vm233_vm2, %v387_v61, 0.0 }
  0xe1   :  { %v264_v62 = vadd.f32 %v263_v59, %v262_v56  ;;  %v317_v63 = vadd.f32 %v316_v58, %v315_v57  ;;  %v221_v3 = vpop.f32.mrf.mxu1 }
  0xe2   :  { %247 = vst.msk [vmem:[%s635_s4 + $0x68] sm:$0xff] %vm233_vm2, %v221_v3  ;;  %v302_v24 = vmul.f32 %v221_v3, %v221_v3  ;;  %v275_v28 = vsel %vm233_vm2, %v221_v3, 0.0  ;;  %v334_v40 = vsel %vm233_vm2, %v304_v32, 0.0 }
  0xe3   :  { %v319_v6 = vadd.f32 %v318_v0, %v317_v63  ;;  %v266_v7 = vadd.f32 %v265_v1, %v264_v62 }
  0xe4   :  { %v330_v33 = vsel %vm233_vm2, %v302_v24, 0.0 }
  0xe5   :  { %v268_v11 = vadd.f32 %v267_v10, %v266_v7  ;;  %v321_v12 = vadd.f32 %v320_v9, %v319_v6 }
  0xe7   :  { %v270_v14 = vadd.f32 %v269_v4, %v268_v11  ;;  %v323_v15 = vadd.f32 %v322_v5, %v321_v12 }
  0xe9   :  { %v325_v19 = vadd.f32 %v324_v16, %v323_v15  ;;  %v272_v20 = vadd.f32 %v271_v17, %v270_v14 }
  0xeb   :  { %v274_v25 = vadd.f32 %v273_v23, %v272_v20  ;;  %v327_v26 = vadd.f32 %v326_v22, %v325_v19 }
  0xed   :  { %v329_v29 = vadd.f32 %v328_v27, %v327_v26  ;;  %v276_v30 = vadd.f32 %v275_v28, %v274_v25 }
  0xef   :  { %v278_v34 = vadd.f32 %v277_v31, %v276_v30  ;;  %v331_v35 = vadd.f32 %v330_v33, %v329_v29 }
  0xf1   :  { %v280_v38 = vadd.f32 %v279_v37, %v278_v34  ;;  %v333_v39 = vadd.f32 %v332_v36, %v331_v35 }
  0xf3   :  { %v281_v41 = vrot.slane %v280_v38, 4  ;;  %v335_v42 = vadd.f32 %v334_v40, %v333_v39 }
  0xf5   :  { %v282_v43 = vadd.f32 %v281_v41, %v280_v38  ;;  %v336_v44 = vrot.slane %v335_v42, 4 }
  0xf7   :  { %v283_v45 = vrot.slane %v282_v43, 2  ;;  %v337_v46 = vadd.f32 %v336_v44, %v335_v42 }
  0xf9   :  { %v284_v47 = vadd.f32 %v283_v45, %v282_v43  ;;  %v338_v48 = vrot.slane %v337_v46, 2 }
  0xfb   :  { %v285_v49 = vrot.slane %v284_v47, 1  ;;  %v339_v50 = vadd.f32 %v338_v48, %v337_v46 }
  0xfd   :  { %v286_v51 = vadd.f32 %v285_v49, %v284_v47  ;;  %v340_v52 = vrot.slane %v339_v50, 1 }
  0xff   :  { %288 = vst.msk [vmem:[%s636_s5] sm:$0x1] %vm287_vm3, %v286_v51  ;;  %v341_v53 = vadd.f32 %v340_v52, %v339_v50 }
 0x101   :  { %342 = vst.msk [vmem:[%s636_s5 + $0x1] sm:$0x1] %vm287_vm3, %v341_v53 }

// kernel: bottleneck_forward.11
= control target key start
LH: loop header
LB: loop body
LE: loop exit
PB: predicated region body
PF: predicated region fallthrough
CT: control target
= control target key end

     0   :  { %vm180_vm0 = vcmask 261120   ;;  %s479_s0 = inlined_call_operand.vmem [shape: f32[128,32], index: 0, kind: input, shape index: {}]   ;;  %s480_s1 = inlined_call_operand.vmem [shape: f32[1,32], index: 1, kind: input, shape index: {}]   ;;  %s481_s2 = inlined_call_operand.vmem [shape: f32[1,32], index: 2, kind: input, shape index: {}]   ;;  %s482_s3 = inlined_call_operand.vmem [shape: f32[128,32], index: 3, kind: input, shape index: {}]   ;;  %s483_s4 = inlined_call_operand.vmem [shape: f32[1,32], index: 4, kind: input, shape index: {}]   ;;  %s484_s5 = inlined_call_operand.vmem [shape: f32[1,32], index: 5, kind: input, shape index: {}]   ;;  %s485_s6 = inlined_call_operand.hbm [shape: f32[128,32], index: 6, kind: output, shape index: {}]  }
   0x1   :  { %v24_v0 = vld [vmem:[%s479_s0] sm:$0xff]  ;;  %v25_v8 = vld [vmem:[%s479_s0 + $0x8] sm:$0xff]  ;;  %v26_v10 = vld [vmem:[%s479_s0 + $0x10] sm:$0xff] }
   0x2   :  { %v286_v1 = vld [vmem:[%s480_s1] ss:$0 sm:$0xff]  ;;  %v87_v9 = vld [vmem:[%s482_s3 + $0x8] sm:$0xff]  ;;  %v88_v15 = vld [vmem:[%s482_s3 + $0x10] sm:$0xff] }
   0x3   :  { %v291_v2 = vld [vmem:[%s481_s2] ss:$0 sm:$0xff]  ;;  %v47_v3 = vmul.f32 %v286_v1, %v24_v0  ;;  %v48_v12 = vmul.f32 %v286_v1, %v25_v8  ;;  %v49_v14 = vmul.f32 %v286_v1, %v26_v10  ;;  %v27_v16 = vld [vmem:[%s479_s0 + $0x18] sm:$0xff]  ;;  %v29_v23 = vld [vmem:[%s479_s0 + $0x28] sm:$0xff] }
   0x4   :  { %v86_v4 = vld [vmem:[%s482_s3] sm:$0xff]  ;;  %v89_v17 = vld [vmem:[%s482_s3 + $0x18] sm:$0xff]  ;;  %v50_v19 = vmul.f32 %v286_v1, %v27_v16  ;;  %v91_v28 = vld [vmem:[%s482_s3 + $0x28] sm:$0xff]  ;;  %v52_v33 = vmul.f32 %v286_v1, %v29_v23 }
   0x5   :  { %v300_v5 = vld [vmem:[%s483_s4] ss:$0 sm:$0xff]  ;;  %v70_v11 = vadd.f32 %v291_v2, %v47_v3  ;;  %v71_v25 = vadd.f32 %v291_v2, %v48_v12  ;;  %v72_v26 = vadd.f32 %v291_v2, %v49_v14  ;;  %v30_v29 = vld [vmem:[%s479_s0 + $0x30] sm:$0xff]  ;;  %v31_v39 = vld [vmem:[%s479_s0 + $0x38] sm:$0xff] }
   0x6   :  { %v109_v6 = vmul.f32 %v300_v5, %v86_v4  ;;  %v306_v7 = vld [vmem:[%s484_s5] ss:$0 sm:$0xff]  ;;  %v110_v13 = vmul.f32 %v300_v5, %v87_v9  ;;  %v111_v18 = vmul.f32 %v300_v5, %v88_v15  ;;  %v112_v20 = vmul.f32 %v300_v5, %v89_v17  ;;  %v92_v30 = vld [vmem:[%s482_s3 + $0x30] sm:$0xff]  ;;  %v93_v44 = vld [vmem:[%s482_s3 + $0x38] sm:$0xff] }
   0x7   :  { %v28_v21 = vld [vmem:[%s479_s0 + $0x20] sm:$0xff]  ;;  %v73_v31 = vadd.f32 %v291_v2, %v50_v19  ;;  %v114_v34 = vmul.f32 %v300_v5, %v91_v28  ;;  %v75_v41 = vadd.f32 %v291_v2, %v52_v33  ;;  %v53_v42 = vmul.f32 %v286_v1, %v30_v29  ;;  %v33_v55 = vld [vmem:[%s479_s0 + $0x48] sm:$0xff]  ;;  %v34_v3 = vld [vmem:[%s479_s0 + $0x50] sm:$0xff] }
   0x8   :  { %v90_v22 = vld [vmem:[%s482_s3 + $0x20] sm:$0xff]  ;;  %v125_v24 = vadd.f32 %v109_v6, %v70_v11  ;;  %v51_v27 = vmul.f32 %v286_v1, %v28_v21  ;;  %v126_v36 = vadd.f32 %v110_v13, %v71_v25  ;;  %v127_v37 = vadd.f32 %v111_v18, %v72_v26  ;;  %v95_v60 = vld [vmem:[%s482_s3 + $0x48] sm:$0xff]  ;;  %v96_v4 = vld [vmem:[%s482_s3 + $0x50] sm:$0xff] }
   0x9   :  { %v113_v32 = vmul.f32 %v300_v5, %v90_v22  ;;  %v128_v40 = vadd.f32 %v112_v20, %v73_v31  ;;  %v115_v43 = vmul.f32 %v300_v5, %v92_v30  ;;  %v130_v50 = vadd.f32 %v114_v34, %v75_v41  ;;  %v32_v53 = vld [vmem:[%s479_s0 + $0x40] sm:$0xff] }
   0xa   :  { %v148_v35 = vadd.f32 %v306_v7, %v125_v24  ;;  %v74_v38 = vadd.f32 %v291_v2, %v51_v27  ;;  %v149_v46 = vadd.f32 %v306_v7, %v126_v36  ;;  %v150_v47 = vadd.f32 %v306_v7, %v127_v37  ;;  %v94_v54 = vld [vmem:[%s482_s3 + $0x40] sm:$0xff] }
   0xb   :  { %v151_v49 = vadd.f32 %v306_v7, %v128_v40  ;;  %v76_v51 = vadd.f32 %v291_v2, %v53_v42  ;;  %v54_v52 = vmul.f32 %v286_v1, %v31_v39  ;;  %v116_v59 = vmul.f32 %v300_v5, %v93_v44 }
   0xc   :  { %v164_v45 = vmax.f32 %v148_v35, 0.0  ;;  %v129_v48 = vadd.f32 %v113_v32, %v74_v38  ;;  %v165_v56 = vmax.f32 %v149_v46, 0.0  ;;  %v166_v57 = vmax.f32 %v150_v47, 0.0 }
   0xd   :  { %v167_v61 = vmax.f32 %v151_v49, 0.0  ;;  %v153_v62 = vadd.f32 %v306_v7, %v130_v50  ;;  %v131_v63 = vadd.f32 %v115_v43, %v76_v51  ;;  %v77_v0 = vadd.f32 %v291_v2, %v54_v52 }
   0xe   :  { %181 = vst.msk [vmem:[#allocation2] sm:$0xff] %vm180_vm0, %v164_v45  ;;  %v152_v58 = vadd.f32 %v306_v7, %v129_v48 }
   0xf   :  { %11 = vsyncpa [#allocation3], 0  ;;  %182 = vst.msk [vmem:[#allocation2 + $0x8] sm:$0xff] %vm180_vm0, %v165_v56  ;;  %v55_v8 = vmul.f32 %v286_v1, %v32_v53  ;;  %v117_v9 = vmul.f32 %v300_v5, %v94_v54  ;;  %v56_v10 = vmul.f32 %v286_v1, %v33_v55  ;;  %v35_v11 = vld [vmem:[%s479_s0 + $0x58] sm:$0xff]  ;;  %v169_v13 = vmax.f32 %v153_v62, 0.0  ;;  %v36_v17 = vld [vmem:[%s479_s0 + $0x60] sm:$0xff] }
  0x10   :  { %183 = vst.msk [vmem:[#allocation2 + $0x10] sm:$0xff] %vm180_vm0, %v166_v57  ;;  %v168_v6 = vmax.f32 %v152_v58, 0.0  ;;  %v97_v12 = vld [vmem:[%s482_s3 + $0x58] sm:$0xff]  ;;  %184 = vst.msk [vmem:[#allocation2 + $0x18] sm:$0xff] %vm180_vm0, %v167_v61  ;;  %v154_v14 = vadd.f32 %v306_v7, %v131_v63  ;;  %v132_v15 = vadd.f32 %v116_v59, %v77_v0  ;;  %v118_v16 = vmul.f32 %v300_v5, %v95_v60  ;;  %v98_v22 = vld [vmem:[%s482_s3 + $0x60] sm:$0xff] }
  0x11   :  { %v78_v18 = vadd.f32 %v291_v2, %v55_v8  ;;  %v79_v19 = vadd.f32 %v291_v2, %v56_v10  ;;  %v57_v20 = vmul.f32 %v286_v1, %v34_v3  ;;  %v119_v21 = vmul.f32 %v300_v5, %v96_v4  ;;  %v37_v23 = vld [vmem:[%s479_s0 + $0x68] sm:$0xff]  ;;  %186 = vst.msk [vmem:[#allocation2 + $0x28] sm:$0xff] %vm180_vm0, %v169_v13  ;;  %v38_v33 = vld [vmem:[%s479_s0 + $0x70] sm:$0xff]  ;;  %v39_v47 = vld [vmem:[%s479_s0 + $0x78] sm:$0xff]  ;;  %s242_s0 = smov [#allocation2]  }
  0x12   :  { %185 = vst.msk [vmem:[#allocation2 + $0x20] sm:$0xff] %vm180_vm0, %v168_v6  ;;  %v170_v24 = vmax.f32 %v154_v14, 0.0  ;;  %v155_v25 = vadd.f32 %v306_v7, %v132_v15  ;;  %v58_v26 = vmul.f32 %v286_v1, %v35_v11  ;;  %v120_v27 = vmul.f32 %v300_v5, %v97_v12  ;;  %v99_v32 = vld [vmem:[%s482_s3 + $0x68] sm:$0xff]  ;;  %v100_v42 = vld [vmem:[%s482_s3 + $0x70] sm:$0xff]  ;;  %v101_v48 = vld [vmem:[%s482_s3 + $0x78] sm:$0xff]  ;;  %s202_s3 = sshll.u32 %s242_s0, 4  ;;  %s203_s3 = int_to_ptr.vmem [resolvable:$true] %s202_s3 }
  0x13   :  { %v133_v28 = vadd.f32 %v117_v9, %v78_v18  ;;  %v134_v29 = vadd.f32 %v118_v16, %v79_v19  ;;  %v80_v30 = vadd.f32 %v291_v2, %v57_v20  ;;  %v59_v31 = vmul.f32 %v286_v1, %v36_v17  ;;  %s220_s11 = scalar_lea.vmem %s203_s3, 2048  ;;  %p225_p1 = scmp.lt.s32.totalorder %s203_s3, %s203_s3 }
  0x14   :  { %187 = vst.msk [vmem:[#allocation2 + $0x30] sm:$0xff] %vm180_vm0, %v170_v24  ;;  %v171_v34 = vmax.f32 %v155_v25, 0.0  ;;  %v81_v35 = vadd.f32 %v291_v2, %v58_v26  ;;  %v121_v36 = vmul.f32 %v300_v5, %v98_v22  ;;  %v60_v37 = vmul.f32 %v286_v1, %v37_v23  ;;  %p221_p0 = scmp.ne.s32.totalorder %s203_s3, %s220_s11  ;;  %p226_p2 = scmp.lt.s32.totalorder %s220_s11, %s220_s11 }
  0x15   :  { %v156_v38 = vadd.f32 %v306_v7, %v133_v28  ;;  %v157_v39 = vadd.f32 %v306_v7, %v134_v29  ;;  %v135_v40 = vadd.f32 %v119_v21, %v80_v30  ;;  %v82_v41 = vadd.f32 %v291_v2, %v59_v31 }
  0x16   :  { %188 = vst.msk [vmem:[#allocation2 + $0x38] sm:$0xff] %vm180_vm0, %v171_v34  ;;  %v136_v43 = vadd.f32 %v120_v27, %v81_v35  ;;  %v83_v44 = vadd.f32 %v291_v2, %v60_v37  ;;  %v122_v45 = vmul.f32 %v300_v5, %v99_v32  ;;  %v61_v46 = vmul.f32 %v286_v1, %v38_v33  ;;  %p227_p3 = por %p226_p2, %p225_p1 }
  0x17   :  { %v172_v49 = vmax.f32 %v156_v38, 0.0  ;;  %v173_v50 = vmax.f32 %v157_v39, 0.0  ;;  %v158_v51 = vadd.f32 %v306_v7, %v135_v40  ;;  %v137_v52 = vadd.f32 %v121_v36, %v82_v41 }
  0x18   :  { %v159_v53 = vadd.f32 %v306_v7, %v136_v43  ;;  %v138_v54 = vadd.f32 %v122_v45, %v83_v44  ;;  %v84_v55 = vadd.f32 %v291_v2, %v61_v46  ;;  %v123_v56 = vmul.f32 %v300_v5, %v100_v42  ;;  %p228_p4 = pnand %p227_p3, %p221_p0 }
  0x19   :  { %189 = vst.msk [vmem:[#allocation2 + $0x40] sm:$0xff] %vm180_vm0, %v172_v49  ;;  %190 = vst.msk [vmem:[#allocation2 + $0x48] sm:$0xff] %vm180_vm0, %v173_v50  ;;  %v174_v57 = vmax.f32 %v158_v51, 0.0  ;;  %v160_v58 = vadd.f32 %v306_v7, %v137_v52  ;;  %v62_v59 = vmul.f32 %v286_v1, %v39_v47  ;;  %v124_v60 = vmul.f32 %v300_v5, %v101_v48 }
  0x1a   :  { %v175_v61 = vmax.f32 %v159_v53, 0.0  ;;  %v161_v62 = vadd.f32 %v306_v7, %v138_v54  ;;  %v139_v63 = vadd.f32 %v123_v56, %v84_v55 }
  0x1b   :  { %191 = vst.msk [vmem:[#allocation2 + $0x50] sm:$0xff] %vm180_vm0, %v174_v57  ;;  %v176_v0 = vmax.f32 %v160_v58, 0.0  ;;  %v85_v3 = vadd.f32 %v291_v2, %v62_v59 }
  0x1c   :  { %192 = vst.msk [vmem:[#allocation2 + $0x58] sm:$0xff] %vm180_vm0, %v175_v61  ;;  %v177_v4 = vmax.f32 %v161_v62, 0.0  ;;  %v162_v6 = vadd.f32 %v306_v7, %v139_v63 }
  0x1d   :  { %193 = vst.msk [vmem:[#allocation2 + $0x60] sm:$0xff] %vm180_vm0, %v176_v0  ;;  %v140_v8 = vadd.f32 %v124_v60, %v85_v3 }
  0x1e   :  { %194 = vst.msk [vmem:[#allocation2 + $0x68] sm:$0xff] %vm180_vm0, %v177_v4  ;;  %v178_v1 = vmax.f32 %v162_v6, 0.0 }
  0x1f   :  { %v163_v5 = vadd.f32 %v306_v7, %v140_v8 }
  0x20   :  { %195 = vst.msk [vmem:[#allocation2 + $0x70] sm:$0xff] %vm180_vm0, %v178_v1 }
  0x21   :  { %v179_v9 = vmax.f32 %v163_v5, 0.0 }
  0x23   :  { %196 = vst.msk [vmem:[#allocation2 + $0x78] sm:$0xff] %vm180_vm0, %v179_v9 }
  0x24   :  { %231 = shalt.err (!%p228_p4)
}
  0x25   :  { %s243_s12 = smov 128   ;;  %s244_s4 = smov 8  }
  0x26   :  { %208 = dma.vmem_to_hbm [thread:$0]  %s203_s3, 2048, %s485_s6, [#allocation3], %s243_s12, %s243_s12, %s244_s4  }
  0x27   :  { %240 = dma.done.wait [#allocation3], 2048  }
  0x28   :  { %241 = vsyncadd [#allocation3], 4294965248 }
  0x29   :  { %212 = vsyncpa [#allocation3], 1 }

// kernel: bottleneck_forward.8
= control target key start
LH: loop header
LB: loop body
LE: loop exit
PB: predicated region body
PF: predicated region fallthrough
CT: control target
= control target key end

     0   :  { %s2201_s12 = smov 0   ;;  %s2203_s13 = smov 0   ;;  %s2525_s0 = inlined_call_operand.vmem [shape: bf16[2,4,9,9,8], index: 0, kind: input, shape index: {}]   ;;  %s2526_s1 = inlined_call_operand.vmem [shape: bf16[3,3,8,8], index: 1, kind: input, shape index: {}]   ;;  %s2527_s2 = inlined_call_operand.vmem [shape: f32[128,8], index: 2, kind: output, shape index: {0}]   ;;  %s2528_s3 = inlined_call_operand.vmem [shape: f32[2,2,8], index: 3, kind: output, shape index: {1}]  }
   0x1   :  { %s2205_s14 = smov 0  }
   0x2 LB: > { %s26_s15 = sadd.s32 1, %s2175_s13  ;;  %p1802_p0 = scmp.ge.s32.totalorder %s2179_s14, 1  ;;  %s2179_s14 = sphi %s2205_s14, %s14_s14   ;;  %s2175_s13 = sphi %s2203_s13, %s2532_s13   ;;  %s2171_s12 = sphi %s2201_s12, %s2531_s12  }
   0x3   : > { %p28_p1 = scmp.ge.s32.totalorder %s26_s15, 2  ;;  %p156_p2 = scmp.lt.s32.totalorder %s2179_s14, 3 }
   0x5   : > { %s2534_s15 = smov (%p28_p1, %s26_s15), 0  ;;  %p157_p3 = pnand %p1802_p0, %p156_p2 }
   0x6   : > { %p186_p4 = scmp.lt.s32.totalorder (!%p157_p3), %s2171_s12, 1  ;;  %s1804_s16 = sshll.u32 (!%p157_p3), %s2171_s12, 3 }
   0x7   : > { %160 = sbr.rel (%p157_p3) target bundleno = 317 (0x13d), region = 28  ;;  %p193_p5 = scmp.lt.s32.totalorder (!%p157_p3), %s1804_s16, 15 }
   0xc   : > { %v1815_v0 = vld [vmem:[%s2526_s1 + $0x4] sm:$0xf]  ;;  %vm265_vm0 = vcmask 1043456   ;;  %v218_v2 = vld [vmem:[%s2526_s1] sm:$0xf]  ;;  %s2235_s22 = scalar_select %p186_p4, %s2171_s12, 1 }
   0xd   : > { %2099 = vmatprep.subr.msk.bf16.mxu1 %vm265_vm0, %v1815_v0  ;;  %2098 = vmatprep.subr.msk.bf16.mxu0 %vm265_vm0, %v1815_v0  ;;  %v267_v1 = vsel %vm265_vm0, %v1815_v0, 0  ;;  %v1832_v3 = vld [vmem:[%s2526_s1 + $0x8] sm:$0xf]  ;;  %vm252_vm1 = vcmask 64512   ;;  %v367_v4 = vsel %vm265_vm0, %v218_v2, 0  ;;  %s2536_s16 = smov (!%p193_p5, %s1804_s16), 15 }
   0xe   : > { %2097 = vmatpush3.bf16.msra.mxu1 %v267_v1  ;;  %2007 = vmatpush3.bf16.msra.mxu0 %v267_v1  ;;  %s2108_s23 = smul.u32 288, %s2235_s22  ;;  %v592_v5 = vsel %vm265_vm0, %v1832_v3, 0  ;;  %v1849_v7 = vld [vmem:[%s2526_s1 + $0xc] sm:$0xf]  ;;  %v1866_v8 = vld [vmem:[%s2526_s1 + $0x10] sm:$0xf] }
   0xf   : > { %2100 = vmatprep.subr.msk.bf16.mxu1 %vm265_vm0, %v218_v2  ;;  %2101 = vmatprep.subr.msk.bf16.mxu0 %vm265_vm0, %v1832_v3  ;;  %vm450_vm2 = vsmask.f32 3328  ;;  %vm451_vm3 = vsmask.f32 7440  ;;  %v713_v13 = vsel %vm265_vm0, %v1849_v7, 0  ;;  %v2264_v14 = vsel %vm265_vm0, %v1866_v8, 0 }
  0x10   : > { %s2243_s26 = scalar_lea.vmem %s2525_s0, %s2108_s23  ;;  %v2281_v38 = vld [vmem:[%s2526_s1 + $0x14] sm:$0xf]  ;;  %vm2285_vm4 = vmor %vm450_vm2, %vm451_vm3  ;;  %s1805_s12 = sshll.u32 %s2536_s16, 3  ;;  %vm1641_vm5 = vcmask 57344  }
  0x11   : > { %v2133_v6 = vld [vmem:[%s2243_s26 + $0x48] ss:$8 sps:$4 sm:$0xff]   ;;  %v2135_v10 = vld [vmem:[%s2243_s26 + $0x58] ss:$8 sps:$4 sm:$0xff]   ;;  %v435_v16 = vld [vmem:[%s2243_s26 + $0x4] sm:$0x1]  ;;  %s2476_s19 = scalar_lea.vmem %s2527_s2, %s1805_s12 }
  0x12   : > { %v2134_v9 = vld [vmem:[%s2243_s26 + $0x68] ss:$8 sps:$4 sm:$0xff]   ;;  %2008 = vmatprep.mubr.msk.bf16.mxu0 %vm252_vm1, %v2133_v6  ;;  %v2136_v11 = vld [vmem:[%s2243_s26 + $0x78] ss:$8 sps:$4 sm:$0xff]   ;;  %v437_v19 = vld [vmem:[%s2243_s26 + $0xc] sm:$0x1] }
  0x13   : > { %2012 = vmatprep.mubr.msk.bf16.mxu1 %vm252_vm1, %v2134_v9  ;;  %2009 = vmatmul.mubr.msk.bf16.vlgmr.msra.gmra.mxu0 %vm252_vm1, %v2135_v10  ;;  %v2137_v12 = vld [vmem:[%s2243_s26] ss:$8 sps:$4 sm:$0xff]   ;;  %v2138_v18 = vld [vmem:[%s2243_s26 + $0x10] ss:$8 sps:$4 sm:$0xff]   ;;  %v463_v22 = vshll.u32 %v435_v16, 16  ;;  %v477_v25 = vshll.u32 %v437_v19, 16 }
  0x14   : > { %2013 = vmatmul.mubr.msk.bf16.vlgmr.msra.gmra.mxu1 %vm252_vm1, %v2136_v11  ;;  %2027 = vmatpush3.bf16.msra.mxu0 %v592_v5  ;;  %v434_v15 = vld [vmem:[%s2243_s26] sm:$0xf]  ;;  %v436_v17 = vld [vmem:[%s2243_s26 + $0x8] sm:$0xf]  ;;  %v438_v26 = vld [vmem:[%s2243_s26 + $0x10] sm:$0xf] }
  0x15   : > { %2017 = vmatpush3.bf16.msra.mxu1 %v367_v4  ;;  %2018 = vmatprep.mubr.msk.bf16.mxu1 %vm252_vm1, %v2137_v12  ;;  %v454_v20 = vshrl.u32 %v434_v15, 16  ;;  %v457_v21 = vshll.u32 %v434_v15, 16  ;;  %v468_v23 = vshrl.u32 %v436_v17, 16  ;;  %v471_v24 = vshll.u32 %v436_v17, 16  ;;  %v439_v27 = vld [vmem:[%s2243_s26 + $0x14] sm:$0x1] }
  0x16   : > { %2102 = vmatprep.subr.msk.bf16.mxu1 %vm265_vm0, %v1849_v7  ;;  %2103 = vmatprep.subr.msk.bf16.mxu0 %vm265_vm0, %v1866_v8  ;;  %v465_v30 = vrot.slane %v463_v22, 5  ;;  %v440_v32 = vld [vmem:[%s2243_s26 + $0x18] sm:$0xf]  ;;  %v479_v34 = vrot.slane %v477_v25, 5  ;;  %v441_v35 = vld [vmem:[%s2243_s26 + $0x1c] sm:$0x1] }
  0x17   : > { %v456_v28 = vrot.slane %v454_v20, 4  ;;  %v459_v29 = vrot.slane %v457_v21, 5  ;;  %v470_v31 = vrot.slane %v468_v23, 4  ;;  %v473_v33 = vrot.slane %v471_v24, 5  ;;  %v2139_v52 = vld [vmem:[%s2243_s26 + $0x20] ss:$8 sps:$4 sm:$0xff]  }
  0x18   : > { %v482_v36 = vshrl.u32 %v438_v26, 16  ;;  %v485_v37 = vshll.u32 %v438_v26, 16  ;;  %v491_v40 = vshll.u32 %v439_v27, 16  ;;  %v496_v41 = vshrl.u32 %v440_v32, 16  ;;  %v2140_v58 = vld [vmem:[%s2243_s26 + $0x30] ss:$8 sps:$4 sm:$0xff]  }
  0x19   : > { %v460_v39 = vor.u32 %v459_v29, %v456_v28  ;;  %v499_v42 = vshll.u32 %v440_v32, 16  ;;  %v474_v44 = vor.u32 %v473_v33, %v470_v31  ;;  %v505_v47 = vshll.u32 %v441_v35, 16  ;;  %v442_v59 = vld [vmem:[%s2243_s26 + $0x20] sm:$0xf]  ;;  %v443_v60 = vld [vmem:[%s2243_s26 + $0x24] sm:$0x1] }
  0x1a   : > { %v484_v45 = vrot.slane %v482_v36, 4  ;;  %v487_v46 = vrot.slane %v485_v37, 5  ;;  %v493_v49 = vrot.slane %v491_v40, 5  ;;  %v498_v50 = vrot.slane %v496_v41, 4  ;;  %v444_v63 = vld [vmem:[%s2243_s26 + $0x28] sm:$0xf] }
  0x1b   : > { %v461_v48 = vrot.slane %v460_v39, 4  ;;  %v501_v51 = vrot.slane %v499_v42, 5  ;;  %v475_v53 = vrot.slane %v474_v44, 4  ;;  %v507_v55 = vrot.slane %v505_v47, 5  ;;  %v445_v0 = vld [vmem:[%s2243_s26 + $0x2c] sm:$0x1] }
  0x1c   : > { %2019 = vmatmul.mubr.msk.bf16.vlgmr.msra.gmra.mxu1 %vm252_vm1, %v2138_v18  ;;  %v488_v54 = vor.u32 %v487_v46, %v484_v45  ;;  %v510_v1 = vshrl.u32 %v442_v59, 16  ;;  %v513_v4 = vshll.u32 %v442_v59, 16  ;;  %v519_v5 = vshll.u32 %v443_v60, 16  ;;  %v446_v6 = vld [vmem:[%s2243_s26 + $0x30] sm:$0xf]  ;;  %s1806_s20 = sshll.u32 %s2235_s22, 1 }
  0x1d   : > { %2037 = vmatpush3.bf16.msra.mxu1 %v713_v13  ;;  %v466_v56 = vsel %vm2285_vm4, %v461_v48, %v465_v30  ;;  %v502_v57 = vor.u32 %v501_v51, %v498_v50  ;;  %2022 = vmatprep.mubr.msk.bf16.mxu1 %vm252_vm1, %v2139_v52  ;;  %v480_v61 = vsel %vm2285_vm4, %v475_v53, %v479_v34  ;;  %v524_v9 = vshrl.u32 %v444_v63, 16  ;;  %v447_v11 = vld [vmem:[%s2243_s26 + $0x34] sm:$0x1]  ;;  %v448_v17 = vld [vmem:[%s2243_s26 + $0x38] sm:$0xf]  ;;  %s203_s24 = scalar_lea.vmem %s2528_s3, %s1806_s20 }
  0x1e   : > { %2104 = vmatprep.subr.msk.bf16.mxu1 %vm265_vm0, %v2281_v38  ;;  %v489_v62 = vrot.slane %v488_v54, 4  ;;  %v1833_v2 = vcombine.low %v466_v56, %v480_v61  ;;  %v512_v8 = vrot.slane %v510_v1, 4  ;;  %v527_v10 = vshll.u32 %v444_v63, 16  ;;  %v1908_v18 = vld [vmem:[%s2526_s1 + $0x18] sm:$0xf] }
  0x1f   : > { %v503_v3 = vrot.slane %v502_v57, 4  ;;  %v515_v13 = vrot.slane %v513_v4, 5  ;;  %v521_v15 = vrot.slane %v519_v5, 5  ;;  %v533_v16 = vshll.u32 %v445_v0, 16  ;;  %v449_v22 = vld [vmem:[%s2243_s26 + $0x3c] sm:$0x1] }
  0x20   : > { %v494_v7 = vsel %vm2285_vm4, %v489_v62, %v493_v49  ;;  %2028 = vmatprep.mubr.msk.bf16.mxu0 %vm252_vm1, %v1833_v2  ;;  %v526_v20 = vrot.slane %v524_v9, 4  ;;  %v529_v21 = vrot.slane %v527_v10, 5  ;;  %v538_v23 = vshrl.u32 %v446_v6, 16  ;;  %v2141_v35 = vld [vmem:[%s2243_s26 + $0x90] ss:$8 sps:$4 sm:$0xff]  }
  0x21   : > { %v508_v12 = vsel %vm2285_vm4, %v503_v3, %v507_v55  ;;  %v516_v24 = vor.u32 %v515_v13, %v512_v8  ;;  %v535_v25 = vrot.slane %v533_v16, 5  ;;  %v541_v26 = vshll.u32 %v446_v6, 16  ;;  %v2142_v44 = vld [vmem:[%s2243_s26 + $0xa0] ss:$8 sps:$4 sm:$0xff]   ;;  %v1925_v51 = vld [vmem:[%s2526_s1 + $0x1c] sm:$0xf] }
  0x22   : > { %v1834_v19 = vcombine.low %v494_v7, %v508_v12  ;;  %v547_v27 = vshll.u32 %v447_v11, 16  ;;  %v530_v28 = vor.u32 %v529_v21, %v526_v20  ;;  %v540_v29 = vrot.slane %v538_v23, 4  ;;  %v2145_v53 = vld [vmem:[%s2243_s26 + $0xb0] ss:$8 sps:$4 sm:$0xff]   ;;  %v2146_v57 = vld [vmem:[%s2243_s26 + $0xc0] ss:$8 sps:$4 sm:$0xff]  }
  0x23   : > { %v552_v30 = vshrl.u32 %v448_v17, 16  ;;  %v555_v31 = vshll.u32 %v448_v17, 16  ;;  %v517_v32 = vrot.slane %v516_v24, 4  ;;  %v543_v33 = vrot.slane %v541_v26, 5  ;;  %v1876_v59 = vld [vmem:[%s2243_s26 + $0x94] sm:$0x1] }
  0x24   : > { %2023 = vmatmul.mubr.msk.bf16.gmra.mxu1 %vm252_vm1, %v2140_v58  ;;  %2029 = vmatmul.mubr.msk.bf16.vlgmr.msra.gmra.mxu0 %vm252_vm1, %v1834_v19  ;;  %v561_v34 = vshll.u32 %v449_v22, 16  ;;  %v531_v36 = vrot.slane %v530_v28, 4  ;;  %v549_v42 = vrot.slane %v547_v27, 5  ;;  %v1064_v49 = vsel %vm265_vm0, %v2281_v38, 0  ;;  %v2143_v38 = vld [vmem:[%s2243_s26 + $0xd8] ss:$8 sps:$4 sm:$0xff]  }
  0x25   : > { %2047 = vmatpush3.bf16.msra.mxu0 %v2264_v14  ;;  %v554_v37 = vrot.slane %v552_v30, 4  ;;  %v557_v39 = vrot.slane %v555_v31, 5  ;;  %v522_v40 = vsel %vm2285_vm4, %v517_v32, %v521_v15  ;;  %v544_v41 = vor.u32 %v543_v33, %v540_v29  ;;  %2038 = vmatprep.mubr.msk.bf16.mxu1 %vm252_vm1, %v2141_v35  ;;  %v1875_v58 = vld [vmem:[%s2243_s26 + $0x90] sm:$0xf]  ;;  %v1877_v60 = vld [vmem:[%s2243_s26 + $0x98] sm:$0xf] }
  0x26   : > { %2105 = vmatprep.subr.msk.bf16.mxu0 %vm265_vm0, %v1908_v18  ;;  %v536_v14 = vsel %vm2285_vm4, %v531_v36, %v535_v25  ;;  %v563_v46 = vrot.slane %v561_v34, 5  ;;  %v1186_v56 = vsel %vm265_vm0, %v1908_v18, 0  ;;  %v1878_v61 = vld [vmem:[%s2243_s26 + $0x9c] sm:$0x1]  ;;  %v926_v62 = vshrl.u32 %v1875_v58, 16 }
  0x27   : > { %v558_v45 = vor.u32 %v557_v39, %v554_v37  ;;  %v1835_v47 = vcombine.low %v522_v40, %v536_v14  ;;  %v545_v48 = vrot.slane %v544_v41, 4  ;;  %v929_v63 = vshll.u32 %v1875_v58, 16  ;;  %v1879_v2 = vld [vmem:[%s2243_s26 + $0xa0] sm:$0xf]  ;;  %v2144_v3 = vld [vmem:[%s2243_s26 + $0xe8] ss:$8 sps:$4 sm:$0xff]  }
  0x28   : > { %v935_v0 = vshll.u32 %v1876_v59, 16  ;;  %v940_v1 = vshrl.u32 %v1877_v60, 16  ;;  %v943_v4 = vshll.u32 %v1877_v60, 16  ;;  %v949_v5 = vshll.u32 %v1878_v61, 16  ;;  %v1880_v6 = vld [vmem:[%s2243_s26 + $0xa4] sm:$0x1] }
  0x29   : > { %v559_v50 = vrot.slane %v558_v45, 4  ;;  %2032 = vmatprep.mubr.msk.bf16.mxu0 %vm252_vm1, %v1835_v47  ;;  %v550_v52 = vsel %vm2285_vm4, %v545_v48, %v549_v42  ;;  %v1881_v7 = vld [vmem:[%s2243_s26 + $0xa8] sm:$0xf]  ;;  %v2147_v8 = vld [vmem:[%s2243_s26 + $0xf8] ss:$8 sps:$4 sm:$0xff]   ;;  %v928_v9 = vrot.slane %v926_v62, 4 }
  0x2a   : > { %v931_v10 = vrot.slane %v929_v63, 5  ;;  %v937_v11 = vrot.slane %v935_v0, 5  ;;  %v942_v12 = vrot.slane %v940_v1, 4  ;;  %v1882_v13 = vld [vmem:[%s2243_s26 + $0xac] sm:$0x1]  ;;  %v945_v15 = vrot.slane %v943_v4, 5 }
  0x2b   : > { %v564_v54 = vsel %vm2285_vm4, %v559_v50, %v563_v46  ;;  %v951_v16 = vrot.slane %v949_v5, 5  ;;  %v954_v17 = vshrl.u32 %v1879_v2, 16  ;;  %v957_v18 = vshll.u32 %v1879_v2, 16  ;;  %v2359_v27 = vld [vmem:[%s2526_s1 + $0x20] sm:$0xf] }
  0x2c   : > { %2039 = vmatmul.mubr.msk.bf16.vlgmr.msra.gmra.mxu1 %vm252_vm1, %v2142_v44  ;;  %v1836_v55 = vcombine.low %v550_v52, %v564_v54  ;;  %v932_v19 = vor.u32 %v931_v10, %v928_v9  ;;  %v963_v20 = vshll.u32 %v1880_v6, 16  ;;  %v968_v21 = vshrl.u32 %v1881_v7, 16  ;;  %v1883_v39 = vld [vmem:[%s2243_s26 + $0xb0] sm:$0xf]  ;;  %v1884_v40 = vld [vmem:[%s2243_s26 + $0xb4] sm:$0x1] }
  0x2d   : > { %2057 = vmatpush3.bf16.msra.mxu1 %v1064_v49  ;;  %2042 = vmatprep.mubr.msk.bf16.mxu1 %vm252_vm1, %v2145_v53  ;;  %v971_v22 = vshll.u32 %v1881_v7, 16  ;;  %v946_v23 = vor.u32 %v945_v15, %v942_v12  ;;  %v956_v24 = vrot.slane %v954_v17, 4  ;;  %v959_v25 = vrot.slane %v957_v18, 5  ;;  %v1885_v41 = vld [vmem:[%s2243_s26 + $0xb8] sm:$0xf] }
  0x2e   : > { %2106 = vmatprep.subr.msk.bf16.mxu1 %vm265_vm0, %v1925_v51  ;;  %2033 = vmatmul.mubr.msk.bf16.gmra.mxu0 %vm252_vm1, %v1836_v55  ;;  %v977_v26 = vshll.u32 %v1882_v13, 16  ;;  %v933_v28 = vrot.slane %v932_v19, 4  ;;  %v970_v29 = vrot.slane %v968_v21, 4  ;;  %v1307_v31 = vsel %vm265_vm0, %v1925_v51, 0  ;;  %v2148_v42 = vld [vmem:[%s2243_s26 + $0x108] ss:$8 sps:$4 sm:$0xff]  }
  0x2f   : > { %2048 = vmatprep.mubr.msk.bf16.mxu0 %vm252_vm1, %v2143_v38  ;;  %v973_v30 = vrot.slane %v971_v22, 5  ;;  %v947_v32 = vrot.slane %v946_v23, 4  ;;  %v960_v33 = vor.u32 %v959_v25, %v956_v24  ;;  %v965_v34 = vrot.slane %v963_v20, 5  ;;  %v1886_v45 = vld [vmem:[%s2243_s26 + $0xbc] sm:$0x1] }
  0x30   : > { %v979_v35 = vrot.slane %v977_v26, 5  ;;  %v938_v36 = vsel %vm2285_vm4, %v933_v28, %v937_v11  ;;  %v982_v46 = vshrl.u32 %v1883_v39, 16  ;;  %v985_v47 = vshll.u32 %v1883_v39, 16  ;;  %v2149_v50 = vld [vmem:[%s2243_s26 + $0x8] ss:$8 sps:$4 sm:$0xff]  }
  0x31   : > { %v974_v37 = vor.u32 %v973_v30, %v970_v29  ;;  %v952_v44 = vsel %vm2285_vm4, %v947_v32, %v951_v16  ;;  %v961_v14 = vrot.slane %v960_v33, 4  ;;  %v991_v51 = vshll.u32 %v1884_v40, 16  ;;  %v1887_v53 = vld [vmem:[%s2243_s26 + $0xc0] sm:$0xf]  ;;  %v1889_v62 = vld [vmem:[%s2243_s26 + $0xc8] sm:$0xf] }
  0x32   : > { %v1892_v48 = vcombine.low %v938_v36, %v952_v44  ;;  %v996_v52 = vshrl.u32 %v1885_v41, 16  ;;  %v984_v38 = vrot.slane %v982_v46, 4  ;;  %v987_v55 = vrot.slane %v985_v47, 5  ;;  %v1890_v2 = vld [vmem:[%s2243_s26 + $0xcc] sm:$0x1] }
  0x33   : > { %v975_v49 = vrot.slane %v974_v37, 4  ;;  %v966_v54 = vsel %vm2285_vm4, %v961_v14, %v965_v34  ;;  %v993_v59 = vrot.slane %v991_v51, 5  ;;  %v1005_v61 = vshll.u32 %v1886_v45, 16  ;;  %v2150_v16 = vld [vmem:[%s2243_s26 + $0x18] ss:$8 sps:$4 sm:$0xff]  }
  0x34   : > { %2043 = vmatmul.mubr.msk.bf16.gmra.mxu1 %vm252_vm1, %v2146_v57  ;;  %v1888_v57 = vld [vmem:[%s2243_s26 + $0xc4] sm:$0x1]  ;;  %v998_v60 = vrot.slane %v996_v52, 4  ;;  %v988_v0 = vor.u32 %v987_v55, %v984_v38  ;;  %v1013_v5 = vshll.u32 %v1887_v53, 16  ;;  %v1024_v7 = vshrl.u32 %v1889_v62, 16 }
  0x35   : > { %2058 = vmatprep.mubr.msk.bf16.mxu1 %vm252_vm1, %v1892_v48  ;;  %v980_v58 = vsel %vm2285_vm4, %v975_v49, %v979_v35  ;;  %v1007_v4 = vrot.slane %v1005_v61, 5  ;;  %v1019_v6 = vshll.u32 %v1888_v57, 16  ;;  %v1027_v11 = vshll.u32 %v1889_v62, 16  ;;  %v2151_v29 = vld [vmem:[%s2243_s26 + $0x28] ss:$8 sps:$4 sm:$0xff]  }
  0x36   : > { %2049 = vmatmul.mubr.msk.bf16.vlgmr.msra.gmra.mxu0 %vm252_vm1, %v2144_v3  ;;  %v1893_v63 = vcombine.low %v966_v54, %v980_v58  ;;  %v1010_v3 = vshrl.u32 %v1887_v53, 16  ;;  %v1015_v12 = vrot.slane %v1013_v5, 5  ;;  %v1026_v13 = vrot.slane %v1024_v7, 4  ;;  %v1934_v30 = vld [vmem:[%s2243_s26 + $0x8] sm:$0xf] }
  0x37   : > { %2067 = vmatpush3.bf16.msra.mxu0 %v1186_v56  ;;  %2052 = vmatprep.mubr.msk.bf16.mxu0 %vm252_vm1, %v2147_v8  ;;  %v999_v56 = vshll.u32 %v1885_v41, 16  ;;  %v989_v8 = vrot.slane %v988_v0, 4  ;;  %v1033_v15 = vshll.u32 %v1890_v2, 16  ;;  %v1029_v19 = vrot.slane %v1027_v11, 5  ;;  %v2153_v32 = vld [vmem:[%s2243_s26 + $0x50] ss:$8 sps:$4 sm:$0xff]  }
  0x38   : > { %2107 = vmatprep.subr.msk.bf16.mxu0 %vm265_vm0, %v2359_v27  ;;  %v1012_v10 = vrot.slane %v1010_v3, 4  ;;  %v1021_v21 = vrot.slane %v1019_v6, 5  ;;  %v1537_v25 = vsel %vm265_vm0, %v2359_v27, 0  ;;  %v1935_v33 = vld [vmem:[%s2243_s26 + $0xc] sm:$0x1]  ;;  %v1399_v35 = vshrl.u32 %v1934_v30, 16 }
  0x39   : > { %v1001_v1 = vrot.slane %v999_v56, 5  ;;  %v994_v17 = vsel %vm2285_vm4, %v989_v8, %v993_v59  ;;  %v1030_v23 = vor.u32 %v1029_v19, %v1026_v13  ;;  %v1035_v24 = vrot.slane %v1033_v15, 5  ;;  %v1936_v34 = vld [vmem:[%s2243_s26 + $0x10] sm:$0xf]  ;;  %v1937_v37 = vld [vmem:[%s2243_s26 + $0x14] sm:$0x1] }
  0x3a   : > { %v1016_v20 = vor.u32 %v1015_v12, %v1012_v10  ;;  %v1402_v39 = vshll.u32 %v1934_v30, 16  ;;  %v1408_v27 = vshll.u32 %v1935_v33, 16  ;;  %v1413_v40 = vshrl.u32 %v1936_v34, 16  ;;  %v1938_v45 = vld [vmem:[%s2243_s26 + $0x18] sm:$0xf] }
  0x3b   : > { %v1002_v9 = vor.u32 %v1001_v1, %v998_v60  ;;  %v1416_v44 = vshll.u32 %v1936_v34, 16  ;;  %v1422_v14 = vshll.u32 %v1937_v37, 16  ;;  %v2152_v51 = vld [vmem:[%s2243_s26 + $0x38] ss:$8 sps:$4 sm:$0xff]   ;;  %v1941_v38 = vld [vmem:[%s2243_s26 + $0x24] sm:$0x1] }
  0x3c   : > { %2059 = vmatmul.mubr.msk.bf16.vlgmr.msra.gmra.mxu1 %vm252_vm1, %v1893_v63  ;;  %v1017_v28 = vrot.slane %v1016_v20, 4  ;;  %v1404_v47 = vrot.slane %v1402_v39, 5  ;;  %v1410_v48 = vrot.slane %v1408_v27, 5  ;;  %v1415_v49 = vrot.slane %v1413_v40, 4  ;;  %v1940_v54 = vld [vmem:[%s2243_s26 + $0x20] sm:$0xf] }
  0x3d   : > { %2077 = vmatpush3.bf16.msra.mxu1 %v1307_v31  ;;  %v1003_v18 = vrot.slane %v1002_v9, 4  ;;  %v1031_v31 = vrot.slane %v1030_v23, 4  ;;  %v1418_v52 = vrot.slane %v1416_v44, 5  ;;  %v1424_v53 = vrot.slane %v1422_v14, 5  ;;  %v2154_v63 = vld [vmem:[%s2243_s26 + $0x60] ss:$8 sps:$4 sm:$0xff]  }
  0x3e   : > { %2053 = vmatmul.mubr.msk.bf16.gmra.mxu0 %vm252_vm1, %v2148_v42  ;;  %v1022_v36 = vsel %vm2285_vm4, %v1017_v28, %v1021_v21  ;;  %v1401_v42 = vrot.slane %v1399_v35, 4  ;;  %v1427_v56 = vshrl.u32 %v1938_v45, 16  ;;  %v1430_v57 = vshll.u32 %v1938_v45, 16  ;;  %v2155_v6 = vld [vmem:[%s2243_s26 + $0x70] ss:$8 sps:$4 sm:$0xff]  }
  0x3f   : > { %2068 = vmatprep.mubr.msk.bf16.mxu0 %vm252_vm1, %v2149_v50  ;;  %v1008_v22 = vsel %vm2285_vm4, %v1003_v18, %v1007_v4  ;;  %v1036_v41 = vsel %vm2285_vm4, %v1031_v31, %v1035_v24  ;;  %v1939_v50 = vld [vmem:[%s2243_s26 + $0x1c] sm:$0x1]  ;;  %v1419_v59 = vor.u32 %v1418_v52, %v1415_v49  ;;  %v1441_v60 = vshrl.u32 %v1940_v54, 16  ;;  %v1942_v11 = vld [vmem:[%s2243_s26 + $0x28] sm:$0xf] }
  0x40   : > { %v1894_v26 = vcombine.low %v994_v17, %v1008_v22  ;;  %v1895_v46 = vcombine.low %v1022_v36, %v1036_v41  ;;  %v1405_v55 = vor.u32 %v1404_v47, %v1401_v42  ;;  %v1436_v58 = vshll.u32 %v1939_v50, 16  ;;  %v1943_v15 = vld [vmem:[%s2243_s26 + $0x2c] sm:$0x1]  ;;  %v1945_v17 = vld [vmem:[%s2243_s26 + $0x34] sm:$0x1] }
  0x41   : > { %v1444_v61 = vshll.u32 %v1940_v54, 16  ;;  %v1450_v62 = vshll.u32 %v1941_v38, 16  ;;  %v1429_v1 = vrot.slane %v1427_v56, 4  ;;  %v1432_v2 = vrot.slane %v1430_v57, 5  ;;  %v1946_v22 = vld [vmem:[%s2243_s26 + $0x38] sm:$0xf] }
  0x42   : > { %2062 = vmatprep.mubr.msk.bf16.mxu1 %vm252_vm1, %v1894_v26  ;;  %v1406_v0 = vrot.slane %v1405_v55, 4  ;;  %v1420_v3 = vrot.slane %v1419_v59, 4  ;;  %v1443_v4 = vrot.slane %v1441_v60, 4  ;;  %v1438_v9 = vrot.slane %v1436_v58, 5  ;;  %v1947_v28 = vld [vmem:[%s2243_s26 + $0x3c] sm:$0x1] }
  0x43   : > { %v1446_v5 = vrot.slane %v1444_v61, 5  ;;  %v1433_v8 = vor.u32 %v1432_v2, %v1429_v1  ;;  %v1452_v10 = vrot.slane %v1450_v62, 5  ;;  %v1455_v20 = vshrl.u32 %v1942_v11, 16  ;;  %v1948_v33 = vld [vmem:[%s2243_s26 + $0x40] sm:$0xf] }
  0x44   : > { %2063 = vmatmul.mubr.msk.bf16.gmra.mxu1 %vm252_vm1, %v1895_v46  ;;  %v1411_v7 = vsel %vm2285_vm4, %v1406_v0, %v1410_v48  ;;  %v1425_v12 = vsel %vm2285_vm4, %v1420_v3, %v1424_v53  ;;  %v1458_v21 = vshll.u32 %v1942_v11, 16  ;;  %v1464_v24 = vshll.u32 %v1943_v15, 16  ;;  %v1949_v39 = vld [vmem:[%s2243_s26 + $0x44] sm:$0x1]  ;;  %v2156_v47 = vld [vmem:[%s2243_s26 + $0x80] ss:$8 sps:$4 sm:$0xff]  }
  0x45   : > { %2078 = vmatprep.mubr.msk.bf16.mxu1 %vm252_vm1, %v2153_v32  ;;  %v1447_v13 = vor.u32 %v1446_v5, %v1443_v4  ;;  %v1951_v18 = vcombine.low %v1411_v7, %v1425_v12  ;;  %v1434_v19 = vrot.slane %v1433_v8, 4  ;;  %v1457_v30 = vrot.slane %v1455_v20, 4 }
  0x46   : > { %2069 = vmatmul.mubr.msk.bf16.vlgmr.msra.gmra.mxu0 %vm252_vm1, %v2150_v16  ;;  %v1944_v16 = vld [vmem:[%s2243_s26 + $0x30] sm:$0xf]  ;;  %v1460_v31 = vrot.slane %v1458_v21, 5  ;;  %v1478_v32 = vshll.u32 %v1945_v17, 16  ;;  %v1466_v35 = vrot.slane %v1464_v24, 5  ;;  %v1483_v42 = vshrl.u32 %v1946_v22, 16 }
  0x47   : > { %2087 = vmatpush3.bf16.msra.mxu0 %v1537_v25  ;;  %2072 = vmatprep.mubr.msk.bf16.mxu0 %vm252_vm1, %v2151_v29  ;;  %v1448_v23 = vrot.slane %v1447_v13, 4  ;;  %v1469_v25 = vshrl.u32 %v1944_v16, 16  ;;  %v1472_v26 = vshll.u32 %v1944_v16, 16  ;;  %v1439_v29 = vsel %vm2285_vm4, %v1434_v19, %v1438_v9 }
  0x48   : > { %v1461_v40 = vor.u32 %v1460_v31, %v1457_v30  ;;  %v1480_v41 = vrot.slane %v1478_v32, 5  ;;  %v1486_v14 = vshll.u32 %v1946_v22, 16  ;;  %v1492_v45 = vshll.u32 %v1947_v28, 16 }
  0x49   : > { %v1453_v34 = vsel %vm2285_vm4, %v1448_v23, %v1452_v10  ;;  %v1471_v36 = vrot.slane %v1469_v25, 4  ;;  %v1474_v37 = vrot.slane %v1472_v26, 5  ;;  %v1497_v46 = vshrl.u32 %v1948_v33, 16 }
  0x4a   : > { %v1952_v27 = vcombine.low %v1439_v29, %v1453_v34  ;;  %v1462_v48 = vrot.slane %v1461_v40, 4  ;;  %v1485_v49 = vrot.slane %v1483_v42, 4  ;;  %v1500_v50 = vshll.u32 %v1948_v33, 16 }
  0x4b   : > { %v1475_v44 = vor.u32 %v1474_v37, %v1471_v36  ;;  %v1488_v53 = vrot.slane %v1486_v14, 5  ;;  %v1499_v54 = vrot.slane %v1497_v46, 4  ;;  %v1494_v58 = vrot.slane %v1492_v45, 5 }
  0x4c   : > { %2079 = vmatmul.mubr.msk.bf16.vlgmr.msra.gmra.mxu1 %vm252_vm1, %v2154_v63  ;;  %v1467_v38 = vsel %vm2285_vm4, %v1462_v48, %v1466_v35  ;;  %v1502_v55 = vrot.slane %v1500_v50, 5 }
  0x4d   : > { %2082 = vmatprep.mubr.msk.bf16.mxu1 %vm252_vm1, %v2155_v6  ;;  %v1476_v52 = vrot.slane %v1475_v44, 4  ;;  %v1489_v57 = vor.u32 %v1488_v53, %v1485_v49 }
  0x4e   : > { %2073 = vmatmul.mubr.msk.bf16.gmra.mxu0 %vm252_vm1, %v2152_v51  ;;  %v1506_v51 = vshll.u32 %v1949_v39, 16  ;;  %v1503_v60 = vor.u32 %v1502_v55, %v1499_v54 }
  0x4f   : > { %2088 = vmatprep.mubr.msk.bf16.mxu0 %vm252_vm1, %v1951_v18  ;;  %v1481_v56 = vsel %vm2285_vm4, %v1476_v52, %v1480_v41  ;;  %v1490_v62 = vrot.slane %v1489_v57, 4 }
  0x50   : > { %v1953_v59 = vcombine.low %v1467_v38, %v1481_v56  ;;  %v1508_v61 = vrot.slane %v1506_v51, 5  ;;  %v1504_v63 = vrot.slane %v1503_v60, 4 }
  0x51   : > { %v1495_v0 = vsel %vm2285_vm4, %v1490_v62, %v1494_v58 }
  0x52   : > { %v1509_v1 = vsel %vm2285_vm4, %v1504_v63, %v1508_v61 }
  0x53   : > { %v1954_v2 = vcombine.low %v1495_v0, %v1509_v1 }
  0x54   : > { %2083 = vmatmul.mubr.msk.bf16.gmra.mxu1 %vm252_vm1, %v2156_v47 }
  0x56   : > { %2089 = vmatmul.mubr.msk.bf16.vlgmr.msra.gmra.mxu0 %vm252_vm1, %v1952_v27 }
  0x57   : > { %2092 = vmatprep.mubr.msk.bf16.mxu0 %vm252_vm1, %v1953_v59 }
  0x5e   : > { %2093 = vmatmul.mubr.msk.bf16.gmra.mxu0 %vm252_vm1, %v1954_v2 }
  0xd3   : > { %v2010_v5 = vpop.f32.mrf.mxu0 }
  0xd4   : > { %v2014_v3 = vpop.f32.mrf.mxu1 }
  0xd5   : > { %v303_v8 = vpop.f32.mrf.mxu0 }
  0xd6   : > { %v2450_v4 = vpop.f32.mrf.mxu1 }
  0xd7   : > { %v2011_v11 = vpop.f32.mrf.mxu0 }
  0xd8   : > { %v2452_v6 = vpop.f32.mrf.mxu1 }
  0xd9   : > { %v306_v15 = vpop.f32.mrf.mxu0 }
  0xda   : > { %v2454_v7 = vpop.f32.mrf.mxu1 }
  0xdc   : > { %v2020_v9 = vpop.f32.mrf.mxu1 }
  0xdd   : > { %v412_v14 = vadd.f32 %v2020_v9, %v2010_v5 }
  0xde   : > { %v403_v10 = vpop.f32.mrf.mxu1 }
  0xdf   : > { %v404_v47 = vadd.f32 %v403_v10, %v303_v8 }
  0xe0   : > { %v2021_v12 = vpop.f32.mrf.mxu1 }
  0xe1   : > { %v415_v50 = vadd.f32 %v2021_v12, %v2011_v11 }
  0xe2   : > { %v406_v13 = vpop.f32.mrf.mxu1 }
  0xe3   : > { %v407_v54 = vadd.f32 %v406_v13, %v306_v15 }
  0xe4   : > { %v2024_v43 = vpop.f32.mrf.mxu1  ;;  %v2030_v16 = vpop.f32.mrf.mxu0 }
  0xe5   : > { %v661_v49 = vadd.f32 %v2030_v16, %v412_v14  ;;  %v428_v61 = vadd.f32 %v2024_v43, %v2014_v3 }
  0xe6   : > { %v419_v17 = vpop.f32.mrf.mxu1  ;;  %v628_v18 = vpop.f32.mrf.mxu0 }
  0xe7   : > { %v659_v53 = vadd.f32 %v628_v18, %v404_v47  ;;  %v420_v1 = vadd.f32 %v419_v17, %v2450_v4 }
  0xe8   : > { %v2025_v19 = vpop.f32.mrf.mxu1  ;;  %v2031_v20 = vpop.f32.mrf.mxu0 }
  0xe9   : > { %v662_v56 = vadd.f32 %v2031_v20, %v415_v50  ;;  %v431_v11 = vadd.f32 %v2025_v19, %v2452_v6 }
  0xea   : > { %v422_v21 = vpop.f32.mrf.mxu1  ;;  %v631_v22 = vpop.f32.mrf.mxu0 }
  0xeb   : > { %v660_v60 = vadd.f32 %v631_v22, %v407_v54  ;;  %v423_v43 = vadd.f32 %v422_v21, %v2454_v7 }
  0xec   : > { %v2040_v23 = vpop.f32.mrf.mxu1 }
  0xed   : > { %v782_v38 = vadd.f32 %v2040_v23, %v661_v49 }
  0xee   : > { %v749_v24 = vpop.f32.mrf.mxu1  ;;  %v2034_v25 = vpop.f32.mrf.mxu0 }
  0xef   : > { %v780_v57 = vadd.f32 %v749_v24, %v659_v53  ;;  %v665_v13 = vadd.f32 %v2034_v25, %v428_v61 }
  0xf0   : > { %v2041_v26 = vpop.f32.mrf.mxu1  ;;  %v644_v28 = vpop.f32.mrf.mxu0 }
  0xf1   : > { %v783_v63 = vadd.f32 %v2041_v26, %v662_v56  ;;  %v663_v3 = vadd.f32 %v644_v28, %v420_v1 }
  0xf2   : > { %v752_v29 = vpop.f32.mrf.mxu1  ;;  %v2035_v30 = vpop.f32.mrf.mxu0 }
  0xf3   : > { %v781_v8 = vadd.f32 %v752_v29, %v660_v60  ;;  %v666_v26 = vadd.f32 %v2035_v30, %v431_v11 }
  0xf4   : > { %v2044_v31 = vpop.f32.mrf.mxu1  ;;  %v2456_v32 = vpop.f32.mrf.mxu0 }
  0xf5   : > { %v786_v23 = vadd.f32 %v2044_v31, %v665_v13 }
  0xf6   : > { %v765_v33 = vpop.f32.mrf.mxu1  ;;  %v2050_v34 = vpop.f32.mrf.mxu0 }
  0xf7   : > { %v903_v62 = vadd.f32 %v2050_v34, %v782_v38  ;;  %v784_v29 = vadd.f32 %v765_v33, %v663_v3 }
  0xf8   : > { %v2458_v35 = vpop.f32.mrf.mxu1  ;;  %v870_v36 = vpop.f32.mrf.mxu0 }
  0xf9   : > { %v901_v5 = vadd.f32 %v870_v36, %v780_v57  ;;  %v787_v28 = vadd.f32 %v2458_v35, %v666_v26 }
  0xfa   : > { %v2051_v37 = vpop.f32.mrf.mxu0  ;;  %v2460_v39 = vpop.f32.mrf.mxu1 }
  0xfb   : > { %v904_v15 = vadd.f32 %v2051_v37, %v783_v63  ;;  %v664_v37 = vadd.f32 %v2456_v32, %v423_v43 }
  0xfc   : > { %v873_v27 = vpop.f32.mrf.mxu0  ;;  %v2060_v41 = vpop.f32.mrf.mxu1 }
  0xfd   : > { %v1133_v9 = vadd.f32 %v2060_v41, %v903_v62  ;;  %v902_v22 = vadd.f32 %v873_v27, %v781_v8  ;;  %v785_v14 = vadd.f32 %v2460_v39, %v664_v37 }
  0xfe   : > { %v2054_v40 = vpop.f32.mrf.mxu0  ;;  %v1100_v44 = vpop.f32.mrf.mxu1 }
  0xff   : > { %v1131_v16 = vadd.f32 %v1100_v44, %v901_v5  ;;  %v907_v7 = vadd.f32 %v2054_v40, %v786_v23 }
 0x100   : > { %v886_v42 = vpop.f32.mrf.mxu0  ;;  %v2061_v46 = vpop.f32.mrf.mxu1 }
 0x101   : > { %v1134_v17 = vadd.f32 %v2061_v46, %v904_v15  ;;  %v905_v44 = vadd.f32 %v886_v42, %v784_v29 }
 0x102   : > { %v2462_v45 = vpop.f32.mrf.mxu0  ;;  %v1103_v51 = vpop.f32.mrf.mxu1 }
 0x103   : > { %v1132_v6 = vadd.f32 %v1103_v51, %v902_v22  ;;  %v908_v40 = vadd.f32 %v2462_v45, %v787_v28 }
 0x104   : > { %v2464_v48 = vpop.f32.mrf.mxu0  ;;  %v2064_v58 = vpop.f32.mrf.mxu1 }
 0x105   : > { %v1137_v32 = vadd.f32 %v2064_v58, %v907_v7 }
 0x106   : > { %v2070_v52 = vpop.f32.mrf.mxu0  ;;  %v1116_v0 = vpop.f32.mrf.mxu1 }
 0x107   : > { %v1255_v4 = vadd.f32 %v2070_v52, %v1133_v9  ;;  %v1135_v50 = vadd.f32 %v1116_v0, %v905_v44  ;;  %v906_v52 = vadd.f32 %v2464_v48, %v785_v14 }
 0x108   : > { %v1222_v55 = vpop.f32.mrf.mxu0  ;;  %v2065_v10 = vpop.f32.mrf.mxu1 }
 0x109   : > { %v1253_v36 = vadd.f32 %v1222_v55, %v1131_v16  ;;  %v1138_v53 = vadd.f32 %v2065_v10, %v908_v40 }
 0x10a   : > { %v2071_v59 = vpop.f32.mrf.mxu0  ;;  %v1119_v18 = vpop.f32.mrf.mxu1 }
 0x10b   : > { %v1256_v21 = vadd.f32 %v2071_v59, %v1134_v17  ;;  %v1136_v57 = vadd.f32 %v1119_v18, %v906_v52 }
 0x10c   : > { %v1225_v2 = vpop.f32.mrf.mxu0  ;;  %v2080_v24 = vpop.f32.mrf.mxu1 }
 0x10d   : > { %v1376_v19 = vadd.f32 %v2080_v24, %v1255_v4  ;;  %v1254_v33 = vadd.f32 %v1225_v2, %v1132_v6 }
 0x10e   : > { %v2074_v12 = vpop.f32.mrf.mxu0  ;;  %v1343_v25 = vpop.f32.mrf.mxu1 }
 0x10f   : > { %v1374_v27 = vadd.f32 %v1343_v25, %v1253_v36  ;;  %v1259_v38 = vadd.f32 %v2074_v12, %v1137_v32 }
 0x110   : > { %v1238_v20 = vpop.f32.mrf.mxu0  ;;  %v2081_v31 = vpop.f32.mrf.mxu1 }
 0x111   : > { %v1377_v35 = vadd.f32 %v2081_v31, %v1256_v21  ;;  %v1257_v59 = vadd.f32 %v1238_v20, %v1135_v50 }
 0x112   : > { %v2075_v34 = vpop.f32.mrf.mxu0  ;;  %v1346_v47 = vpop.f32.mrf.mxu1 }
 0x113   : > { %v1375_v42 = vadd.f32 %v1346_v47, %v1254_v33  ;;  %v1260_v63 = vadd.f32 %v2075_v34, %v1138_v53 }
 0x114   : > { %v1241_v41 = vpop.f32.mrf.mxu0  ;;  %v2084_v51 = vpop.f32.mrf.mxu1 }
 0x115   : > { %v1380_v61 = vadd.f32 %v2084_v51, %v1259_v38  ;;  %v1258_v8 = vadd.f32 %v1241_v41, %v1136_v57 }
 0x116   : > { %v2090_v30 = vpop.f32.mrf.mxu0  ;;  %v1359_v56 = vpop.f32.mrf.mxu1 }
 0x117   : > { %v1606_v46 = vadd.f32 %v2090_v30, %v1376_v19  ;;  %v1378_v5 = vadd.f32 %v1359_v56, %v1257_v59 }
 0x118   : > { %v1573_v49 = vpop.f32.mrf.mxu0  ;;  %v2085_v62 = vpop.f32.mrf.mxu1 }
 0x119   : > { %1614 = vst.msk [vmem:[%s2476_s19 + $0x10] sm:$0xff] %vm252_vm1, %v1606_v46  ;;  %v1604_v39 = vadd.f32 %v1573_v49, %v1374_v27  ;;  %v1645_v0 = vmul.f32 %v1606_v46, %v1606_v46  ;;  %v1623_v9 = vsel %vm252_vm1, %v1606_v46, 0.0  ;;  %v1381_v3 = vadd.f32 %v2085_v62, %v1260_v63 }
 0x11a   : > { %v2091_v54 = vpop.f32.mrf.mxu0  ;;  %v1362_v13 = vpop.f32.mrf.mxu1 }
 0x11b   : > { %1612 = vst.msk [vmem:[%s2476_s19] sm:$0xff] %vm252_vm1, %v1604_v39  ;;  %v1607_v55 = vadd.f32 %v2091_v54, %v1377_v35  ;;  %v1643_v45 = vmul.f32 %v1604_v39, %v1604_v39  ;;  %v1620_v48 = vsel %vm252_vm1, %v1604_v39, 0.0  ;;  %v1654_v23 = vsel %vm252_vm1, %v1645_v0, 0.0 }
 0x11c   : > { %v1576_v58 = vpop.f32.mrf.mxu0  ;;  %v1379_v24 = vadd.f32 %v1362_v13, %v1258_v8 }
 0x11d   : > { %1615 = vst.msk [vmem:[%s2476_s19 + $0x18] sm:$0xff] %vm252_vm1, %v1607_v55  ;;  %v1605_v60 = vadd.f32 %v1576_v58, %v1375_v42  ;;  %v1651_v10 = vsel %vm252_vm1, %v1643_v45, 0.0  ;;  %v1646_v15 = vmul.f32 %v1607_v55, %v1607_v55  ;;  %v1625_v4 = vsel %vm252_vm1, %v1607_v55, 0.0 }
 0x11e   : > { %v2094_v12 = vpop.f32.mrf.mxu0 }
 0x11f   : > { %1613 = vst.msk [vmem:[%s2476_s19 + $0x8] sm:$0xff] %vm252_vm1, %v1605_v60  ;;  %v1621_v1 = vsel %vm252_vm1, %v1605_v60, 0.0  ;;  %v1644_v2 = vmul.f32 %v1605_v60, %v1605_v60  ;;  %v1610_v18 = vadd.f32 %v2094_v12, %v1380_v61  ;;  %v1656_v36 = vsel %vm252_vm1, %v1646_v15, 0.0 }
 0x120   : > { %v1622_v11 = vadd.f32 %v1621_v1, %v1620_v48  ;;  %v1589_v22 = vpop.f32.mrf.mxu0 }
 0x121   : > { %v1652_v16 = vsel %vm252_vm1, %v1644_v2, 0.0  ;;  %1618 = vst.msk [vmem:[%s2476_s19 + $0x30] sm:$0xff] %vm252_vm1, %v1610_v18  ;;  %v1608_v17 = vadd.f32 %v1589_v22, %v1378_v5  ;;  %v1649_v31 = vmul.f32 %v1610_v18, %v1610_v18  ;;  %v1631_v33 = vsel %vm252_vm1, %v1610_v18, 0.0 }
 0x122   : > { %v1624_v43 = vadd.f32 %v1623_v9, %v1622_v11  ;;  %v1653_v20 = vadd.f32 %v1652_v16, %v1651_v10  ;;  %v2095_v34 = vpop.f32.mrf.mxu0 }
 0x123   : > { %1616 = vst.msk [vmem:[%s2476_s19 + $0x20] sm:$0xff] %vm252_vm1, %v1608_v17  ;;  %v1627_v6 = vsel %vm252_vm1, %v1608_v17, 0.0  ;;  %v1647_v19 = vmul.f32 %v1608_v17, %v1608_v17  ;;  %v1611_v25 = vadd.f32 %v2095_v34, %v1381_v3  ;;  %v1662_v40 = vsel %vm252_vm1, %v1649_v31, 0.0 }
 0x124   : > { %v1655_v26 = vadd.f32 %v1654_v23, %v1653_v20  ;;  %v1626_v29 = vadd.f32 %v1625_v4, %v1624_v43  ;;  %v1592_v41 = vpop.f32.mrf.mxu0 }
 0x125   : > { %v1658_v7 = vsel %vm252_vm1, %v1647_v19, 0.0  ;;  %1619 = vst.msk [vmem:[%s2476_s19 + $0x38] sm:$0xff] %vm252_vm1, %v1611_v25  ;;  %v1609_v21 = vadd.f32 %v1592_v41, %v1379_v24  ;;  %v1650_v32 = vmul.f32 %v1611_v25, %v1611_v25  ;;  %v1633_v49 = vsel %vm252_vm1, %v1611_v25, 0.0 }
 0x126   : > { %v1628_v37 = vadd.f32 %v1627_v6, %v1626_v29  ;;  %v1657_v28 = vadd.f32 %v1656_v36, %v1655_v26 }
 0x127   : > { %1617 = vst.msk [vmem:[%s2476_s19 + $0x28] sm:$0xff] %vm252_vm1, %v1609_v21  ;;  %v1629_v44 = vsel %vm252_vm1, %v1609_v21, 0.0  ;;  %v1648_v14 = vmul.f32 %v1609_v21, %v1609_v21  ;;  %v1664_v42 = vsel %vm252_vm1, %v1650_v32, 0.0 }
 0x128   : > { %v1659_v27 = vadd.f32 %v1658_v7, %v1657_v28  ;;  %v1630_v30 = vadd.f32 %v1629_v44, %v1628_v37 }
 0x129   : > { %v1660_v46 = vsel %vm252_vm1, %v1648_v14, 0.0 }
 0x12a   : > { %v1632_v35 = vadd.f32 %v1631_v33, %v1630_v30  ;;  %v1661_v47 = vadd.f32 %v1660_v46, %v1659_v27 }
 0x12c   : > { %v1634_v50 = vadd.f32 %v1633_v49, %v1632_v35  ;;  %v1663_v39 = vadd.f32 %v1662_v40, %v1661_v47 }
 0x12e   : > { %v1635_v51 = vrot.slane %v1634_v50, 4  ;;  %v1665_v52 = vadd.f32 %v1664_v42, %v1663_v39 }
 0x130   : > { %v1636_v53 = vadd.f32 %v1635_v51, %v1634_v50  ;;  %v1666_v54 = vrot.slane %v1665_v52, 4 }
 0x132   : > { %v1637_v38 = vrot.slane %v1636_v53, 2  ;;  %v1667_v55 = vadd.f32 %v1666_v54, %v1665_v52 }
 0x134   : > { %v1638_v56 = vadd.f32 %v1637_v38, %v1636_v53  ;;  %v1668_v57 = vrot.slane %v1667_v55, 2 }
 0x136   : > { %v1639_v45 = vrot.slane %v1638_v56, 1  ;;  %v1669_v58 = vadd.f32 %v1668_v57, %v1667_v55 }
 0x138   : > { %v1640_v59 = vadd.f32 %v1639_v45, %v1638_v56  ;;  %v1670_v60 = vrot.slane %v1669_v58, 1 }
 0x13a   : > { %1642 = vst.msk [vmem:[%s203_s24] sm:$0x1] %vm1641_vm5, %v1640_v59  ;;  %v1671_v61 = vadd.f32 %v1670_v60, %v1669_v58 }
 0x13c   : > { %1672 = vst.msk [vmem:[%s203_s24 + $0x1] sm:$0x1] %vm1641_vm5, %v1671_v61 }
 0x13d PF: > { %s14_s14 = sadd.s32 1, %s2179_s14   ;;  %s2531_s12 = smov %s2175_s13 }
 0x13e   : > { %p11_p6 = scmp.ge.s32.totalorder %s14_s14, 4   ;;  %s2532_s13 = smov %s2534_s15 }
 0x140   :  { %13 = sbr.rel (!%p11_p6) target bundleno = 2 (0x2), region = 84 }

</bundles_post_ra>
